<compile_context>
chip_gen: v7x
topology: tpu7x:2x2x1
jax: 0.10.0
libtpu: 0.0.40
codegen_flags: <defaults>
</compile_context>

<pallas_src>
import functools

import jax
import jax.numpy as jnp
import numpy as np
from jax.experimental import pallas as pl
from jax.experimental.pallas import tpu as pltpu

BN_EPS = 1e-5


def _round_up(x, m):
    return (x + m - 1) // m * m


def _ceil_div(a, b):
    return -(-a // b)


# ------------------------------ Pallas kernels ------------------------------

def _conv_gemm_kernel(w_ref, b_ref, a_ref, o_ref, *, relu):
    """o = act(W @ A + b): W (Cp,K) bf16, A (K,tm) bf16, b (Cp,1) f32, f32 MXU acc."""
    acc = jnp.dot(w_ref[...], a_ref[...], preferred_element_type=jnp.float32)
    acc = acc + b_ref[...]                       # VPU broadcast-add; VALU slots idle
    if relu:
        acc = jnp.maximum(acc, 0.0)
    o_ref[...] = acc.astype(o_ref.dtype)         # lane-dense unmasked store


def conv_gemm(wmat, bias, patches, *, relu, out_dtype, target_steps):
    """Lane-dense tiled GEMM over M = N*OH*OW. Returns ((Cp, Mp) result, M)."""
    Cp, K = wmat.shape
    M = patches.shape[1]
    steps = max(2, int(target_steps))            # >=2 so v7x's 2 TCs both get work
    tm = _round_up(max(1, _ceil_div(M, steps)), 128)
    steps = _ceil_div(M, tm)
    Mp = steps * tm
    a_pad = jnp.pad(patches, ((0, 0), (0, Mp - M)))
    out = pl.pallas_call(
        functools.partial(_conv_gemm_kernel, relu=relu),
        out_shape=jax.ShapeDtypeStruct((Cp, Mp), out_dtype),
        grid=(steps,),
        in_specs=[
            pl.BlockSpec((Cp, K), lambda i: (0, 0)),   # tiny weights, stay resident
            pl.BlockSpec((Cp, 1), lambda i: (0, 0)),   # folded BN/conv bias
            pl.BlockSpec((K, tm), lambda i: (0, i)),   # patch tile, M on lanes
        ],
        out_specs=pl.BlockSpec((Cp, tm), lambda i: (0, i)),
        compiler_params=pltpu.CompilerParams(
            dimension_semantics=("parallel",)),
    )(wmat, bias, a_pad)
    return out, M


def _tail_kernel(w2_ref, b2_ref, a2_ref, wl_ref, bl_ref, o_ref, *, n_samples, pp):
    """Fused conv2 GEMM + BN + ReLU + per-sample flatten + Linear(480, 3)."""
    acc = jnp.dot(w2_ref[...], a2_ref[...], preferred_element_type=jnp.float32)
    act = jnp.maximum(acc + b2_ref[...], 0.0)            # (8, n_samples*pp) f32
    wl = wl_ref[...]                                      # (3, 8, pp) f32
    cols = []
    for n in range(n_samples):                            # static, tiny (N=2)
        a_n = act[:, n * pp:(n + 1) * pp]                 # (8, pp) static slice
        prod = wl * a_n[None, :, :]                       # (3, 8, pp)
        s = jnp.sum(prod, axis=2)                         # (3, 8)  lane reduce
        cols.append(jnp.sum(s, axis=1, keepdims=True))    # (3, 1)
    o_ref[...] = jnp.concatenate(cols, axis=1) + bl_ref[...]   # (3, n_samples)


# -------------------------------- JAX glue ----------------------------------

def im2col_cnhw(x, kh, kw, stride, pad):
    """(C, N, H, W) -> patches (C*kh*kw, N*OH*OW) matching OIHW weight order.

    K lands on sublanes, M = N*OH*OW on lanes (lane-dense GEMM operand).
    """
    C, N, H, W = x.shape
    OH = (H + 2 * pad - kh) // stride + 1
    OW = (W + 2 * pad - kw) // stride + 1
    xp = jnp.pad(x, ((0, 0), (0, 0), (pad, pad), (pad, pad)))
    cols = []
    for i in range(kh):
        for j in range(kw):
            cols.append(xp[:, :, i:i + stride * (OH - 1) + 1:stride,
                              j:j + stride * (OW - 1) + 1:stride])
    patches = jnp.stack(cols, axis=1)                     # (C, kh*kw, N, OH, OW)
    return patches.reshape(C * kh * kw, N * OH * OW), OH, OW


def fold_bn(w, b, gamma, beta, rmean, rvar, cin_p, cout_p):
    """Fold eval-mode BN into conv weights/bias; zero-pad Cin/Cout for alignment."""
    cout, cin, kh, kw = w.shape
    scale = gamma / jnp.sqrt(rvar + BN_EPS)                        # (cout,)
    w4 = w * scale[:, None, None, None]
    w4 = jnp.pad(w4, ((0, cout_p - cout), (0, cin_p - cin), (0, 0), (0, 0)))
    wmat = w4.reshape(cout_p, cin_p * kh * kw).astype(jnp.bfloat16)
    fbias = jnp.pad(beta + scale * (b - rmean), (0, cout_p - cout))[:, None]
    return wmat, fbias.astype(jnp.float32)                 # pad bias rows are zero


def conv_bn_relu(x, w, b, gamma, beta, rmean, rvar, *, stride, pad, target_steps,
                 out_dtype=jnp.bfloat16):
    """Conv2d (PyTorch OIHW weights) + eval BN + ReLU on bf16 CNHW activations."""
    cin_p, N = x.shape[0], x.shape[1]
    cout_p = _round_up(w.shape[0], 8)
    wmat, fbias = fold_bn(w, b, gamma, beta, rmean, rvar, cin_p, cout_p)
    patches, OH, OW = im2col_cnhw(x, w.shape[2], w.shape[3], stride, pad)
    out, M = conv_gemm(wmat, fbias, patches, relu=True, out_dtype=out_dtype,
                       target_steps=target_steps)
    return out[:, :M].reshape(cout_p, N, OH, OW)            # keep padded 8 channels


def avgpool2x2_cnhw(x):
    """nn.AvgPool2d(2, 2) (floor mode) on CNHW; bandwidth-trivial XLA glue."""
    C, N, H, W = x.shape
    OH, OW = H // 2, W // 2
    xf = x[:, :, :2 * OH, :2 * OW].astype(jnp.float32)
    y = 0.25 * (xf[:, :, 0::2, 0::2] + xf[:, :, 0::2, 1::2]
                + xf[:, :, 1::2, 0::2] + xf[:, :, 1::2, 1::2])
    return y.astype(x.dtype)


def rpsnet_forward(x_seq, p):
    N = x_seq.shape[0]
    # temporal mean (trivial VPU work) -> bf16 CNHW activations before im2col
    x = jnp.mean(x_seq.astype(jnp.float32), axis=1)[None]           # (1, N, H, W)
    x = x.astype(jnp.bfloat16)
    x = conv_bn_relu(x, p['w0'], p['b0'], p['g0'], p['be0'], p['rm0'], p['rv0'],
                     stride=2, pad=2, target_steps=4)                # (8, N, 125, 200)
    x = conv_bn_relu(x, p['w1'], p['b1'], p['g1'], p['be1'], p['rm1'], p['rv1'],
                     stride=3, pad=3, target_steps=2)                # (8, N, 43, 68)
    x = avgpool2x2_cnhw(x)                                           # (8, N, 21, 34)

    # fused tail: conv2 + BN + ReLU (+ dropout = identity) + flatten + Linear
    cin_p = x.shape[0]
    w2mat, b2 = fold_bn(p['w2'], p['b2'], p['g2'], p['be2'], p['rm2'], p['rv2'],
                        cin_p, 8)
    patches2, OH2, OW2 = im2col_cnhw(x, 5, 5, 3, 3)                  # (200, N*96) bf16
    pp = OH2 * OW2                                                   # 96
    cout2 = p['w2'].shape[0]
    wl_r = p['wl'].reshape(3, cout2, pp)                  # PyTorch (c,h,w) flatten order
    wl_r = jnp.pad(wl_r, ((0, 0), (0, 8 - cout2), (0, 0))).astype(jnp.float32)
    bl = p['bl'][:, None].astype(jnp.float32)
    logits = pl.pallas_call(
        functools.partial(_tail_kernel, n_samples=N, pp=pp),
        out_shape=jax.ShapeDtypeStruct((3, N), jnp.float32),
    )(w2mat, b2, patches2, wl_r, bl)
    return logits.T                                                  # (N, 3)


# ----------------------------- params / reference ---------------------------

def init_params(key):
    ks = jax.random.split(key, 4)

    def kaiming(k, shape):  # kaiming_normal_, mode='fan_out', relu gain
        cout, _, kh, kw = shape
        std = (2.0 / (cout * kh * kw)) ** 0.5
        return std * jax.random.normal(k, shape, jnp.float32)

    p = {
        'w0': kaiming(ks[0], (5, 1, 5, 5)), 'b0': jnp.zeros((5,), jnp.float32),
        'w1': kaiming(ks[1], (5, 5, 5, 5)), 'b1': jnp.zeros((5,), jnp.float32),
        'w2': kaiming(ks[2], (5, 5, 5, 5)), 'b2': jnp.zeros((5,), jnp.float32),
        'wl': 0.01 * jax.random.normal(ks[3], (3, 480), jnp.float32),
        'bl': jnp.zeros((3,), jnp.float32),
    }
    for i in range(3):
        p[f'g{i}'] = jnp.ones((5,), jnp.float32)     # BN weight
        p[f'be{i}'] = jnp.zeros((5,), jnp.float32)   # BN bias
        p[f'rm{i}'] = jnp.zeros((5,), jnp.float32)   # running mean
        p[f'rv{i}'] = jnp.ones((5,), jnp.float32)    # running var
    return p


def rpsnet_reference(x_seq, p):
    """Pure-JAX f32 reference (no Pallas) mirroring the PyTorch eval forward."""
    def conv_bn_relu_ref(x, w, b, g, be, rm, rv, stride, pad):
        y = jax.lax.conv_general_dilated(
            x, w, window_strides=(stride, stride),
            padding=[(pad, pad), (pad, pad)],
            dimension_numbers=('NCHW', 'OIHW', 'NCHW'))
        y = y + b[None, :, None, None]
        y = (y - rm[None, :, None, None]) * (
            g[None, :, None, None] / jnp.sqrt(rv[None, :, None, None] + BN_EPS)
        ) + be[None, :, None, None]
        return jnp.maximum(y, 0.0)

    x = jnp.mean(x_seq, axis=1)[:, None]                            # (N, 1, H, W)
    x = conv_bn_relu_ref(x, p['w0'], p['b0'], p['g0'], p['be0'], p['rm0'], p['rv0'], 2, 2)
    x = conv_bn_relu_ref(x, p['w1'], p['b1'], p['g1'], p['be1'], p['rm1'], p['rv1'], 3, 3)
    H, W = x.shape[2] // 2 * 2, x.shape[3] // 2 * 2
    x = x[:, :, :H, :W]
    x = 0.25 * (x[:, :, 0::2, 0::2] + x[:, :, 0::2, 1::2]
                + x[:, :, 1::2, 0::2] + x[:, :, 1::2, 1::2])
    x = conv_bn_relu_ref(x, p['w2'], p['b2'], p['g2'], p['be2'], p['rm2'], p['rv2'], 3, 3)
    x = x.reshape(x.shape[0], -1)                                   # (c, h, w) flatten
    return x @ p['wl'].T + p['bl'][None, :]


if __name__ == "__main__":
    # Spatial size 250x400 is what Linear(480, 3) implies:
    # 250x400 -> conv0 125x200 -> conv1 43x68 -> pool 21x34 -> conv2 8x12,
    # flatten = 5*8*12 = 480. Batch N=2, T=4 time steps.
    x_seq = jax.random.uniform(jax.random.PRNGKey(0), (2, 4, 250, 400),
                               dtype=jnp.float32)
    params = init_params(jax.random.PRNGKey(42))

    logits = jax.block_until_ready(jax.jit(rpsnet_forward)(x_seq, params))
    assert logits.shape == (2, 3) and logits.dtype == jnp.float32

    ref = jax.block_until_ready(jax.jit(rpsnet_reference)(x_seq, params))
    max_err = float(np.max(np.abs(np.asarray(logits) - np.asarray(ref))))
    assert np.allclose(np.asarray(logits), np.asarray(ref),
                       atol=3e-2, rtol=5e-2), f"max abs err {max_err}"
    print("KERNEL_OK")
</pallas_src>

<mosaic_0001>
module attributes {stable_mosaic.version = 11 : i64} {
  func.func @_conv_gemm_kernel(%arg0: i32, %arg1: memref<8x25xbf16, #tpu.memory_space<vmem>>, %arg2: memref<8x1xf32, #tpu.memory_space<vmem>>, %arg3: memref<25x12544xbf16, #tpu.memory_space<vmem>>, %arg4: memref<8x12544xbf16, #tpu.memory_space<vmem>>) attributes {dimension_semantics = [#tpu.dimension_semantics<parallel>], iteration_bounds = array<i64: 4>, scalar_prefetch = 0 : i64, scratch_operands = 0 : i64, tpu.core_type = #tpu.core_type<tc>, window_params = [{pipeline_mode = #tpu.pipeline_mode<synchronous>, transform_indices = @transform_0, window_bounds = array<i64: 8, 25>}, {pipeline_mode = #tpu.pipeline_mode<synchronous>, transform_indices = @transform_1, window_bounds = array<i64: 8, 1>}, {transform_indices = @transform_2, window_bounds = array<i64: 25, 12544>}, {transform_indices = @transform_3, window_bounds = array<i64: 8, 12544>}]} {
    %c0 = arith.constant 0 : index
    %c0_0 = arith.constant 0 : index
    %0 = vector.load %arg1[%c0, %c0_0] : memref<8x25xbf16, #tpu.memory_space<vmem>>, vector<8x25xbf16>
    %c0_1 = arith.constant 0 : index
    %c0_2 = arith.constant 0 : index
    %1 = vector.load %arg3[%c0_1, %c0_2] : memref<25x12544xbf16, #tpu.memory_space<vmem>>, vector<25x12544xbf16>
    %cst = arith.constant dense<0.000000e+00> : vector<8x12544xf32>
    %2 = tpu.matmul %0, %1, %cst {dimension_numbers = #tpu.dot_dimension_numbers<[1], [0], [0], [1], [0, 0, 1, 1], [], []>} : vector<8x25xbf16>, vector<25x12544xbf16>, vector<8x12544xf32> -> vector<8x12544xf32>
    %c0_3 = arith.constant 0 : index
    %c0_4 = arith.constant 0 : index
    %3 = vector.load %arg2[%c0_3, %c0_4] : memref<8x1xf32, #tpu.memory_space<vmem>>, vector<8x1xf32>
    %4 = vector.broadcast %3 : vector<8x1xf32> to vector<8x12544xf32>
    %5 = arith.addf %2, %4 : vector<8x12544xf32>
    %cst_5 = arith.constant 0.000000e+00 : f32
    %6 = vector.broadcast %cst_5 : f32 to vector<8x12544xf32>
    %7 = arith.maximumf %5, %6 : vector<8x12544xf32>
    %8 = arith.truncf %7 : vector<8x12544xf32> to vector<8x12544xbf16>
    %c0_6 = arith.constant 0 : index
    %c0_7 = arith.constant 0 : index
    %9 = vector.load %arg4[%c0_6, %c0_7] : memref<8x12544xbf16, #tpu.memory_space<vmem>>, vector<8x12544xbf16>
    tpu.vector_store %arg4[%c0_6, %c0_7], %8 {strides = array<i32>} : memref<8x12544xbf16, #tpu.memory_space<vmem>>, vector<8x12544xbf16>,
    return
  }
  func.func @transform_0(%arg0: i32) -> (i32, i32) {
    %c0_i32 = arith.constant 0 : i32
    %c0_i32_0 = arith.constant 0 : i32
    %c0_i32_1 = arith.constant 0 : i32
    return %c0_i32, %c0_i32_0 : i32, i32
  }
  func.func @transform_1(%arg0: i32) -> (i32, i32) {
    %c0_i32 = arith.constant 0 : i32
    %c0_i32_0 = arith.constant 0 : i32
    %c0_i32_1 = arith.constant 0 : i32
    return %c0_i32, %c0_i32_0 : i32, i32
  }
  func.func @transform_2(%arg0: i32) -> (i32, i32) {
    %c0_i32 = arith.constant 0 : i32
    %c0_i32_0 = arith.constant 0 : i32
    return %c0_i32, %arg0 : i32, i32
  }
  func.func @transform_3(%arg0: i32) -> (i32, i32) {
    %c0_i32 = arith.constant 0 : i32
    %c0_i32_0 = arith.constant 0 : i32
    return %c0_i32, %arg0 : i32, i32
  }
}

module attributes {stable_mosaic.version = 11 : i64} {
  func.func @_conv_gemm_kernel(%arg0: i32, %arg1: memref<8x200xbf16, #tpu.memory_space<vmem>>, %arg2: memref<8x1xf32, #tpu.memory_space<vmem>>, %arg3: memref<200x2944xbf16, #tpu.memory_space<vmem>>, %arg4: memref<8x2944xbf16, #tpu.memory_space<vmem>>) attributes {dimension_semantics = [#tpu.dimension_semantics<parallel>], iteration_bounds = array<i64: 2>, scalar_prefetch = 0 : i64, scratch_operands = 0 : i64, tpu.core_type = #tpu.core_type<tc>, window_params = [{pipeline_mode = #tpu.pipeline_mode<synchronous>, transform_indices = @transform_0, window_bounds = array<i64: 8, 200>}, {pipeline_mode = #tpu.pipeline_mode<synchronous>, transform_indices = @transform_1, window_bounds = array<i64: 8, 1>}, {transform_indices = @transform_2, window_bounds = array<i64: 200, 2944>}, {transform_indices = @transform_3, window_bounds = array<i64: 8, 2944>}]} {
    %c0 = arith.constant 0 : index
    %c0_0 = arith.constant 0 : index
    %0 = vector.load %arg1[%c0, %c0_0] : memref<8x200xbf16, #tpu.memory_space<vmem>>, vector<8x200xbf16>
    %c0_1 = arith.constant 0 : index
    %c0_2 = arith.constant 0 : index
    %1 = vector.load %arg3[%c0_1, %c0_2] : memref<200x2944xbf16, #tpu.memory_space<vmem>>, vector<200x2944xbf16>
    %cst = arith.constant dense<0.000000e+00> : vector<8x2944xf32>
    %2 = tpu.matmul %0, %1, %cst {dimension_numbers = #tpu.dot_dimension_numbers<[1], [0], [0], [1], [0, 0, 1, 1], [], []>} : vector<8x200xbf16>, vector<200x2944xbf16>, vector<8x2944xf32> -> vector<8x2944xf32>
    %c0_3 = arith.constant 0 : index
    %c0_4 = arith.constant 0 : index
    %3 = vector.load %arg2[%c0_3, %c0_4] : memref<8x1xf32, #tpu.memory_space<vmem>>, vector<8x1xf32>
    %4 = vector.broadcast %3 : vector<8x1xf32> to vector<8x2944xf32>
    %5 = arith.addf %2, %4 : vector<8x2944xf32>
    %cst_5 = arith.constant 0.000000e+00 : f32
    %6 = vector.broadcast %cst_5 : f32 to vector<8x2944xf32>
    %7 = arith.maximumf %5, %6 : vector<8x2944xf32>
    %8 = arith.truncf %7 : vector<8x2944xf32> to vector<8x2944xbf16>
    %c0_6 = arith.constant 0 : index
    %c0_7 = arith.constant 0 : index
    %9 = vector.load %arg4[%c0_6, %c0_7] : memref<8x2944xbf16, #tpu.memory_space<vmem>>, vector<8x2944xbf16>
    tpu.vector_store %arg4[%c0_6, %c0_7], %8 {strides = array<i32>} : memref<8x2944xbf16, #tpu.memory_space<vmem>>, vector<8x2944xbf16>,
    return
  }
  func.func @transform_0(%arg0: i32) -> (i32, i32) {
    %c0_i32 = arith.constant 0 : i32
    %c0_i32_0 = arith.constant 0 : i32
    %c0_i32_1 = arith.constant 0 : i32
    return %c0_i32, %c0_i32_0 : i32, i32
  }
  func.func @transform_1(%arg0: i32) -> (i32, i32) {
    %c0_i32 = arith.constant 0 : i32
    %c0_i32_0 = arith.constant 0 : i32
    %c0_i32_1 = arith.constant 0 : i32
    return %c0_i32, %c0_i32_0 : i32, i32
  }
  func.func @transform_2(%arg0: i32) -> (i32, i32) {
    %c0_i32 = arith.constant 0 : i32
    %c0_i32_0 = arith.constant 0 : i32
    return %c0_i32, %arg0 : i32, i32
  }
  func.func @transform_3(%arg0: i32) -> (i32, i32) {
    %c0_i32 = arith.constant 0 : i32
    %c0_i32_0 = arith.constant 0 : i32
    return %c0_i32, %arg0 : i32, i32
  }
}

module attributes {stable_mosaic.version = 11 : i64} {
  func.func @_tail_kernel(%arg0: memref<8x200xbf16, #tpu.memory_space<vmem>>, %arg1: memref<8x1xf32, #tpu.memory_space<vmem>>, %arg2: memref<200x192xbf16, #tpu.memory_space<vmem>>, %arg3: memref<3x8x96xf32, #tpu.memory_space<vmem>>, %arg4: memref<3x1xf32, #tpu.memory_space<vmem>>, %arg5: memref<3x2xf32, #tpu.memory_space<vmem>>) attributes {dimension_semantics = [], scalar_prefetch = 0 : i64, scratch_operands = 0 : i64, tpu.core_type = #tpu.core_type<tc>} {
    %c0 = arith.constant 0 : index
    %c0_0 = arith.constant 0 : index
    %0 = vector.load %arg0[%c0, %c0_0] : memref<8x200xbf16, #tpu.memory_space<vmem>>, vector<8x200xbf16>
    %c0_1 = arith.constant 0 : index
    %c0_2 = arith.constant 0 : index
    %1 = vector.load %arg2[%c0_1, %c0_2] : memref<200x192xbf16, #tpu.memory_space<vmem>>, vector<200x192xbf16>
    %cst = arith.constant dense<0.000000e+00> : vector<8x192xf32>
    %2 = tpu.matmul %0, %1, %cst {dimension_numbers = #tpu.dot_dimension_numbers<[1], [0], [0], [1], [0, 0, 1, 1], [], []>} : vector<8x200xbf16>, vector<200x192xbf16>, vector<8x192xf32> -> vector<8x192xf32>
    %c0_3 = arith.constant 0 : index
    %c0_4 = arith.constant 0 : index
    %3 = vector.load %arg1[%c0_3, %c0_4] : memref<8x1xf32, #tpu.memory_space<vmem>>, vector<8x1xf32>
    %4 = vector.broadcast %3 : vector<8x1xf32> to vector<8x192xf32>
    %5 = arith.addf %2, %4 : vector<8x192xf32>
    %cst_5 = arith.constant 0.000000e+00 : f32
    %6 = vector.broadcast %cst_5 : f32 to vector<8x192xf32>
    %7 = arith.maximumf %5, %6 : vector<8x192xf32>
    %c0_6 = arith.constant 0 : index
    %c0_7 = arith.constant 0 : index
    %c0_8 = arith.constant 0 : index
    %8 = vector.load %arg3[%c0_6, %c0_7, %c0_8] : memref<3x8x96xf32, #tpu.memory_space<vmem>>, vector<3x8x96xf32>
    %9 = vector.extract_strided_slice %7 {offsets = [0, 0], sizes = [8, 96], strides = [1, 1]} : vector<8x192xf32> to vector<8x96xf32>
    %10 = vector.shape_cast %9 : vector<8x96xf32> to vector<1x8x96xf32>
    %11 = vector.broadcast %10 : vector<1x8x96xf32> to vector<3x8x96xf32>
    %12 = arith.mulf %8, %11 : vector<3x8x96xf32>
    %cst_9 = arith.constant dense<0.000000e+00> : vector<3x8xf32>
    %13 = vector.multi_reduction <add>, %12, %cst_9 [2] : vector<3x8x96xf32> to vector<3x8xf32>
    %cst_10 = arith.constant dense<0.000000e+00> : vector<3xf32>
    %14 = vector.multi_reduction <add>, %13, %cst_10 [1] : vector<3x8xf32> to vector<3xf32>
    %15 = vector.shape_cast %14 : vector<3xf32> to vector<3x1xf32>
    %16 = vector.extract_strided_slice %7 {offsets = [0, 96], sizes = [8, 96], strides = [1, 1]} : vector<8x192xf32> to vector<8x96xf32>
    %17 = vector.shape_cast %16 : vector<8x96xf32> to vector<1x8x96xf32>
    %18 = vector.broadcast %17 : vector<1x8x96xf32> to vector<3x8x96xf32>
    %19 = arith.mulf %8, %18 : vector<3x8x96xf32>
    %cst_11 = arith.constant dense<0.000000e+00> : vector<3x8xf32>
    %20 = vector.multi_reduction <add>, %19, %cst_11 [2] : vector<3x8x96xf32> to vector<3x8xf32>
    %cst_12 = arith.constant dense<0.000000e+00> : vector<3xf32>
    %21 = vector.multi_reduction <add>, %20, %cst_12 [1] : vector<3x8xf32> to vector<3xf32>
    %22 = vector.shape_cast %21 : vector<3xf32> to vector<3x1xf32>
    %23 = tpu.concatenate %15, %22 in 1 : vector<3x1xf32>, vector<3x1xf32> -> vector<3x2xf32>
    %c0_13 = arith.constant 0 : index
    %c0_14 = arith.constant 0 : index
    %24 = vector.load %arg4[%c0_13, %c0_14] : memref<3x1xf32, #tpu.memory_space<vmem>>, vector<3x1xf32>
    %25 = vector.broadcast %24 : vector<3x1xf32> to vector<3x2xf32>
    %26 = arith.addf %23, %25 : vector<3x2xf32>
    %c0_15 = arith.constant 0 : index
    %c0_16 = arith.constant 0 : index
    %27 = vector.load %arg5[%c0_15, %c0_16] : memref<3x2xf32, #tpu.memory_space<vmem>>, vector<3x2xf32>
    tpu.vector_store %arg5[%c0_15, %c0_16], %26 {strides = array<i32>} : memref<3x2xf32, #tpu.memory_space<vmem>>, vector<3x2xf32>,
    return
  }
}

</mosaic_0001>

<bundles_post_ra>
// kernel: rpsnet_forward.3
= control target key start
LH: loop header
LB: loop body
LE: loop exit
PB: predicated region body
PF: predicated region fallthrough
CT: control target
= control target key end

     0   :  { %s5304_s12 = smov 0   ;;  %s5306_s13 = smov 0   ;;  %s6362_s0 = inlined_call_operand.vmem [shape: bf16[8,25], index: 0, kind: input, shape index: {}]   ;;  %s6363_s1 = inlined_call_operand.vmem [shape: f32[8,1], index: 1, kind: input, shape index: {}]   ;;  %s6364_s2 = inlined_call_operand.vmem [shape: bf16[25,50176], index: 2, kind: input, shape index: {}]   ;;  %s6365_s3 = inlined_call_operand.vmem [shape: bf16[8,50176], index: 3, kind: output, shape index: {}]  }
   0x1   :  { %s5308_s14 = smov 0  }
   0x2 LB: > { %s4581_s15 = sadd.s32 4294967295, %s5280_s14   ;;  %s5321_s16 = sadd.s32 1, %s5280_s14   ;;  %s5280_s14 = sphi %s5308_s14, %s6368_s14   ;;  %s5276_s13 = sphi %s5306_s13, %s6367_s13   ;;  %s5272_s12 = sphi %s5304_s12, %s6366_s12  }
   0x3   : > { %s59_s17 = ssub.s32 %s5280_s14, %s5321_s16  ;;  %s62_s18 = sadd.s32 1, %s5276_s13 }
   0x4   : > { %p60_p0 = scmp.eq.s32.totalorder %s59_s17, 0  ;;  %p69_p1 = scmp.ne.s32.totalorder %s5276_s13, %s5272_s12 }
   0x5   : > { %p70_p2 = scmp.eq.s32.totalorder %s5280_s14, 0  ;;  %p4584_p4 = scmp.ge.s32.totalorder %s5280_s14, 4 }
   0x6   : > { %s5330_s19 = scalar_select %p60_p0, %s5276_s13, %s62_s18  }
   0x7   : > { %p71_p3 = por %p70_p2, %p69_p1  ;;  %127 = sbr.rel (%p4584_p4) target bundleno = 117 (0x75), region = 24 }
   0xe   : > { %130 = sbr.rel (!%p71_p3) target bundleno = 117 (0x75), region = 28  ;;  %s132_s20 = sand.u32 (%p71_p3), 1, %s5276_s13  }
   0xf   : > { %s4884_s21 = smul.u32 (%p71_p3), 392, %s5280_s14 }
  0x10   : > { %s4934_s22 = smul.u32 (%p71_p3), 1568, %s132_s20 }
  0x11   : > { %s5338_s25 = scalar_lea.vmem (%p71_p3), %s6364_s2, %s4884_s21 }
  0x12   : > { %v150_v0 = vld [vmem:[%s5338_s25] sm:$0xff] (%p71_p3)  ;;  %v152_v1 = vld [vmem:[%s5338_s25 + $0x8] sm:$0xff] (%p71_p3)  ;;  %v154_v2 = vld [vmem:[%s5338_s25 + $0x10] sm:$0xff] (%p71_p3)  ;;  %s5343_s26 = scalar_lea.vmem (%p71_p3), [#allocation2], %s4934_s22 }
  0x13   : > { %151 = vst [vmem:[%s5343_s26] sm:$0xff] (%p71_p3), %v150_v0  ;;  %153 = vst [vmem:[%s5343_s26 + $0x8] sm:$0xff] (%p71_p3), %v152_v1  ;;  %v156_v3 = vld [vmem:[%s5338_s25 + $0x18] sm:$0xff] (%p71_p3)  ;;  %v158_v4 = vld [vmem:[%s5338_s25 + $0x20] sm:$0xff] (%p71_p3) }
  0x14   : > { %155 = vst [vmem:[%s5343_s26 + $0x10] sm:$0xff] (%p71_p3), %v154_v2  ;;  %v160_v5 = vld [vmem:[%s5338_s25 + $0x28] sm:$0xff] (%p71_p3)  ;;  %157 = vst [vmem:[%s5343_s26 + $0x18] sm:$0xff] (%p71_p3), %v156_v3  ;;  %v162_v6 = vld [vmem:[%s5338_s25 + $0x30] sm:$0xff] (%p71_p3) }
  0x15   : > { %159 = vst [vmem:[%s5343_s26 + $0x20] sm:$0xff] %v158_v4  ;;  %161 = vst [vmem:[%s5343_s26 + $0x28] sm:$0xff] %v160_v5  ;;  %v164_v7 = vld [vmem:[%s5338_s25 + $0x38] sm:$0xff]  ;;  %v166_v8 = vld [vmem:[%s5338_s25 + $0x40] sm:$0xff] }
  0x16   : > { %163 = vst [vmem:[%s5343_s26 + $0x30] sm:$0xff] %v162_v6  ;;  %165 = vst [vmem:[%s5343_s26 + $0x38] sm:$0xff] %v164_v7  ;;  %v168_v9 = vld [vmem:[%s5338_s25 + $0x48] sm:$0xff]  ;;  %v170_v10 = vld [vmem:[%s5338_s25 + $0x50] sm:$0xff] }
  0x17   : > { %167 = vst [vmem:[%s5343_s26 + $0x40] sm:$0xff] %v166_v8  ;;  %v172_v11 = vld [vmem:[%s5338_s25 + $0x58] sm:$0xff]  ;;  %169 = vst [vmem:[%s5343_s26 + $0x48] sm:$0xff] %v168_v9  ;;  %v174_v12 = vld [vmem:[%s5338_s25 + $0x60] sm:$0xff] }
  0x18   : > { %171 = vst [vmem:[%s5343_s26 + $0x50] sm:$0xff] %v170_v10  ;;  %173 = vst [vmem:[%s5343_s26 + $0x58] sm:$0xff] %v172_v11  ;;  %v176_v13 = vld [vmem:[%s5338_s25 + $0x68] sm:$0xff]  ;;  %v178_v14 = vld [vmem:[%s5338_s25 + $0x70] sm:$0xff] }
  0x19   : > { %175 = vst [vmem:[%s5343_s26 + $0x60] sm:$0xff] %v174_v12  ;;  %177 = vst [vmem:[%s5343_s26 + $0x68] sm:$0xff] %v176_v13  ;;  %v180_v15 = vld [vmem:[%s5338_s25 + $0x78] sm:$0xff]  ;;  %v182_v16 = vld [vmem:[%s5338_s25 + $0x80] sm:$0xff] }
  0x1a   : > { %179 = vst [vmem:[%s5343_s26 + $0x70] sm:$0xff] %v178_v14  ;;  %v184_v17 = vld [vmem:[%s5338_s25 + $0x88] sm:$0xff]  ;;  %181 = vst [vmem:[%s5343_s26 + $0x78] sm:$0xff] %v180_v15  ;;  %v186_v18 = vld [vmem:[%s5338_s25 + $0x90] sm:$0xff] }
  0x1b   : > { %183 = vst [vmem:[%s5343_s26 + $0x80] sm:$0xff] %v182_v16  ;;  %185 = vst [vmem:[%s5343_s26 + $0x88] sm:$0xff] %v184_v17  ;;  %v188_v19 = vld [vmem:[%s5338_s25 + $0x98] sm:$0xff]  ;;  %v190_v20 = vld [vmem:[%s5338_s25 + $0xa0] sm:$0xff] }
  0x1c   : > { %187 = vst [vmem:[%s5343_s26 + $0x90] sm:$0xff] %v186_v18  ;;  %189 = vst [vmem:[%s5343_s26 + $0x98] sm:$0xff] %v188_v19  ;;  %v192_v21 = vld [vmem:[%s5338_s25 + $0xa8] sm:$0xff]  ;;  %v194_v22 = vld [vmem:[%s5338_s25 + $0xb0] sm:$0xff] }
  0x1d   : > { %191 = vst [vmem:[%s5343_s26 + $0xa0] sm:$0xff] %v190_v20  ;;  %v196_v23 = vld [vmem:[%s5338_s25 + $0xb8] sm:$0xff]  ;;  %193 = vst [vmem:[%s5343_s26 + $0xa8] sm:$0xff] %v192_v21  ;;  %v198_v24 = vld [vmem:[%s5338_s25 + $0xc0] sm:$0xff] }
  0x1e   : > { %195 = vst [vmem:[%s5343_s26 + $0xb0] sm:$0xff] %v194_v22  ;;  %197 = vst [vmem:[%s5343_s26 + $0xb8] sm:$0xff] %v196_v23  ;;  %v200_v25 = vld [vmem:[%s5338_s25 + $0xc8] sm:$0xff]  ;;  %v202_v26 = vld [vmem:[%s5338_s25 + $0xd0] sm:$0xff] }
  0x1f   : > { %199 = vst [vmem:[%s5343_s26 + $0xc0] sm:$0xff] %v198_v24  ;;  %201 = vst [vmem:[%s5343_s26 + $0xc8] sm:$0xff] %v200_v25  ;;  %v204_v27 = vld [vmem:[%s5338_s25 + $0xd8] sm:$0xff]  ;;  %v206_v28 = vld [vmem:[%s5338_s25 + $0xe0] sm:$0xff] }
  0x20   : > { %203 = vst [vmem:[%s5343_s26 + $0xd0] sm:$0xff] %v202_v26  ;;  %v208_v29 = vld [vmem:[%s5338_s25 + $0xe8] sm:$0xff]  ;;  %205 = vst [vmem:[%s5343_s26 + $0xd8] sm:$0xff] %v204_v27  ;;  %v210_v30 = vld [vmem:[%s5338_s25 + $0xf0] sm:$0xff] }
  0x21   : > { %207 = vst [vmem:[%s5343_s26 + $0xe0] sm:$0xff] %v206_v28  ;;  %209 = vst [vmem:[%s5343_s26 + $0xe8] sm:$0xff] %v208_v29  ;;  %v212_v31 = vld [vmem:[%s5338_s25 + $0xf8] sm:$0xff]  ;;  %v214_v32 = vld [vmem:[%s5338_s25 + $0x100] sm:$0xff] }
  0x22   : > { %211 = vst [vmem:[%s5343_s26 + $0xf0] sm:$0xff] %v210_v30  ;;  %213 = vst [vmem:[%s5343_s26 + $0xf8] sm:$0xff] %v212_v31  ;;  %v216_v33 = vld [vmem:[%s5338_s25 + $0x108] sm:$0xff]  ;;  %v218_v34 = vld [vmem:[%s5338_s25 + $0x110] sm:$0xff] }
  0x23   : > { %215 = vst [vmem:[%s5343_s26 + $0x100] sm:$0xff] %v214_v32  ;;  %v220_v35 = vld [vmem:[%s5338_s25 + $0x118] sm:$0xff]  ;;  %217 = vst [vmem:[%s5343_s26 + $0x108] sm:$0xff] %v216_v33  ;;  %v222_v36 = vld [vmem:[%s5338_s25 + $0x120] sm:$0xff] }
  0x24   : > { %219 = vst [vmem:[%s5343_s26 + $0x110] sm:$0xff] %v218_v34  ;;  %221 = vst [vmem:[%s5343_s26 + $0x118] sm:$0xff] %v220_v35  ;;  %v224_v37 = vld [vmem:[%s5338_s25 + $0x128] sm:$0xff]  ;;  %v226_v38 = vld [vmem:[%s5338_s25 + $0x130] sm:$0xff] }
  0x25   : > { %223 = vst [vmem:[%s5343_s26 + $0x120] sm:$0xff] %v222_v36  ;;  %225 = vst [vmem:[%s5343_s26 + $0x128] sm:$0xff] %v224_v37  ;;  %v228_v39 = vld [vmem:[%s5338_s25 + $0x138] sm:$0xff]  ;;  %v230_v40 = vld [vmem:[%s5338_s25 + $0x140] sm:$0xff] }
  0x26   : > { %227 = vst [vmem:[%s5343_s26 + $0x130] sm:$0xff] %v226_v38  ;;  %v232_v41 = vld [vmem:[%s5338_s25 + $0x148] sm:$0xff]  ;;  %229 = vst [vmem:[%s5343_s26 + $0x138] sm:$0xff] %v228_v39  ;;  %v234_v42 = vld [vmem:[%s5338_s25 + $0x150] sm:$0xff] }
  0x27   : > { %231 = vst [vmem:[%s5343_s26 + $0x140] sm:$0xff] %v230_v40  ;;  %233 = vst [vmem:[%s5343_s26 + $0x148] sm:$0xff] %v232_v41  ;;  %v236_v43 = vld [vmem:[%s5338_s25 + $0x158] sm:$0xff]  ;;  %v238_v44 = vld [vmem:[%s5338_s25 + $0x160] sm:$0xff] }
  0x28   : > { %235 = vst [vmem:[%s5343_s26 + $0x150] sm:$0xff] %v234_v42  ;;  %237 = vst [vmem:[%s5343_s26 + $0x158] sm:$0xff] %v236_v43  ;;  %v240_v45 = vld [vmem:[%s5338_s25 + $0x168] sm:$0xff]  ;;  %v242_v46 = vld [vmem:[%s5338_s25 + $0x170] sm:$0xff] }
  0x29   : > { %239 = vst [vmem:[%s5343_s26 + $0x160] sm:$0xff] %v238_v44  ;;  %v244_v47 = vld [vmem:[%s5338_s25 + $0x178] sm:$0xff]  ;;  %241 = vst [vmem:[%s5343_s26 + $0x168] sm:$0xff] %v240_v45  ;;  %v246_v48 = vld [vmem:[%s5338_s25 + $0x180] sm:$0xff] }
  0x2a   : > { %243 = vst [vmem:[%s5343_s26 + $0x170] sm:$0xff] %v242_v46  ;;  %245 = vst [vmem:[%s5343_s26 + $0x178] sm:$0xff] %v244_v47  ;;  %v248_v49 = vld [vmem:[%s5338_s25 + $0x620] sm:$0xff]  ;;  %v250_v50 = vld [vmem:[%s5338_s25 + $0x628] sm:$0xff] }
  0x2b   : > { %247 = vst [vmem:[%s5343_s26 + $0x180] sm:$0xff] %v246_v48  ;;  %249 = vst [vmem:[%s5343_s26 + $0x188] sm:$0xff] %v248_v49  ;;  %v252_v51 = vld [vmem:[%s5338_s25 + $0x630] sm:$0xff]  ;;  %v254_v52 = vld [vmem:[%s5338_s25 + $0x638] sm:$0xff] }
  0x2c   : > { %251 = vst [vmem:[%s5343_s26 + $0x190] sm:$0xff] %v250_v50  ;;  %v256_v53 = vld [vmem:[%s5338_s25 + $0x640] sm:$0xff]  ;;  %253 = vst [vmem:[%s5343_s26 + $0x198] sm:$0xff] %v252_v51  ;;  %v258_v54 = vld [vmem:[%s5338_s25 + $0x648] sm:$0xff] }
  0x2d   : > { %255 = vst [vmem:[%s5343_s26 + $0x1a0] sm:$0xff] %v254_v52  ;;  %257 = vst [vmem:[%s5343_s26 + $0x1a8] sm:$0xff] %v256_v53  ;;  %v260_v55 = vld [vmem:[%s5338_s25 + $0x650] sm:$0xff]  ;;  %v262_v56 = vld [vmem:[%s5338_s25 + $0x658] sm:$0xff] }
  0x2e   : > { %259 = vst [vmem:[%s5343_s26 + $0x1b0] sm:$0xff] %v258_v54  ;;  %261 = vst [vmem:[%s5343_s26 + $0x1b8] sm:$0xff] %v260_v55  ;;  %v264_v57 = vld [vmem:[%s5338_s25 + $0x660] sm:$0xff]  ;;  %v266_v58 = vld [vmem:[%s5338_s25 + $0x668] sm:$0xff] }
  0x2f   : > { %263 = vst [vmem:[%s5343_s26 + $0x1c0] sm:$0xff] %v262_v56  ;;  %v268_v59 = vld [vmem:[%s5338_s25 + $0x670] sm:$0xff]  ;;  %265 = vst [vmem:[%s5343_s26 + $0x1c8] sm:$0xff] %v264_v57  ;;  %v270_v60 = vld [vmem:[%s5338_s25 + $0x678] sm:$0xff] }
  0x30   : > { %267 = vst [vmem:[%s5343_s26 + $0x1d0] sm:$0xff] %v266_v58  ;;  %269 = vst [vmem:[%s5343_s26 + $0x1d8] sm:$0xff] %v268_v59  ;;  %v272_v61 = vld [vmem:[%s5338_s25 + $0x680] sm:$0xff]  ;;  %v274_v62 = vld [vmem:[%s5338_s25 + $0x688] sm:$0xff] }
  0x31   : > { %271 = vst [vmem:[%s5343_s26 + $0x1e0] sm:$0xff] %v270_v60  ;;  %273 = vst [vmem:[%s5343_s26 + $0x1e8] sm:$0xff] %v272_v61  ;;  %v276_v63 = vld [vmem:[%s5338_s25 + $0x690] sm:$0xff]  ;;  %v278_v0 = vld [vmem:[%s5338_s25 + $0x698] sm:$0xff] }
  0x32   : > { %275 = vst [vmem:[%s5343_s26 + $0x1f0] sm:$0xff] %v274_v62  ;;  %v280_v1 = vld [vmem:[%s5338_s25 + $0x6a0] sm:$0xff]  ;;  %277 = vst [vmem:[%s5343_s26 + $0x1f8] sm:$0xff] %v276_v63  ;;  %v282_v2 = vld [vmem:[%s5338_s25 + $0x6a8] sm:$0xff] }
  0x33   : > { %279 = vst [vmem:[%s5343_s26 + $0x200] sm:$0xff] %v278_v0  ;;  %281 = vst [vmem:[%s5343_s26 + $0x208] sm:$0xff] %v280_v1  ;;  %v284_v3 = vld [vmem:[%s5338_s25 + $0x6b0] sm:$0xff]  ;;  %v286_v4 = vld [vmem:[%s5338_s25 + $0x6b8] sm:$0xff] }
  0x34   : > { %283 = vst [vmem:[%s5343_s26 + $0x210] sm:$0xff] %v282_v2  ;;  %285 = vst [vmem:[%s5343_s26 + $0x218] sm:$0xff] %v284_v3  ;;  %v288_v5 = vld [vmem:[%s5338_s25 + $0x6c0] sm:$0xff]  ;;  %v290_v6 = vld [vmem:[%s5338_s25 + $0x6c8] sm:$0xff] }
  0x35   : > { %287 = vst [vmem:[%s5343_s26 + $0x220] sm:$0xff] %v286_v4  ;;  %v292_v7 = vld [vmem:[%s5338_s25 + $0x6d0] sm:$0xff]  ;;  %289 = vst [vmem:[%s5343_s26 + $0x228] sm:$0xff] %v288_v5  ;;  %v294_v8 = vld [vmem:[%s5338_s25 + $0x6d8] sm:$0xff] }
  0x36   : > { %291 = vst [vmem:[%s5343_s26 + $0x230] sm:$0xff] %v290_v6  ;;  %293 = vst [vmem:[%s5343_s26 + $0x238] sm:$0xff] %v292_v7  ;;  %v296_v9 = vld [vmem:[%s5338_s25 + $0x6e0] sm:$0xff]  ;;  %v298_v10 = vld [vmem:[%s5338_s25 + $0x6e8] sm:$0xff] }
  0x37   : > { %295 = vst [vmem:[%s5343_s26 + $0x240] sm:$0xff] %v294_v8  ;;  %297 = vst [vmem:[%s5343_s26 + $0x248] sm:$0xff] %v296_v9  ;;  %v300_v11 = vld [vmem:[%s5338_s25 + $0x6f0] sm:$0xff]  ;;  %v302_v12 = vld [vmem:[%s5338_s25 + $0x6f8] sm:$0xff] }
  0x38   : > { %299 = vst [vmem:[%s5343_s26 + $0x250] sm:$0xff] %v298_v10  ;;  %v304_v13 = vld [vmem:[%s5338_s25 + $0x700] sm:$0xff]  ;;  %301 = vst [vmem:[%s5343_s26 + $0x258] sm:$0xff] %v300_v11  ;;  %v306_v14 = vld [vmem:[%s5338_s25 + $0x708] sm:$0xff] }
  0x39   : > { %303 = vst [vmem:[%s5343_s26 + $0x260] sm:$0xff] %v302_v12  ;;  %305 = vst [vmem:[%s5343_s26 + $0x268] sm:$0xff] %v304_v13  ;;  %v308_v15 = vld [vmem:[%s5338_s25 + $0x710] sm:$0xff]  ;;  %v310_v16 = vld [vmem:[%s5338_s25 + $0x718] sm:$0xff] }
  0x3a   : > { %307 = vst [vmem:[%s5343_s26 + $0x270] sm:$0xff] %v306_v14  ;;  %309 = vst [vmem:[%s5343_s26 + $0x278] sm:$0xff] %v308_v15  ;;  %v312_v17 = vld [vmem:[%s5338_s25 + $0x720] sm:$0xff]  ;;  %v314_v18 = vld [vmem:[%s5338_s25 + $0x728] sm:$0xff] }
  0x3b   : > { %311 = vst [vmem:[%s5343_s26 + $0x280] sm:$0xff] %v310_v16  ;;  %v316_v19 = vld [vmem:[%s5338_s25 + $0x730] sm:$0xff]  ;;  %313 = vst [vmem:[%s5343_s26 + $0x288] sm:$0xff] %v312_v17  ;;  %v318_v20 = vld [vmem:[%s5338_s25 + $0x738] sm:$0xff] }
  0x3c   : > { %315 = vst [vmem:[%s5343_s26 + $0x290] sm:$0xff] %v314_v18  ;;  %317 = vst [vmem:[%s5343_s26 + $0x298] sm:$0xff] %v316_v19  ;;  %v320_v21 = vld [vmem:[%s5338_s25 + $0x740] sm:$0xff]  ;;  %v322_v22 = vld [vmem:[%s5338_s25 + $0x748] sm:$0xff] }
  0x3d   : > { %319 = vst [vmem:[%s5343_s26 + $0x2a0] sm:$0xff] %v318_v20  ;;  %321 = vst [vmem:[%s5343_s26 + $0x2a8] sm:$0xff] %v320_v21  ;;  %v324_v23 = vld [vmem:[%s5338_s25 + $0x750] sm:$0xff]  ;;  %v326_v24 = vld [vmem:[%s5338_s25 + $0x758] sm:$0xff] }
  0x3e   : > { %323 = vst [vmem:[%s5343_s26 + $0x2b0] sm:$0xff] %v322_v22  ;;  %v328_v25 = vld [vmem:[%s5338_s25 + $0x760] sm:$0xff]  ;;  %325 = vst [vmem:[%s5343_s26 + $0x2b8] sm:$0xff] %v324_v23  ;;  %v330_v26 = vld [vmem:[%s5338_s25 + $0x768] sm:$0xff] }
  0x3f   : > { %327 = vst [vmem:[%s5343_s26 + $0x2c0] sm:$0xff] %v326_v24  ;;  %329 = vst [vmem:[%s5343_s26 + $0x2c8] sm:$0xff] %v328_v25  ;;  %v332_v27 = vld [vmem:[%s5338_s25 + $0x770] sm:$0xff]  ;;  %v334_v28 = vld [vmem:[%s5338_s25 + $0x778] sm:$0xff] }
  0x40   : > { %331 = vst [vmem:[%s5343_s26 + $0x2d0] sm:$0xff] %v330_v26  ;;  %333 = vst [vmem:[%s5343_s26 + $0x2d8] sm:$0xff] %v332_v27  ;;  %v336_v29 = vld [vmem:[%s5338_s25 + $0x780] sm:$0xff]  ;;  %v338_v30 = vld [vmem:[%s5338_s25 + $0x788] sm:$0xff] }
  0x41   : > { %335 = vst [vmem:[%s5343_s26 + $0x2e0] sm:$0xff] %v334_v28  ;;  %v340_v31 = vld [vmem:[%s5338_s25 + $0x790] sm:$0xff]  ;;  %337 = vst [vmem:[%s5343_s26 + $0x2e8] sm:$0xff] %v336_v29  ;;  %v342_v32 = vld [vmem:[%s5338_s25 + $0x798] sm:$0xff] }
  0x42   : > { %339 = vst [vmem:[%s5343_s26 + $0x2f0] sm:$0xff] %v338_v30  ;;  %341 = vst [vmem:[%s5343_s26 + $0x2f8] sm:$0xff] %v340_v31  ;;  %v344_v33 = vld [vmem:[%s5338_s25 + $0x7a0] sm:$0xff]  ;;  %v348_v35 = vld [vmem:[%s5338_s25 + $0xc48] sm:$0xff] }
  0x43   : > { %v346_v34 = vld [vmem:[%s5338_s25 + $0xc40] sm:$0xff]  ;;  %343 = vst [vmem:[%s5343_s26 + $0x300] sm:$0xff] %v342_v32  ;;  %345 = vst [vmem:[%s5343_s26 + $0x308] sm:$0xff] %v344_v33  ;;  %v350_v36 = vld [vmem:[%s5338_s25 + $0xc50] sm:$0xff] }
  0x44   : > { %347 = vst [vmem:[%s5343_s26 + $0x310] sm:$0xff] %v346_v34  ;;  %v352_v37 = vld [vmem:[%s5338_s25 + $0xc58] sm:$0xff]  ;;  %349 = vst [vmem:[%s5343_s26 + $0x318] sm:$0xff] %v348_v35  ;;  %v354_v38 = vld [vmem:[%s5338_s25 + $0xc60] sm:$0xff] }
  0x45   : > { %351 = vst [vmem:[%s5343_s26 + $0x320] sm:$0xff] %v350_v36  ;;  %353 = vst [vmem:[%s5343_s26 + $0x328] sm:$0xff] %v352_v37  ;;  %v356_v39 = vld [vmem:[%s5338_s25 + $0xc68] sm:$0xff]  ;;  %v358_v40 = vld [vmem:[%s5338_s25 + $0xc70] sm:$0xff] }
  0x46   : > { %355 = vst [vmem:[%s5343_s26 + $0x330] sm:$0xff] %v354_v38  ;;  %357 = vst [vmem:[%s5343_s26 + $0x338] sm:$0xff] %v356_v39  ;;  %v360_v41 = vld [vmem:[%s5338_s25 + $0xc78] sm:$0xff]  ;;  %v362_v42 = vld [vmem:[%s5338_s25 + $0xc80] sm:$0xff] }
  0x47   : > { %359 = vst [vmem:[%s5343_s26 + $0x340] sm:$0xff] %v358_v40  ;;  %v364_v43 = vld [vmem:[%s5338_s25 + $0xc88] sm:$0xff]  ;;  %361 = vst [vmem:[%s5343_s26 + $0x348] sm:$0xff] %v360_v41  ;;  %v366_v44 = vld [vmem:[%s5338_s25 + $0xc90] sm:$0xff] }
  0x48   : > { %363 = vst [vmem:[%s5343_s26 + $0x350] sm:$0xff] %v362_v42  ;;  %365 = vst [vmem:[%s5343_s26 + $0x358] sm:$0xff] %v364_v43  ;;  %v368_v45 = vld [vmem:[%s5338_s25 + $0xc98] sm:$0xff]  ;;  %v370_v46 = vld [vmem:[%s5338_s25 + $0xca0] sm:$0xff] }
  0x49   : > { %367 = vst [vmem:[%s5343_s26 + $0x360] sm:$0xff] %v366_v44  ;;  %369 = vst [vmem:[%s5343_s26 + $0x368] sm:$0xff] %v368_v45  ;;  %v372_v47 = vld [vmem:[%s5338_s25 + $0xca8] sm:$0xff]  ;;  %v374_v48 = vld [vmem:[%s5338_s25 + $0xcb0] sm:$0xff] }
  0x4a   : > { %371 = vst [vmem:[%s5343_s26 + $0x370] sm:$0xff] %v370_v46  ;;  %v376_v49 = vld [vmem:[%s5338_s25 + $0xcb8] sm:$0xff]  ;;  %373 = vst [vmem:[%s5343_s26 + $0x378] sm:$0xff] %v372_v47  ;;  %v378_v50 = vld [vmem:[%s5338_s25 + $0xcc0] sm:$0xff] }
  0x4b   : > { %375 = vst [vmem:[%s5343_s26 + $0x380] sm:$0xff] %v374_v48  ;;  %377 = vst [vmem:[%s5343_s26 + $0x388] sm:$0xff] %v376_v49  ;;  %v380_v51 = vld [vmem:[%s5338_s25 + $0xcc8] sm:$0xff]  ;;  %v382_v52 = vld [vmem:[%s5338_s25 + $0xcd0] sm:$0xff] }
  0x4c   : > { %379 = vst [vmem:[%s5343_s26 + $0x390] sm:$0xff] %v378_v50  ;;  %381 = vst [vmem:[%s5343_s26 + $0x398] sm:$0xff] %v380_v51  ;;  %v384_v53 = vld [vmem:[%s5338_s25 + $0xcd8] sm:$0xff]  ;;  %v386_v54 = vld [vmem:[%s5338_s25 + $0xce0] sm:$0xff] }
  0x4d   : > { %383 = vst [vmem:[%s5343_s26 + $0x3a0] sm:$0xff] %v382_v52  ;;  %v388_v55 = vld [vmem:[%s5338_s25 + $0xce8] sm:$0xff]  ;;  %385 = vst [vmem:[%s5343_s26 + $0x3a8] sm:$0xff] %v384_v53  ;;  %v390_v56 = vld [vmem:[%s5338_s25 + $0xcf0] sm:$0xff] }
  0x4e   : > { %387 = vst [vmem:[%s5343_s26 + $0x3b0] sm:$0xff] %v386_v54  ;;  %389 = vst [vmem:[%s5343_s26 + $0x3b8] sm:$0xff] %v388_v55  ;;  %v392_v57 = vld [vmem:[%s5338_s25 + $0xcf8] sm:$0xff]  ;;  %v394_v58 = vld [vmem:[%s5338_s25 + $0xd00] sm:$0xff] }
  0x4f   : > { %391 = vst [vmem:[%s5343_s26 + $0x3c0] sm:$0xff] %v390_v56  ;;  %393 = vst [vmem:[%s5343_s26 + $0x3c8] sm:$0xff] %v392_v57  ;;  %v396_v59 = vld [vmem:[%s5338_s25 + $0xd08] sm:$0xff]  ;;  %v398_v60 = vld [vmem:[%s5338_s25 + $0xd10] sm:$0xff] }
  0x50   : > { %395 = vst [vmem:[%s5343_s26 + $0x3d0] sm:$0xff] %v394_v58  ;;  %v400_v61 = vld [vmem:[%s5338_s25 + $0xd18] sm:$0xff]  ;;  %397 = vst [vmem:[%s5343_s26 + $0x3d8] sm:$0xff] %v396_v59  ;;  %v402_v62 = vld [vmem:[%s5338_s25 + $0xd20] sm:$0xff] }
  0x51   : > { %399 = vst [vmem:[%s5343_s26 + $0x3e0] sm:$0xff] %v398_v60  ;;  %401 = vst [vmem:[%s5343_s26 + $0x3e8] sm:$0xff] %v400_v61  ;;  %v404_v63 = vld [vmem:[%s5338_s25 + $0xd28] sm:$0xff]  ;;  %v406_v0 = vld [vmem:[%s5338_s25 + $0xd30] sm:$0xff] }
  0x52   : > { %403 = vst [vmem:[%s5343_s26 + $0x3f0] sm:$0xff] %v402_v62  ;;  %405 = vst [vmem:[%s5343_s26 + $0x3f8] sm:$0xff] %v404_v63  ;;  %v408_v1 = vld [vmem:[%s5338_s25 + $0xd38] sm:$0xff]  ;;  %v410_v2 = vld [vmem:[%s5338_s25 + $0xd40] sm:$0xff] }
  0x53   : > { %407 = vst [vmem:[%s5343_s26 + $0x400] sm:$0xff] %v406_v0  ;;  %v412_v3 = vld [vmem:[%s5338_s25 + $0xd48] sm:$0xff]  ;;  %409 = vst [vmem:[%s5343_s26 + $0x408] sm:$0xff] %v408_v1  ;;  %v414_v4 = vld [vmem:[%s5338_s25 + $0xd50] sm:$0xff] }
  0x54   : > { %411 = vst [vmem:[%s5343_s26 + $0x410] sm:$0xff] %v410_v2  ;;  %413 = vst [vmem:[%s5343_s26 + $0x418] sm:$0xff] %v412_v3  ;;  %v416_v5 = vld [vmem:[%s5338_s25 + $0xd58] sm:$0xff]  ;;  %v418_v6 = vld [vmem:[%s5338_s25 + $0xd60] sm:$0xff] }
  0x55   : > { %415 = vst [vmem:[%s5343_s26 + $0x420] sm:$0xff] %v414_v4  ;;  %417 = vst [vmem:[%s5343_s26 + $0x428] sm:$0xff] %v416_v5  ;;  %v420_v7 = vld [vmem:[%s5338_s25 + $0xd68] sm:$0xff]  ;;  %v422_v8 = vld [vmem:[%s5338_s25 + $0xd70] sm:$0xff] }
  0x56   : > { %419 = vst [vmem:[%s5343_s26 + $0x430] sm:$0xff] %v418_v6  ;;  %v424_v9 = vld [vmem:[%s5338_s25 + $0xd78] sm:$0xff]  ;;  %421 = vst [vmem:[%s5343_s26 + $0x438] sm:$0xff] %v420_v7  ;;  %v426_v10 = vld [vmem:[%s5338_s25 + $0xd80] sm:$0xff] }
  0x57   : > { %423 = vst [vmem:[%s5343_s26 + $0x440] sm:$0xff] %v422_v8  ;;  %425 = vst [vmem:[%s5343_s26 + $0x448] sm:$0xff] %v424_v9  ;;  %v428_v11 = vld [vmem:[%s5338_s25 + $0xd88] sm:$0xff]  ;;  %v430_v12 = vld [vmem:[%s5338_s25 + $0xd90] sm:$0xff] }
  0x58   : > { %427 = vst [vmem:[%s5343_s26 + $0x450] sm:$0xff] %v426_v10  ;;  %429 = vst [vmem:[%s5343_s26 + $0x458] sm:$0xff] %v428_v11  ;;  %v432_v13 = vld [vmem:[%s5338_s25 + $0xd98] sm:$0xff]  ;;  %v434_v14 = vld [vmem:[%s5338_s25 + $0xda0] sm:$0xff] }
  0x59   : > { %431 = vst [vmem:[%s5343_s26 + $0x460] sm:$0xff] %v430_v12  ;;  %v436_v15 = vld [vmem:[%s5338_s25 + $0xda8] sm:$0xff]  ;;  %433 = vst [vmem:[%s5343_s26 + $0x468] sm:$0xff] %v432_v13  ;;  %v438_v16 = vld [vmem:[%s5338_s25 + $0xdb0] sm:$0xff] }
  0x5a   : > { %435 = vst [vmem:[%s5343_s26 + $0x470] sm:$0xff] %v434_v14  ;;  %437 = vst [vmem:[%s5343_s26 + $0x478] sm:$0xff] %v436_v15  ;;  %v440_v17 = vld [vmem:[%s5338_s25 + $0xdb8] sm:$0xff]  ;;  %v442_v18 = vld [vmem:[%s5338_s25 + $0xdc0] sm:$0xff] }
  0x5b   : > { %439 = vst [vmem:[%s5343_s26 + $0x480] sm:$0xff] %v438_v16  ;;  %441 = vst [vmem:[%s5343_s26 + $0x488] sm:$0xff] %v440_v17  ;;  %v444_v19 = vld [vmem:[%s5338_s25 + $0x1260] sm:$0xff]  ;;  %v446_v20 = vld [vmem:[%s5338_s25 + $0x1268] sm:$0xff] }
  0x5c   : > { %443 = vst [vmem:[%s5343_s26 + $0x490] sm:$0xff] %v442_v18  ;;  %v448_v21 = vld [vmem:[%s5338_s25 + $0x1270] sm:$0xff]  ;;  %445 = vst [vmem:[%s5343_s26 + $0x498] sm:$0xff] %v444_v19  ;;  %v450_v22 = vld [vmem:[%s5338_s25 + $0x1278] sm:$0xff] }
  0x5d   : > { %447 = vst [vmem:[%s5343_s26 + $0x4a0] sm:$0xff] %v446_v20  ;;  %449 = vst [vmem:[%s5343_s26 + $0x4a8] sm:$0xff] %v448_v21  ;;  %v452_v23 = vld [vmem:[%s5338_s25 + $0x1280] sm:$0xff]  ;;  %v454_v24 = vld [vmem:[%s5338_s25 + $0x1288] sm:$0xff] }
  0x5e   : > { %451 = vst [vmem:[%s5343_s26 + $0x4b0] sm:$0xff] %v450_v22  ;;  %453 = vst [vmem:[%s5343_s26 + $0x4b8] sm:$0xff] %v452_v23  ;;  %v456_v25 = vld [vmem:[%s5338_s25 + $0x1290] sm:$0xff]  ;;  %v458_v26 = vld [vmem:[%s5338_s25 + $0x1298] sm:$0xff] }
  0x5f   : > { %455 = vst [vmem:[%s5343_s26 + $0x4c0] sm:$0xff] %v454_v24  ;;  %v460_v27 = vld [vmem:[%s5338_s25 + $0x12a0] sm:$0xff]  ;;  %457 = vst [vmem:[%s5343_s26 + $0x4c8] sm:$0xff] %v456_v25  ;;  %v462_v28 = vld [vmem:[%s5338_s25 + $0x12a8] sm:$0xff] }
  0x60   : > { %459 = vst [vmem:[%s5343_s26 + $0x4d0] sm:$0xff] %v458_v26  ;;  %461 = vst [vmem:[%s5343_s26 + $0x4d8] sm:$0xff] %v460_v27  ;;  %v464_v29 = vld [vmem:[%s5338_s25 + $0x12b0] sm:$0xff]  ;;  %v466_v30 = vld [vmem:[%s5338_s25 + $0x12b8] sm:$0xff] }
  0x61   : > { %463 = vst [vmem:[%s5343_s26 + $0x4e0] sm:$0xff] %v462_v28  ;;  %465 = vst [vmem:[%s5343_s26 + $0x4e8] sm:$0xff] %v464_v29  ;;  %v468_v31 = vld [vmem:[%s5338_s25 + $0x12c0] sm:$0xff]  ;;  %v470_v32 = vld [vmem:[%s5338_s25 + $0x12c8] sm:$0xff] }
  0x62   : > { %467 = vst [vmem:[%s5343_s26 + $0x4f0] sm:$0xff] %v466_v30  ;;  %v472_v33 = vld [vmem:[%s5338_s25 + $0x12d0] sm:$0xff]  ;;  %469 = vst [vmem:[%s5343_s26 + $0x4f8] sm:$0xff] %v468_v31  ;;  %v474_v34 = vld [vmem:[%s5338_s25 + $0x12d8] sm:$0xff] }
  0x63   : > { %471 = vst [vmem:[%s5343_s26 + $0x500] sm:$0xff] %v470_v32  ;;  %473 = vst [vmem:[%s5343_s26 + $0x508] sm:$0xff] %v472_v33  ;;  %v476_v35 = vld [vmem:[%s5338_s25 + $0x12e0] sm:$0xff]  ;;  %v478_v36 = vld [vmem:[%s5338_s25 + $0x12e8] sm:$0xff] }
  0x64   : > { %475 = vst [vmem:[%s5343_s26 + $0x510] sm:$0xff] %v474_v34  ;;  %477 = vst [vmem:[%s5343_s26 + $0x518] sm:$0xff] %v476_v35  ;;  %v480_v37 = vld [vmem:[%s5338_s25 + $0x12f0] sm:$0xff]  ;;  %v482_v38 = vld [vmem:[%s5338_s25 + $0x12f8] sm:$0xff] }
  0x65   : > { %479 = vst [vmem:[%s5343_s26 + $0x520] sm:$0xff] %v478_v36  ;;  %v484_v39 = vld [vmem:[%s5338_s25 + $0x1300] sm:$0xff]  ;;  %481 = vst [vmem:[%s5343_s26 + $0x528] sm:$0xff] %v480_v37  ;;  %v486_v40 = vld [vmem:[%s5338_s25 + $0x1308] sm:$0xff] }
  0x66   : > { %483 = vst [vmem:[%s5343_s26 + $0x530] sm:$0xff] %v482_v38  ;;  %485 = vst [vmem:[%s5343_s26 + $0x538] sm:$0xff] %v484_v39  ;;  %v488_v41 = vld [vmem:[%s5338_s25 + $0x1310] sm:$0xff]  ;;  %v490_v42 = vld [vmem:[%s5338_s25 + $0x1318] sm:$0xff] }
  0x67   : > { %487 = vst [vmem:[%s5343_s26 + $0x540] sm:$0xff] %v486_v40  ;;  %489 = vst [vmem:[%s5343_s26 + $0x548] sm:$0xff] %v488_v41  ;;  %v492_v43 = vld [vmem:[%s5338_s25 + $0x1320] sm:$0xff]  ;;  %v494_v44 = vld [vmem:[%s5338_s25 + $0x1328] sm:$0xff] }
  0x68   : > { %491 = vst [vmem:[%s5343_s26 + $0x550] sm:$0xff] %v490_v42  ;;  %v496_v45 = vld [vmem:[%s5338_s25 + $0x1330] sm:$0xff]  ;;  %493 = vst [vmem:[%s5343_s26 + $0x558] sm:$0xff] %v492_v43  ;;  %v498_v46 = vld [vmem:[%s5338_s25 + $0x1338] sm:$0xff] }
  0x69   : > { %495 = vst [vmem:[%s5343_s26 + $0x560] sm:$0xff] %v494_v44  ;;  %497 = vst [vmem:[%s5343_s26 + $0x568] sm:$0xff] %v496_v45  ;;  %v500_v47 = vld [vmem:[%s5338_s25 + $0x1340] sm:$0xff]  ;;  %v502_v48 = vld [vmem:[%s5338_s25 + $0x1348] sm:$0xff] }
  0x6a   : > { %499 = vst [vmem:[%s5343_s26 + $0x570] sm:$0xff] %v498_v46  ;;  %501 = vst [vmem:[%s5343_s26 + $0x578] sm:$0xff] %v500_v47  ;;  %v504_v49 = vld [vmem:[%s5338_s25 + $0x1350] sm:$0xff]  ;;  %v506_v50 = vld [vmem:[%s5338_s25 + $0x1358] sm:$0xff] }
  0x6b   : > { %503 = vst [vmem:[%s5343_s26 + $0x580] sm:$0xff] %v502_v48  ;;  %v508_v51 = vld [vmem:[%s5338_s25 + $0x1360] sm:$0xff]  ;;  %505 = vst [vmem:[%s5343_s26 + $0x588] sm:$0xff] %v504_v49  ;;  %v510_v52 = vld [vmem:[%s5338_s25 + $0x1368] sm:$0xff] }
  0x6c   : > { %507 = vst [vmem:[%s5343_s26 + $0x590] sm:$0xff] %v506_v50  ;;  %509 = vst [vmem:[%s5343_s26 + $0x598] sm:$0xff] %v508_v51  ;;  %v512_v53 = vld [vmem:[%s5338_s25 + $0x1370] sm:$0xff]  ;;  %v514_v54 = vld [vmem:[%s5338_s25 + $0x1378] sm:$0xff] }
  0x6d   : > { %511 = vst [vmem:[%s5343_s26 + $0x5a0] sm:$0xff] %v510_v52  ;;  %513 = vst [vmem:[%s5343_s26 + $0x5a8] sm:$0xff] %v512_v53  ;;  %v516_v55 = vld [vmem:[%s5338_s25 + $0x1380] sm:$0xff]  ;;  %v518_v56 = vld [vmem:[%s5338_s25 + $0x1388] sm:$0xff] }
  0x6e   : > { %515 = vst [vmem:[%s5343_s26 + $0x5b0] sm:$0xff] %v514_v54  ;;  %v520_v57 = vld [vmem:[%s5338_s25 + $0x1390] sm:$0xff]  ;;  %517 = vst [vmem:[%s5343_s26 + $0x5b8] sm:$0xff] %v516_v55  ;;  %v522_v58 = vld [vmem:[%s5338_s25 + $0x1398] sm:$0xff] }
  0x6f   : > { %519 = vst [vmem:[%s5343_s26 + $0x5c0] sm:$0xff] %v518_v56  ;;  %521 = vst [vmem:[%s5343_s26 + $0x5c8] sm:$0xff] %v520_v57  ;;  %v524_v59 = vld [vmem:[%s5338_s25 + $0x13a0] sm:$0xff]  ;;  %v526_v60 = vld [vmem:[%s5338_s25 + $0x13a8] sm:$0xff] }
  0x70   : > { %523 = vst [vmem:[%s5343_s26 + $0x5d0] sm:$0xff] %v522_v58  ;;  %525 = vst [vmem:[%s5343_s26 + $0x5d8] sm:$0xff] %v524_v59  ;;  %v528_v61 = vld [vmem:[%s5338_s25 + $0x13b0] sm:$0xff]  ;;  %v530_v62 = vld [vmem:[%s5338_s25 + $0x13b8] sm:$0xff] }
  0x71   : > { %527 = vst [vmem:[%s5343_s26 + $0x5e0] sm:$0xff] %v526_v60  ;;  %v532_v63 = vld [vmem:[%s5338_s25 + $0x13c0] sm:$0xff]  ;;  %529 = vst [vmem:[%s5343_s26 + $0x5e8] sm:$0xff] %v528_v61  ;;  %v534_v0 = vld [vmem:[%s5338_s25 + $0x13c8] sm:$0xff] }
  0x72   : > { %531 = vst [vmem:[%s5343_s26 + $0x5f0] sm:$0xff] %v530_v62  ;;  %533 = vst [vmem:[%s5343_s26 + $0x5f8] sm:$0xff] %v532_v63  ;;  %v536_v1 = vld [vmem:[%s5338_s25 + $0x13d0] sm:$0xff]  ;;  %v538_v2 = vld [vmem:[%s5338_s25 + $0x13d8] sm:$0xff] }
  0x73   : > { %535 = vst [vmem:[%s5343_s26 + $0x600] sm:$0xff] %v534_v0  ;;  %537 = vst [vmem:[%s5343_s26 + $0x608] sm:$0xff] %v536_v1  ;;  %v540_v3 = vld [vmem:[%s5338_s25 + $0x13e0] sm:$0xff] }
  0x74   : > { %539 = vst [vmem:[%s5343_s26 + $0x610] sm:$0xff] %v538_v2  ;;  %541 = vst [vmem:[%s5343_s26 + $0x618] sm:$0xff] %v540_v3 }
  0x75 PF: > { %p4586_p5 = scmp.ge.s32.totalorder %s5280_s14, 1  ;;  %p546_p6 = scmp.lt.s32.totalorder %s5280_s14, 5 }
  0x77   : > { %p547_p7 = pnand %p4586_p5, %p546_p6 }
  0x78   : > { %s553_s27 = sand.u32 (!%p547_p7), 1, %s5272_s12   ;;  %vm1673_vm0 = vcmask (!%p547_p7), 1043456   ;;  %v781_v4 = vld [vmem:[%s6363_s1] sm:$0xff] (!%p547_p7)  ;;  %v5282_v5 = vmov (!%p547_p7), 0   ;;  %vm1674_vm1 = vcmask (!%p547_p7), 1044480   ;;  %v5283_v6 = vmov (!%p547_p7), 65535  }
  0x79   : > { %550 = sbr.rel (%p547_p7) target bundleno = 546 (0x222), region = 51  ;;  %2003 = vmatprep.mubr.bf16.mxu0 (!%p547_p7), %v5282_v5  ;;  %2044 = vmatprep.mubr.bf16.mxu1 (!%p547_p7), %v5282_v5  ;;  %v1675_v7 = vsel (!%p547_p7), %vm1673_vm0, 4294967295, %v5283_v6  ;;  %v5758_v17 = vld [vmem:[%s6362_s0] sm:$0xf] (!%p547_p7)  ;;  %vm1669_vm2 = vcmask (!%p547_p7), 203776  }
  0x7a   : > { %s4935_s30 = smul.u32 (!%p547_p7), 1568, %s553_s27  ;;  %4962 = vset.pattern.permute.xlu0 (!%p547_p7), %v5282_v5  ;;  %v5747_v10 = vsel (!%p547_p7), %vm1674_vm1, %v1675_v7, 0 }
  0x7b   : > { %784 = vperm.xlu0 (!%p547_p7), %4962, %v781_v4   ;;  %s577_s9 = smul.u32 (!%p547_p7), 98, %s4581_s15 }
  0x7c   : > { %s5743_s4 = scalar_lea.vmem (!%p547_p7), [#allocation2], %s4935_s30 }
  0x7d   : > { %v4963_v8 = vld [vmem:[%s5743_s4 + $0x4] ss:$392 sps:$4 sm:$0xff] (!%p547_p7)   ;;  %v4965_v9 = vld [vmem:[%s5743_s4] ss:$392 sps:$4 sm:$0xff] (!%p547_p7)   ;;  %v4972_v18 = vld [vmem:[%s5743_s4 + $0x10] ss:$392 sps:$4 sm:$0xff] (!%p547_p7)  }
  0x7e   : > { %1971 = vmatprep.subr.bf16.mxu0 (!%p547_p7), %v4963_v8  ;;  %v4966_v11 = vld [vmem:[%s5743_s4 + $0x314] ss:$392 sps:$4 sm:$0x1f] (!%p547_p7)   ;;  %v4968_v12 = vld [vmem:[%s5743_s4 + $0x310] ss:$392 sps:$4 sm:$0x1f] (!%p547_p7)  }
  0x7f   : > { %1972 = vmatpush1.bf16.msra.mxu0 (!%p547_p7), %v4965_v9  ;;  %v4969_v13 = vld [vmem:[%s5743_s4 + $0xc] ss:$392 sps:$4 sm:$0xff] (!%p547_p7)   ;;  %v1681_v14 = vand.u32 (!%p547_p7), %v4966_v11, %v5747_v10  ;;  %v1678_v15 = vand.u32 (!%p547_p7), %v4968_v12, %v5747_v10  ;;  %v4971_v16 = vld [vmem:[%s5743_s4 + $0x8] ss:$392 sps:$4 sm:$0xff] (!%p547_p7)   ;;  %v4983_v26 = vld [vmem:[%s5743_s4 + $0x1c] ss:$392 sps:$4 sm:$0xff] (!%p547_p7)  }
  0x80   : > { %2012 = vmatprep.subr.bf16.mxu1 %v4969_v13  ;;  %v4974_v19 = vld [vmem:[%s5743_s4 + $0x14] ss:$392 sps:$4 sm:$0xff]   ;;  %v4977_v21 = vld [vmem:[%s5743_s4 + $0x318] ss:$392 sps:$4 sm:$0x1f]   ;;  %p578_p8 = scmp.lt.s32.totalorder %s577_s9, 391 }
  0x81   : > { %1973 = vmatprep.subr.bf16.mxu0 %v1681_v14  ;;  %2013 = vmatpush1.bf16.msra.mxu1 %v4971_v16  ;;  %v4975_v20 = vld [vmem:[%s5743_s4 + $0x31c] ss:$392 sps:$4 sm:$0x1f]   ;;  %v4978_v23 = vld [vmem:[%s5743_s4 + $0x320] ss:$392 sps:$4 sm:$0x1f]   ;;  %v1684_v25 = vand.u32 %v4977_v21, %v5747_v10 }
  0x82   : > { %v1687_v22 = vand.u32 %v4975_v20, %v5747_v10  ;;  %v4980_v24 = vld [vmem:[%s5743_s4 + $0x324] ss:$392 sps:$4 sm:$0x1f]   ;;  %v4981_v28 = vld [vmem:[%s5743_s4 + $0x18] ss:$392 sps:$4 sm:$0xff]   ;;  %v1690_v29 = vand.u32 %v4978_v23, %v5747_v10  ;;  %s6370_s9 = smov (!%p578_p8, %s577_s9), 391 }
  0x83   : > { %1974 = vmatpush1.bf16.msra.mxu0 %v1678_v15  ;;  %v1693_v27 = vand.u32 %v4980_v24, %v5747_v10  ;;  %v4986_v30 = vld [vmem:[%s5743_s4 + $0x24] ss:$392 sps:$4 sm:$0xff]   ;;  %v4987_v31 = vld [vmem:[%s5743_s4 + $0x328] ss:$392 sps:$4 sm:$0x1f]   ;;  %s4587_s10 = sshll.u32 %s6370_s9, 2 }
  0x84   : > { %2053 = vmatprep.subr.bf16.mxu0 %v4974_v19  ;;  %2014 = vmatprep.subr.bf16.mxu1 %v1687_v22  ;;  %v4989_v32 = vld [vmem:[%s5743_s4 + $0x32c] ss:$392 sps:$4 sm:$0x1f]   ;;  %v4984_v35 = vld [vmem:[%s5743_s4 + $0x20] ss:$392 sps:$4 sm:$0xff]   ;;  %v1696_v36 = vand.u32 %v4987_v31, %v5747_v10  ;;  %s6205_s14 = scalar_lea.vmem %s6365_s3, %s4587_s10 }
  0x85   : > { %2015 = vmatpush1.bf16.msra.mxu1 %v1684_v25  ;;  %v1699_v33 = vand.u32 %v4989_v32, %v5747_v10  ;;  %v4992_v34 = vld [vmem:[%s5743_s4 + $0x334] ss:$392 sps:$4 sm:$0x1f]   ;;  %v4990_v37 = vld [vmem:[%s5743_s4 + $0x330] ss:$392 sps:$4 sm:$0x1f]  }
  0x86   : > { %4784 = vmatmul.mubr.msk.bf16.vlgmr.msra.gmra.mrb[0].mxu0 %vm1669_vm2, %v5758_v17  ;;  %2094 = vmatprep.subr.bf16.mxu1 %v4983_v26  ;;  %v1705_v38 = vand.u32 %v4992_v34, %v5747_v10  ;;  %v4995_v39 = vld [vmem:[%s5743_s4 + $0x2c] ss:$392 sps:$4 sm:$0xff]   ;;  %v4993_v40 = vld [vmem:[%s5743_s4 + $0x28] ss:$392 sps:$4 sm:$0xff]   ;;  %v1702_v42 = vand.u32 %v4990_v37, %v5747_v10  ;;  %v5007_v50 = vld [vmem:[%s5743_s4 + $0x3c] ss:$392 sps:$4 sm:$0xff]  }
  0x87   : > { %2054 = vmatpush1.bf16.msra.mxu0 %v4972_v18  ;;  %2085 = vmatprep.mubr.bf16.mxu0 %v5282_v5  ;;  %v5001_v41 = vld [vmem:[%s5743_s4 + $0x33c] ss:$392 sps:$4 sm:$0x1f]   ;;  %v4999_v44 = vld [vmem:[%s5743_s4 + $0x338] ss:$392 sps:$4 sm:$0x1f]  }
  0x88   : > { %2055 = vmatprep.subr.bf16.mxu0 %v1693_v27  ;;  %4785 = vmatmul.mubr.msk.bf16.vlgmr.msra.gmra.mrb[0].mxu1 %vm1669_vm2, %v5758_v17  ;;  %v4998_v43 = vld [vmem:[%s5743_s4 + $0x34] ss:$392 sps:$4 sm:$0xff]   ;;  %v1711_v45 = vand.u32 %v5001_v41, %v5747_v10  ;;  %v5004_v46 = vld [vmem:[%s5743_s4 + $0x344] ss:$392 sps:$4 sm:$0x1f]   ;;  %v1708_v49 = vand.u32 %v4999_v44, %v5747_v10 }
  0x89   : > { %2095 = vmatpush1.bf16.msra.mxu1 %v4981_v28  ;;  %2126 = vmatprep.mubr.bf16.mxu1 %v5282_v5  ;;  %v4996_v47 = vld [vmem:[%s5743_s4 + $0x30] ss:$392 sps:$4 sm:$0xff]   ;;  %v5002_v48 = vld [vmem:[%s5743_s4 + $0x340] ss:$392 sps:$4 sm:$0x1f]   ;;  %v1717_v51 = vand.u32 %v5004_v46, %v5747_v10 }
  0x8a   : > { %2096 = vmatprep.subr.bf16.mxu1 %v1699_v33  ;;  %v5013_v52 = vld [vmem:[%s5743_s4 + $0x34c] ss:$392 sps:$4 sm:$0x1f]   ;;  %v5005_v53 = vld [vmem:[%s5743_s4 + $0x38] ss:$392 sps:$4 sm:$0xff]   ;;  %v1714_v55 = vand.u32 %v5002_v48, %v5747_v10 }
  0x8b   : > { %2056 = vmatpush1.bf16.msra.mxu0 %v1690_v29  ;;  %v5010_v54 = vld [vmem:[%s5743_s4 + $0x44] ss:$392 sps:$4 sm:$0xff]   ;;  %v5011_v56 = vld [vmem:[%s5743_s4 + $0x348] ss:$392 sps:$4 sm:$0x1f]   ;;  %v1723_v57 = vand.u32 %v5013_v52, %v5747_v10 }
  0x8c   : > { %2135 = vmatprep.subr.bf16.mxu0 %v4986_v30  ;;  %v5016_v58 = vld [vmem:[%s5743_s4 + $0x354] ss:$392 sps:$4 sm:$0x1f]   ;;  %v5008_v59 = vld [vmem:[%s5743_s4 + $0x40] ss:$392 sps:$4 sm:$0xff]   ;;  %v1720_v60 = vand.u32 %v5011_v56, %v5747_v10 }
  0x8d   : > { %2097 = vmatpush1.bf16.msra.mxu1 %v1696_v36  ;;  %v5014_v61 = vld [vmem:[%s5743_s4 + $0x350] ss:$392 sps:$4 sm:$0x1f]   ;;  %v1729_v62 = vand.u32 %v5016_v58, %v5747_v10  ;;  %v5019_v63 = vld [vmem:[%s5743_s4 + $0x4c] ss:$392 sps:$4 sm:$0xff]  }
  0x8e   : > { %4786 = vmatmul.mubr.msk.bf16.vlgmr.msra.gmra.mrb[4].mxu0 %vm1669_vm2, %v5758_v17  ;;  %2176 = vmatprep.subr.bf16.mxu1 %v4995_v39  ;;  %v5025_v0 = vld [vmem:[%s5743_s4 + $0x35c] ss:$392 sps:$4 sm:$0x1f]   ;;  %v5017_v1 = vld [vmem:[%s5743_s4 + $0x48] ss:$392 sps:$4 sm:$0xff]   ;;  %v1726_v2 = vand.u32 %v5014_v61, %v5747_v10 }
  0x8f   : > { %2136 = vmatpush1.bf16.msra.mxu0 %v4984_v35  ;;  %2167 = vmatprep.mubr.bf16.mxu0 %v5282_v5  ;;  %v5023_v3 = vld [vmem:[%s5743_s4 + $0x358] ss:$392 sps:$4 sm:$0x1f]   ;;  %v5022_v4 = vld [vmem:[%s5743_s4 + $0x54] ss:$392 sps:$4 sm:$0xff]   ;;  %v1735_v6 = vand.u32 %v5025_v0, %v5747_v10 }
  0x90   : > { %2137 = vmatprep.subr.bf16.mxu0 %v1705_v38  ;;  %4787 = vmatmul.mubr.msk.bf16.vlgmr.msra.gmra.mrb[4].mxu1 %vm1669_vm2, %v5758_v17  ;;  %v5028_v7 = vld [vmem:[%s5743_s4 + $0x364] ss:$392 sps:$4 sm:$0x1f]   ;;  %v5020_v8 = vld [vmem:[%s5743_s4 + $0x50] ss:$392 sps:$4 sm:$0xff]   ;;  %v1732_v9 = vand.u32 %v5023_v3, %v5747_v10 }
  0x91   : > { %2177 = vmatpush1.bf16.msra.mxu1 %v4993_v40  ;;  %2208 = vmatprep.mubr.bf16.mxu1 %v5282_v5  ;;  %v5026_v11 = vld [vmem:[%s5743_s4 + $0x360] ss:$392 sps:$4 sm:$0x1f]   ;;  %v5031_v12 = vld [vmem:[%s5743_s4 + $0x5c] ss:$392 sps:$4 sm:$0xff]   ;;  %v1741_v13 = vand.u32 %v5028_v7, %v5747_v10 }
  0x92   : > { %2178 = vmatprep.subr.bf16.mxu1 %v1711_v45  ;;  %v5037_v14 = vld [vmem:[%s5743_s4 + $0x36c] ss:$392 sps:$4 sm:$0x1f]   ;;  %v5029_v15 = vld [vmem:[%s5743_s4 + $0x58] ss:$392 sps:$4 sm:$0xff]   ;;  %v1738_v16 = vand.u32 %v5026_v11, %v5747_v10 }
  0x93   : > { %2138 = vmatpush1.bf16.msra.mxu0 %v1702_v42  ;;  %v5034_v18 = vld [vmem:[%s5743_s4 + $0x64] ss:$392 sps:$4 sm:$0xff]   ;;  %v5035_v19 = vld [vmem:[%s5743_s4 + $0x368] ss:$392 sps:$4 sm:$0x1f]   ;;  %v1747_v20 = vand.u32 %v5037_v14, %v5747_v10 }
  0x94   : > { %2217 = vmatprep.subr.bf16.mxu0 %v4998_v43  ;;  %v5040_v21 = vld [vmem:[%s5743_s4 + $0x374] ss:$392 sps:$4 sm:$0x1f]   ;;  %v5032_v22 = vld [vmem:[%s5743_s4 + $0x60] ss:$392 sps:$4 sm:$0xff]   ;;  %v1744_v24 = vand.u32 %v5035_v19, %v5747_v10 }
  0x95   : > { %2179 = vmatpush1.bf16.msra.mxu1 %v1708_v49  ;;  %v5038_v23 = vld [vmem:[%s5743_s4 + $0x370] ss:$392 sps:$4 sm:$0x1f]   ;;  %v5043_v25 = vld [vmem:[%s5743_s4 + $0x6c] ss:$392 sps:$4 sm:$0xff]   ;;  %v1753_v26 = vand.u32 %v5040_v21, %v5747_v10 }
  0x96   : > { %4788 = vmatmul.mubr.msk.bf16.vlgmr.msra.gmra.mrb[8].mxu0 %vm1669_vm2, %v5758_v17  ;;  %2258 = vmatprep.subr.bf16.mxu1 %v5007_v50  ;;  %v5049_v27 = vld [vmem:[%s5743_s4 + $0x37c] ss:$392 sps:$4 sm:$0x1f]   ;;  %v5041_v28 = vld [vmem:[%s5743_s4 + $0x68] ss:$392 sps:$4 sm:$0xff]   ;;  %v1750_v30 = vand.u32 %v5038_v23, %v5747_v10 }
  0x97   : > { %2218 = vmatpush1.bf16.msra.mxu0 %v4996_v47  ;;  %2249 = vmatprep.mubr.bf16.mxu0 %v5282_v5  ;;  %v5046_v29 = vld [vmem:[%s5743_s4 + $0x74] ss:$392 sps:$4 sm:$0xff]   ;;  %v5047_v31 = vld [vmem:[%s5743_s4 + $0x378] ss:$392 sps:$4 sm:$0x1f]   ;;  %v1759_v32 = vand.u32 %v5049_v27, %v5747_v10 }
  0x98   : > { %2219 = vmatprep.subr.bf16.mxu0 %v1717_v51  ;;  %4789 = vmatmul.mubr.msk.bf16.vlgmr.msra.gmra.mrb[8].mxu1 %vm1669_vm2, %v5758_v17  ;;  %v5052_v33 = vld [vmem:[%s5743_s4 + $0x384] ss:$392 sps:$4 sm:$0x1f]   ;;  %v5044_v34 = vld [vmem:[%s5743_s4 + $0x70] ss:$392 sps:$4 sm:$0xff]   ;;  %v1756_v35 = vand.u32 %v5047_v31, %v5747_v10 }
  0x99   : > { %2259 = vmatpush1.bf16.msra.mxu1 %v5005_v53  ;;  %2290 = vmatprep.mubr.bf16.mxu1 %v5282_v5  ;;  %v5050_v36 = vld [vmem:[%s5743_s4 + $0x380] ss:$392 sps:$4 sm:$0x1f]   ;;  %v1765_v37 = vand.u32 %v5052_v33, %v5747_v10  ;;  %v5055_v38 = vld [vmem:[%s5743_s4 + $0x7c] ss:$392 sps:$4 sm:$0xff]  }
  0x9a   : > { %2260 = vmatprep.subr.bf16.mxu1 %v1723_v57  ;;  %v5061_v39 = vld [vmem:[%s5743_s4 + $0x38c] ss:$392 sps:$4 sm:$0x1f]   ;;  %v1762_v40 = vand.u32 %v5050_v36, %v5747_v10  ;;  %v5053_v41 = vld [vmem:[%s5743_s4 + $0x78] ss:$392 sps:$4 sm:$0xff]  }
  0x9b   : > { %2220 = vmatpush1.bf16.msra.mxu0 %v1714_v55  ;;  %v5059_v42 = vld [vmem:[%s5743_s4 + $0x388] ss:$392 sps:$4 sm:$0x1f]   ;;  %v5058_v43 = vld [vmem:[%s5743_s4 + $0x84] ss:$392 sps:$4 sm:$0xff]   ;;  %v1771_v44 = vand.u32 %v5061_v39, %v5747_v10 }
  0x9c   : > { %2299 = vmatprep.subr.bf16.mxu0 %v5010_v54  ;;  %v5064_v45 = vld [vmem:[%s5743_s4 + $0x394] ss:$392 sps:$4 sm:$0x1f]   ;;  %v5056_v46 = vld [vmem:[%s5743_s4 + $0x80] ss:$392 sps:$4 sm:$0xff]   ;;  %v1768_v47 = vand.u32 %v5059_v42, %v5747_v10 }
  0x9d   : > { %2261 = vmatpush1.bf16.msra.mxu1 %v1720_v60  ;;  %v5062_v48 = vld [vmem:[%s5743_s4 + $0x390] ss:$392 sps:$4 sm:$0x1f]   ;;  %v5067_v49 = vld [vmem:[%s5743_s4 + $0x8c] ss:$392 sps:$4 sm:$0xff]   ;;  %v1777_v50 = vand.u32 %v5064_v45, %v5747_v10 }
  0x9e   : > { %4790 = vmatmul.mubr.msk.bf16.vlgmr.msra.gmra.mrb[12].mxu0 %vm1669_vm2, %v5758_v17  ;;  %2340 = vmatprep.subr.bf16.mxu1 %v5019_v63  ;;  %v5073_v51 = vld [vmem:[%s5743_s4 + $0x39c] ss:$392 sps:$4 sm:$0x1f]   ;;  %v5065_v52 = vld [vmem:[%s5743_s4 + $0x88] ss:$392 sps:$4 sm:$0xff]   ;;  %v1774_v53 = vand.u32 %v5062_v48, %v5747_v10 }
  0x9f   : > { %2300 = vmatpush1.bf16.msra.mxu0 %v5008_v59  ;;  %2331 = vmatprep.mubr.bf16.mxu0 %v5282_v5  ;;  %v5070_v54 = vld [vmem:[%s5743_s4 + $0x94] ss:$392 sps:$4 sm:$0xff]   ;;  %v5071_v55 = vld [vmem:[%s5743_s4 + $0x398] ss:$392 sps:$4 sm:$0x1f]   ;;  %v1783_v56 = vand.u32 %v5073_v51, %v5747_v10 }
  0xa0   : > { %2301 = vmatprep.subr.bf16.mxu0 %v1729_v62  ;;  %4791 = vmatmul.mubr.msk.bf16.vlgmr.msra.gmra.mrb[12].mxu1 %vm1669_vm2, %v5758_v17  ;;  %v5076_v57 = vld [vmem:[%s5743_s4 + $0x3a4] ss:$392 sps:$4 sm:$0x1f]   ;;  %v5068_v58 = vld [vmem:[%s5743_s4 + $0x90] ss:$392 sps:$4 sm:$0xff]   ;;  %v1780_v60 = vand.u32 %v5071_v55, %v5747_v10 }
  0xa1   : > { %2341 = vmatpush1.bf16.msra.mxu1 %v5017_v1  ;;  %2372 = vmatprep.mubr.bf16.mxu1 %v5282_v5  ;;  %v5074_v59 = vld [vmem:[%s5743_s4 + $0x3a0] ss:$392 sps:$4 sm:$0x1f]   ;;  %v5079_v61 = vld [vmem:[%s5743_s4 + $0x9c] ss:$392 sps:$4 sm:$0xff]   ;;  %v1789_v62 = vand.u32 %v5076_v57, %v5747_v10 }
  0xa2   : > { %2342 = vmatprep.subr.bf16.mxu1 %v1735_v6  ;;  %v5085_v63 = vld [vmem:[%s5743_s4 + $0x3ac] ss:$392 sps:$4 sm:$0x1f]   ;;  %v5077_v0 = vld [vmem:[%s5743_s4 + $0x98] ss:$392 sps:$4 sm:$0xff]   ;;  %v1786_v1 = vand.u32 %v5074_v59, %v5747_v10 }
  0xa3   : > { %2302 = vmatpush1.bf16.msra.mxu0 %v1726_v2  ;;  %v5083_v2 = vld [vmem:[%s5743_s4 + $0x3a8] ss:$392 sps:$4 sm:$0x1f]   ;;  %v5082_v3 = vld [vmem:[%s5743_s4 + $0xa4] ss:$392 sps:$4 sm:$0xff]  }
  0xa4   : > { %2381 = vmatprep.subr.bf16.mxu0 %v5022_v4  ;;  %v1795_v4 = vand.u32 %v5085_v63, %v5747_v10  ;;  %v5088_v6 = vld [vmem:[%s5743_s4 + $0x3b4] ss:$392 sps:$4 sm:$0x1f]   ;;  %v5080_v7 = vld [vmem:[%s5743_s4 + $0xa0] ss:$392 sps:$4 sm:$0xff]  }
  0xa5   : > { %2343 = vmatpush1.bf16.msra.mxu1 %v1732_v9  ;;  %v5086_v9 = vld [vmem:[%s5743_s4 + $0x3b0] ss:$392 sps:$4 sm:$0x1f]   ;;  %v1801_v11 = vand.u32 %v5088_v6, %v5747_v10  ;;  %v5098_v23 = vld [vmem:[%s5743_s4 + $0x3c0] ss:$392 sps:$4 sm:$0x1f]  }
  0xa6   : > { %4792 = vmatmul.mubr.msk.bf16.vlgmr.msra.gmra.mrb[16].mxu0 %vm1669_vm2, %v5758_v17  ;;  %2422 = vmatprep.subr.bf16.mxu1 %v5031_v12  ;;  %v5091_v12 = vld [vmem:[%s5743_s4 + $0xac] ss:$392 sps:$4 sm:$0xff]   ;;  %v1798_v14 = vand.u32 %v5086_v9, %v5747_v10  ;;  %v5092_v21 = vld [vmem:[%s5743_s4 + $0xb0] ss:$392 sps:$4 sm:$0xff]   ;;  %v5104_v33 = vld [vmem:[%s5743_s4 + $0xc0] ss:$392 sps:$4 sm:$0xff]  }
  0xa7   : > { %2382 = vmatpush1.bf16.msra.mxu0 %v5020_v8  ;;  %2413 = vmatprep.mubr.bf16.mxu0 %v5282_v5  ;;  %v1792_v8 = vand.u32 %v5083_v2, %v5747_v10  ;;  %v5101_v27 = vld [vmem:[%s5743_s4 + $0xb8] ss:$392 sps:$4 sm:$0xff]   ;;  %v5115_v36 = vld [vmem:[%s5743_s4 + $0xcc] ss:$392 sps:$4 sm:$0xff]   ;;  %v5113_v39 = vld [vmem:[%s5743_s4 + $0xc8] ss:$392 sps:$4 sm:$0xff]  }
  0xa8   : > { %2383 = vmatprep.subr.bf16.mxu0 %v1741_v13  ;;  %4793 = vmatmul.mubr.msk.bf16.vlgmr.msra.gmra.mrb[16].mxu1 %vm1669_vm2, %v5758_v17  ;;  %v5097_v13 = vld [vmem:[%s5743_s4 + $0x3bc] ss:$392 sps:$4 sm:$0x1f]   ;;  %v5116_v45 = vld [vmem:[%s5743_s4 + $0xd0] ss:$392 sps:$4 sm:$0xff]  }
  0xa9   : > { %2423 = vmatpush1.bf16.msra.mxu1 %v5029_v15  ;;  %2454 = vmatprep.mubr.bf16.mxu1 %v5282_v5  ;;  %v5089_v15 = vld [vmem:[%s5743_s4 + $0xa8] ss:$392 sps:$4 sm:$0xff]   ;;  %v1807_v19 = vand.u32 %v5097_v13, %v5747_v10  ;;  %v5118_v42 = vld [vmem:[%s5743_s4 + $0xd4] ss:$392 sps:$4 sm:$0xff]   ;;  %v5125_v51 = vld [vmem:[%s5743_s4 + $0xd8] ss:$392 sps:$4 sm:$0xff]  }
  0xaa   : > { %2424 = vmatprep.subr.bf16.mxu1 %v1747_v20  ;;  %v5100_v20 = vld [vmem:[%s5743_s4 + $0x3c4] ss:$392 sps:$4 sm:$0x1f]   ;;  %v5128_v57 = vld [vmem:[%s5743_s4 + $0xe0] ss:$392 sps:$4 sm:$0xff]  }
  0xab   : > { %2384 = vmatpush1.bf16.msra.mxu0 %v1738_v16  ;;  %v5095_v16 = vld [vmem:[%s5743_s4 + $0x3b8] ss:$392 sps:$4 sm:$0x1f]   ;;  %v5137_v63 = vld [vmem:[%s5743_s4 + $0xe8] ss:$392 sps:$4 sm:$0xff]  }
  0xac   : > { %2463 = vmatprep.subr.bf16.mxu0 %v5034_v18  ;;  %v5094_v18 = vld [vmem:[%s5743_s4 + $0xb4] ss:$392 sps:$4 sm:$0xff]   ;;  %v5134_v59 = vld [vmem:[%s5743_s4 + $0x3f0] ss:$392 sps:$4 sm:$0x1f]  }
  0xad   : > { %2425 = vmatpush1.bf16.msra.mxu1 %v1744_v24  ;;  %v5103_v24 = vld [vmem:[%s5743_s4 + $0xbc] ss:$392 sps:$4 sm:$0xff]   ;;  %v5143_v2 = vld [vmem:[%s5743_s4 + $0x3f8] ss:$392 sps:$4 sm:$0x1f]  }
  0xae   : > { %4794 = vmatmul.mubr.msk.bf16.vlgmr.msra.gmra.mrb[20].mxu0 %vm1669_vm2, %v5758_v17  ;;  %2504 = vmatprep.subr.bf16.mxu1 %v5043_v25  ;;  %v1813_v25 = vand.u32 %v5100_v20, %v5747_v10  ;;  %v5140_v6 = vld [vmem:[%s5743_s4 + $0xf0] ss:$392 sps:$4 sm:$0xff]   ;;  %v5151_v9 = vld [vmem:[%s5743_s4 + $0xfc] ss:$392 sps:$4 sm:$0xff]   ;;  %v5152_v20 = vld [vmem:[%s5743_s4 + $0x100] ss:$392 sps:$4 sm:$0xff]  }
  0xaf   : > { %2464 = vmatpush1.bf16.msra.mxu0 %v5032_v22  ;;  %2495 = vmatprep.mubr.bf16.mxu0 %v5282_v5  ;;  %v1804_v22 = vand.u32 %v5095_v16, %v5747_v10  ;;  %v5149_v13 = vld [vmem:[%s5743_s4 + $0xf8] ss:$392 sps:$4 sm:$0xff]   ;;  %v5154_v16 = vld [vmem:[%s5743_s4 + $0x104] ss:$392 sps:$4 sm:$0xff]  }
  0xb0   : > { %2465 = vmatprep.subr.bf16.mxu0 %v1753_v26  ;;  %4795 = vmatmul.mubr.msk.bf16.vlgmr.msra.gmra.mrb[20].mxu1 %vm1669_vm2, %v5758_v17  ;;  %v5109_v26 = vld [vmem:[%s5743_s4 + $0x3cc] ss:$392 sps:$4 sm:$0x1f]  }
  0xb1   : > { %2505 = vmatpush1.bf16.msra.mxu1 %v5041_v28  ;;  %2536 = vmatprep.mubr.bf16.mxu1 %v5282_v5  ;;  %v5106_v28 = vld [vmem:[%s5743_s4 + $0xc4] ss:$392 sps:$4 sm:$0xff]   ;;  %v1819_v31 = vand.u32 %v5109_v26, %v5747_v10  ;;  %v5161_v26 = vld [vmem:[%s5743_s4 + $0x108] ss:$392 sps:$4 sm:$0xff]  }
  0xb2   : > { %2506 = vmatprep.subr.bf16.mxu1 %v1759_v32  ;;  %v5112_v32 = vld [vmem:[%s5743_s4 + $0x3d4] ss:$392 sps:$4 sm:$0x1f]  }
  0xb3   : > { %2466 = vmatpush1.bf16.msra.mxu0 %v1750_v30  ;;  %v5107_v30 = vld [vmem:[%s5743_s4 + $0x3c8] ss:$392 sps:$4 sm:$0x1f]  }
  0xb4   : > { %2545 = vmatprep.subr.bf16.mxu0 %v5046_v29  ;;  %v1810_v29 = vand.u32 %v5098_v23, %v5747_v10 }
  0xb5   : > { %2507 = vmatpush1.bf16.msra.mxu1 %v1756_v35  ;;  %v1816_v35 = vand.u32 %v5107_v30, %v5747_v10 }
  0xb6   : > { %4796 = vmatmul.mubr.msk.bf16.vlgmr.msra.gmra.mrb[24].mxu0 %vm1669_vm2, %v5758_v17  ;;  %2586 = vmatprep.subr.bf16.mxu1 %v5055_v38  ;;  %v5121_v38 = vld [vmem:[%s5743_s4 + $0x3dc] ss:$392 sps:$4 sm:$0x1f]  }
  0xb7   : > { %2546 = vmatpush1.bf16.msra.mxu0 %v5044_v34  ;;  %2577 = vmatprep.mubr.bf16.mxu0 %v5282_v5  ;;  %v5110_v34 = vld [vmem:[%s5743_s4 + $0x3d0] ss:$392 sps:$4 sm:$0x1f]  }
  0xb8   : > { %2547 = vmatprep.subr.bf16.mxu0 %v1765_v37  ;;  %4797 = vmatmul.mubr.msk.bf16.vlgmr.msra.gmra.mrb[24].mxu1 %vm1669_vm2, %v5758_v17  ;;  %v1825_v37 = vand.u32 %v5112_v32, %v5747_v10  ;;  %v5164_v32 = vld [vmem:[%s5743_s4 + $0x110] ss:$392 sps:$4 sm:$0xff]  }
  0xb9   : > { %2587 = vmatpush1.bf16.msra.mxu1 %v5053_v41  ;;  %2618 = vmatprep.mubr.bf16.mxu1 %v5282_v5  ;;  %v5119_v41 = vld [vmem:[%s5743_s4 + $0x3d8] ss:$392 sps:$4 sm:$0x1f]  }
  0xba   : > { %2588 = vmatprep.subr.bf16.mxu1 %v1771_v44  ;;  %v5124_v44 = vld [vmem:[%s5743_s4 + $0x3e4] ss:$392 sps:$4 sm:$0x1f]  }
  0xbb   : > { %2548 = vmatpush1.bf16.msra.mxu0 %v1762_v40  ;;  %v1822_v40 = vand.u32 %v5110_v34, %v5747_v10  ;;  %v1837_v48 = vand.u32 %v5124_v44, %v5747_v10  ;;  %v5170_v34 = vld [vmem:[%s5743_s4 + $0x420] ss:$392 sps:$4 sm:$0x1f]  }
  0xbc   : > { %2627 = vmatprep.subr.bf16.mxu0 %v5058_v43  ;;  %v1831_v43 = vand.u32 %v5121_v38, %v5747_v10  ;;  %v1882_v38 = vand.u32 %v5170_v34, %v5747_v10  ;;  %v5176_v44 = vld [vmem:[%s5743_s4 + $0x120] ss:$392 sps:$4 sm:$0xff]  }
  0xbd   : > { %2589 = vmatpush1.bf16.msra.mxu1 %v1768_v47  ;;  %v5122_v47 = vld [vmem:[%s5743_s4 + $0x3e0] ss:$392 sps:$4 sm:$0x1f]  }
  0xbe   : > { %4798 = vmatmul.mubr.msk.bf16.vlgmr.msra.gmra.mrb[28].mxu0 %vm1669_vm2, %v5758_v17  ;;  %2668 = vmatprep.subr.bf16.mxu1 %v5067_v49  ;;  %v5127_v49 = vld [vmem:[%s5743_s4 + $0xdc] ss:$392 sps:$4 sm:$0xff]  }
  0xbf   : > { %2628 = vmatpush1.bf16.msra.mxu0 %v5056_v46  ;;  %2659 = vmatprep.mubr.bf16.mxu0 %v5282_v5  ;;  %v1828_v46 = vand.u32 %v5119_v41, %v5747_v10  ;;  %v5178_v41 = vld [vmem:[%s5743_s4 + $0x124] ss:$392 sps:$4 sm:$0xff]  }
  0xc0   : > { %2629 = vmatprep.subr.bf16.mxu0 %v1777_v50  ;;  %4799 = vmatmul.mubr.msk.bf16.vlgmr.msra.gmra.mrb[28].mxu1 %vm1669_vm2, %v5758_v17  ;;  %v5133_v50 = vld [vmem:[%s5743_s4 + $0x3ec] ss:$392 sps:$4 sm:$0x1f]  }
  0xc1   : > { %2669 = vmatpush1.bf16.msra.mxu1 %v5065_v52  ;;  %2700 = vmatprep.mubr.bf16.mxu1 %v5282_v5  ;;  %v1834_v52 = vand.u32 %v5122_v47, %v5747_v10  ;;  %v1843_v55 = vand.u32 %v5133_v50, %v5747_v10 }
  0xc2   : > { %2670 = vmatprep.subr.bf16.mxu1 %v1783_v56  ;;  %v5136_v56 = vld [vmem:[%s5743_s4 + $0x3f4] ss:$392 sps:$4 sm:$0x1f]  }
  0xc3   : > { %2630 = vmatpush1.bf16.msra.mxu0 %v1774_v53  ;;  %v5130_v53 = vld [vmem:[%s5743_s4 + $0xe4] ss:$392 sps:$4 sm:$0xff]  }
  0xc4   : > { %2709 = vmatprep.subr.bf16.mxu0 %v5070_v54  ;;  %v5131_v54 = vld [vmem:[%s5743_s4 + $0x3e8] ss:$392 sps:$4 sm:$0x1f]  }
  0xc5   : > { %2671 = vmatpush1.bf16.msra.mxu1 %v1780_v60  ;;  %v5139_v60 = vld [vmem:[%s5743_s4 + $0xec] ss:$392 sps:$4 sm:$0xff]  }
  0xc6   : > { %4800 = vmatmul.mubr.msk.bf16.vlgmr.msra.gmra.mrb[32].mxu0 %vm1669_vm2, %v5758_v17  ;;  %2750 = vmatprep.subr.bf16.mxu1 %v5079_v61  ;;  %v1849_v61 = vand.u32 %v5136_v56, %v5747_v10  ;;  %v5188_v56 = vld [vmem:[%s5743_s4 + $0x130] ss:$392 sps:$4 sm:$0xff]  }
  0xc7   : > { %2710 = vmatpush1.bf16.msra.mxu0 %v5068_v58  ;;  %2741 = vmatprep.mubr.bf16.mxu0 %v5282_v5  ;;  %v1840_v58 = vand.u32 %v5131_v54, %v5747_v10 }
  0xc8   : > { %2711 = vmatprep.subr.bf16.mxu0 %v1789_v62  ;;  %4801 = vmatmul.mubr.msk.bf16.vlgmr.msra.gmra.mrb[32].mxu1 %vm1669_vm2, %v5758_v17  ;;  %v5145_v62 = vld [vmem:[%s5743_s4 + $0x3fc] ss:$392 sps:$4 sm:$0x1f]  }
  0xc9   : > { %2751 = vmatpush1.bf16.msra.mxu1 %v5077_v0  ;;  %2782 = vmatprep.mubr.bf16.mxu1 %v5282_v5  ;;  %v5142_v0 = vld [vmem:[%s5743_s4 + $0xf4] ss:$392 sps:$4 sm:$0xff]  }
  0xca   : > { %2752 = vmatprep.subr.bf16.mxu1 %v1795_v4  ;;  %v5148_v4 = vld [vmem:[%s5743_s4 + $0x404] ss:$392 sps:$4 sm:$0x1f]  }
  0xcb   : > { %2712 = vmatpush1.bf16.msra.mxu0 %v1786_v1  ;;  %v1846_v1 = vand.u32 %v5134_v59, %v5747_v10 }
  0xcc   : > { %2791 = vmatprep.subr.bf16.mxu0 %v5082_v3  ;;  %v1855_v3 = vand.u32 %v5145_v62, %v5747_v10 }
  0xcd   : > { %2753 = vmatpush1.bf16.msra.mxu1 %v1792_v8  ;;  %v1852_v8 = vand.u32 %v5143_v2, %v5747_v10 }
  0xce   : > { %4802 = vmatmul.mubr.msk.bf16.vlgmr.msra.gmra.mrb[36].mxu0 %vm1669_vm2, %v5758_v17  ;;  %2832 = vmatprep.subr.bf16.mxu1 %v5091_v12  ;;  %v5157_v12 = vld [vmem:[%s5743_s4 + $0x40c] ss:$392 sps:$4 sm:$0x1f]  }
  0xcf   : > { %2792 = vmatpush1.bf16.msra.mxu0 %v5080_v7  ;;  %2823 = vmatprep.mubr.bf16.mxu0 %v5282_v5  ;;  %v5146_v7 = vld [vmem:[%s5743_s4 + $0x400] ss:$392 sps:$4 sm:$0x1f]  }
  0xd0   : > { %2793 = vmatprep.subr.bf16.mxu0 %v1801_v11  ;;  %4803 = vmatmul.mubr.msk.bf16.vlgmr.msra.gmra.mrb[36].mxu1 %vm1669_vm2, %v5758_v17  ;;  %v1861_v11 = vand.u32 %v5148_v4, %v5747_v10  ;;  %v5200_v4 = vld [vmem:[%s5743_s4 + $0x140] ss:$392 sps:$4 sm:$0xff]  }
  0xd1   : > { %2833 = vmatpush1.bf16.msra.mxu1 %v5089_v15  ;;  %2864 = vmatprep.mubr.bf16.mxu1 %v5282_v5  ;;  %v5155_v15 = vld [vmem:[%s5743_s4 + $0x408] ss:$392 sps:$4 sm:$0x1f]  }
  0xd2   : > { %2834 = vmatprep.subr.bf16.mxu1 %v1807_v19  ;;  %v5160_v19 = vld [vmem:[%s5743_s4 + $0x414] ss:$392 sps:$4 sm:$0x1f]  }
  0xd3   : > { %2794 = vmatpush1.bf16.msra.mxu0 %v1798_v14  ;;  %v1858_v14 = vand.u32 %v5146_v7, %v5747_v10  ;;  %v1873_v23 = vand.u32 %v5160_v19, %v5747_v10  ;;  %v5206_v7 = vld [vmem:[%s5743_s4 + $0x450] ss:$392 sps:$4 sm:$0x1f]  }
  0xd4   : > { %2873 = vmatprep.subr.bf16.mxu0 %v5094_v18  ;;  %v1867_v18 = vand.u32 %v5157_v12, %v5747_v10  ;;  %v1918_v12 = vand.u32 %v5206_v7, %v5747_v10  ;;  %v5212_v19 = vld [vmem:[%s5743_s4 + $0x150] ss:$392 sps:$4 sm:$0xff]  }
  0xd5   : > { %2835 = vmatpush1.bf16.msra.mxu1 %v1804_v22  ;;  %v5158_v22 = vld [vmem:[%s5743_s4 + $0x410] ss:$392 sps:$4 sm:$0x1f]  }
  0xd6   : > { %4804 = vmatmul.mubr.msk.bf16.vlgmr.msra.gmra.mrb[40].mxu0 %vm1669_vm2, %v5758_v17  ;;  %2914 = vmatprep.subr.bf16.mxu1 %v5103_v24  ;;  %v5163_v24 = vld [vmem:[%s5743_s4 + $0x10c] ss:$392 sps:$4 sm:$0xff]  }
  0xd7   : > { %2874 = vmatpush1.bf16.msra.mxu0 %v5092_v21  ;;  %2905 = vmatprep.mubr.bf16.mxu0 %v5282_v5  ;;  %v1864_v21 = vand.u32 %v5155_v15, %v5747_v10  ;;  %v5214_v15 = vld [vmem:[%s5743_s4 + $0x154] ss:$392 sps:$4 sm:$0xff]  }
  0xd8   : > { %2875 = vmatprep.subr.bf16.mxu0 %v1813_v25  ;;  %4805 = vmatmul.mubr.msk.bf16.vlgmr.msra.gmra.mrb[40].mxu1 %vm1669_vm2, %v5758_v17  ;;  %v5169_v25 = vld [vmem:[%s5743_s4 + $0x41c] ss:$392 sps:$4 sm:$0x1f]  }
  0xd9   : > { %2915 = vmatpush1.bf16.msra.mxu1 %v5101_v27  ;;  %2946 = vmatprep.mubr.bf16.mxu1 %v5282_v5  ;;  %v1870_v27 = vand.u32 %v5158_v22, %v5747_v10  ;;  %v1879_v30 = vand.u32 %v5169_v25, %v5747_v10 }
  0xda   : > { %2916 = vmatprep.subr.bf16.mxu1 %v1819_v31  ;;  %v5172_v31 = vld [vmem:[%s5743_s4 + $0x424] ss:$392 sps:$4 sm:$0x1f]  }
  0xdb   : > { %2876 = vmatpush1.bf16.msra.mxu0 %v1810_v29  ;;  %v5167_v29 = vld [vmem:[%s5743_s4 + $0x418] ss:$392 sps:$4 sm:$0x1f]  }
  0xdc   : > { %2955 = vmatprep.subr.bf16.mxu0 %v5106_v28  ;;  %v5166_v28 = vld [vmem:[%s5743_s4 + $0x114] ss:$392 sps:$4 sm:$0xff]  }
  0xdd   : > { %2917 = vmatpush1.bf16.msra.mxu1 %v1816_v35  ;;  %v5175_v35 = vld [vmem:[%s5743_s4 + $0x11c] ss:$392 sps:$4 sm:$0xff]  }
  0xde   : > { %4806 = vmatmul.mubr.msk.bf16.vlgmr.msra.gmra.mrb[44].mxu0 %vm1669_vm2, %v5758_v17  ;;  %2996 = vmatprep.subr.bf16.mxu1 %v5115_v36  ;;  %v1885_v36 = vand.u32 %v5172_v31, %v5747_v10  ;;  %v5224_v31 = vld [vmem:[%s5743_s4 + $0x160] ss:$392 sps:$4 sm:$0xff]  }
  0xdf   : > { %2956 = vmatpush1.bf16.msra.mxu0 %v5104_v33  ;;  %2987 = vmatprep.mubr.bf16.mxu0 %v5282_v5  ;;  %v1876_v33 = vand.u32 %v5167_v29, %v5747_v10 }
  0xe0   : > { %2957 = vmatprep.subr.bf16.mxu0 %v1825_v37  ;;  %4807 = vmatmul.mubr.msk.bf16.vlgmr.msra.gmra.mrb[44].mxu1 %vm1669_vm2, %v5758_v17  ;;  %v5181_v37 = vld [vmem:[%s5743_s4 + $0x42c] ss:$392 sps:$4 sm:$0x1f]  }
  0xe1   : > { %2997 = vmatpush1.bf16.msra.mxu1 %v5113_v39  ;;  %3028 = vmatprep.mubr.bf16.mxu1 %v5282_v5  ;;  %v5173_v39 = vld [vmem:[%s5743_s4 + $0x118] ss:$392 sps:$4 sm:$0xff]  }
  0xe2   : > { %2998 = vmatprep.subr.bf16.mxu1 %v1831_v43  ;;  %v5184_v43 = vld [vmem:[%s5743_s4 + $0x434] ss:$392 sps:$4 sm:$0x1f]  }
  0xe3   : > { %2958 = vmatpush1.bf16.msra.mxu0 %v1822_v40  ;;  %v5179_v40 = vld [vmem:[%s5743_s4 + $0x428] ss:$392 sps:$4 sm:$0x1f]   ;;  %v1897_v47 = vand.u32 %v5184_v43, %v5747_v10 }
  0xe4   : > { %3037 = vmatprep.subr.bf16.mxu0 %v5118_v42  ;;  %v1891_v42 = vand.u32 %v5181_v37, %v5747_v10  ;;  %v5236_v43 = vld [vmem:[%s5743_s4 + $0x170] ss:$392 sps:$4 sm:$0xff]  }
  0xe5   : > { %2999 = vmatpush1.bf16.msra.mxu1 %v1828_v46  ;;  %v5182_v46 = vld [vmem:[%s5743_s4 + $0x430] ss:$392 sps:$4 sm:$0x1f]  }
  0xe6   : > { %4808 = vmatmul.mubr.msk.bf16.vlgmr.msra.gmra.mrb[48].mxu0 %vm1669_vm2, %v5758_v17  ;;  %3078 = vmatprep.subr.bf16.mxu1 %v5127_v49  ;;  %v5193_v49 = vld [vmem:[%s5743_s4 + $0x43c] ss:$392 sps:$4 sm:$0x1f]   ;;  %v1894_v50 = vand.u32 %v5182_v46, %v5747_v10 }
  0xe7   : > { %3038 = vmatpush1.bf16.msra.mxu0 %v5116_v45  ;;  %3069 = vmatprep.mubr.bf16.mxu0 %v5282_v5  ;;  %v1888_v45 = vand.u32 %v5179_v40, %v5747_v10  ;;  %v1903_v54 = vand.u32 %v5193_v49, %v5747_v10  ;;  %v5238_v40 = vld [vmem:[%s5743_s4 + $0x174] ss:$392 sps:$4 sm:$0xff]  }
  0xe8   : > { %3039 = vmatprep.subr.bf16.mxu0 %v1837_v48  ;;  %4809 = vmatmul.mubr.msk.bf16.vlgmr.msra.gmra.mrb[48].mxu1 %vm1669_vm2, %v5758_v17  ;;  %v5187_v48 = vld [vmem:[%s5743_s4 + $0x12c] ss:$392 sps:$4 sm:$0xff]  }
  0xe9   : > { %3079 = vmatpush1.bf16.msra.mxu1 %v5125_v51  ;;  %3110 = vmatprep.mubr.bf16.mxu1 %v5282_v5  ;;  %v5185_v51 = vld [vmem:[%s5743_s4 + $0x128] ss:$392 sps:$4 sm:$0xff]  }
  0xea   : > { %3080 = vmatprep.subr.bf16.mxu1 %v1843_v55  ;;  %v5196_v55 = vld [vmem:[%s5743_s4 + $0x444] ss:$392 sps:$4 sm:$0x1f]  }
  0xeb   : > { %3040 = vmatpush1.bf16.msra.mxu0 %v1834_v52  ;;  %v5191_v52 = vld [vmem:[%s5743_s4 + $0x438] ss:$392 sps:$4 sm:$0x1f]   ;;  %v1909_v59 = vand.u32 %v5196_v55, %v5747_v10 }
  0xec   : > { %3119 = vmatprep.subr.bf16.mxu0 %v5130_v53  ;;  %v5190_v53 = vld [vmem:[%s5743_s4 + $0x134] ss:$392 sps:$4 sm:$0xff]   ;;  %v5248_v55 = vld [vmem:[%s5743_s4 + $0x180] ss:$392 sps:$4 sm:$0xff]  }
  0xed   : > { %3081 = vmatpush1.bf16.msra.mxu1 %v1840_v58  ;;  %v5194_v58 = vld [vmem:[%s5743_s4 + $0x440] ss:$392 sps:$4 sm:$0x1f]  }
  0xee   : > { %4810 = vmatmul.mubr.msk.bf16.vlgmr.msra.gmra.mrb[52].mxu0 %vm1669_vm2, %v5758_v17  ;;  %3160 = vmatprep.subr.bf16.mxu1 %v5139_v60  ;;  %v5199_v60 = vld [vmem:[%s5743_s4 + $0x13c] ss:$392 sps:$4 sm:$0xff]   ;;  %v1906_v62 = vand.u32 %v5194_v58, %v5747_v10 }
  0xef   : > { %3120 = vmatpush1.bf16.msra.mxu0 %v5128_v57  ;;  %3151 = vmatprep.mubr.bf16.mxu0 %v5282_v5  ;;  %v1900_v57 = vand.u32 %v5191_v52, %v5747_v10  ;;  %v5250_v52 = vld [vmem:[%s5743_s4 + $0x184] ss:$392 sps:$4 sm:$0xff]  }
  0xf0   : > { %3121 = vmatprep.subr.bf16.mxu0 %v1849_v61  ;;  %4811 = vmatmul.mubr.msk.bf16.vlgmr.msra.gmra.mrb[52].mxu1 %vm1669_vm2, %v5758_v17  ;;  %v6026_v17 = vld [vmem:[%s6362_s0] sm:$0xf]  ;;  %v5205_v61 = vld [vmem:[%s5743_s4 + $0x44c] ss:$392 sps:$4 sm:$0x1f]  }
  0xf1   : > { %3161 = vmatpush1.bf16.msra.mxu1 %v5137_v63  ;;  %3192 = vmatprep.mubr.bf16.mxu1 %v5282_v5  ;;  %v5197_v63 = vld [vmem:[%s5743_s4 + $0x138] ss:$392 sps:$4 sm:$0xff]   ;;  %v1915_v2 = vand.u32 %v5205_v61, %v5747_v10 }
  0xf2   : > { %3162 = vmatprep.subr.bf16.mxu1 %v1855_v3  ;;  %v5208_v3 = vld [vmem:[%s5743_s4 + $0x454] ss:$392 sps:$4 sm:$0x1f]  }
  0xf3   : > { %3122 = vmatpush1.bf16.msra.mxu0 %v1846_v1  ;;  %v5202_v1 = vld [vmem:[%s5743_s4 + $0x144] ss:$392 sps:$4 sm:$0xff]  }
  0xf4   : > { %3201 = vmatprep.subr.bf16.mxu0 %v5142_v0  ;;  %v5203_v0 = vld [vmem:[%s5743_s4 + $0x448] ss:$392 sps:$4 sm:$0x1f]  }
  0xf5   : > { %3163 = vmatpush1.bf16.msra.mxu1 %v1852_v8  ;;  %v1921_v8 = vand.u32 %v5208_v3, %v5747_v10 }
  0xf6   : > { %4812 = vmatmul.mubr.msk.bf16.vlgmr.msra.gmra.mrb[56].mxu0 %vm1669_vm2, %v6026_v17  ;;  %3242 = vmatprep.subr.bf16.mxu1 %v5151_v9  ;;  %v5211_v9 = vld [vmem:[%s5743_s4 + $0x14c] ss:$392 sps:$4 sm:$0xff]  }
  0xf7   : > { %3202 = vmatpush1.bf16.msra.mxu0 %v5140_v6  ;;  %3233 = vmatprep.mubr.bf16.mxu0 %v5282_v5  ;;  %v1912_v6 = vand.u32 %v5203_v0, %v5747_v10 }
  0xf8   : > { %3203 = vmatprep.subr.bf16.mxu0 %v1861_v11  ;;  %4813 = vmatmul.mubr.msk.bf16.vlgmr.msra.gmra.mrb[56].mxu1 %vm1669_vm2, %v6026_v17  ;;  %v5217_v11 = vld [vmem:[%s5743_s4 + $0x45c] ss:$392 sps:$4 sm:$0x1f]  }
  0xf9   : > { %3243 = vmatpush1.bf16.msra.mxu1 %v5149_v13  ;;  %3274 = vmatprep.mubr.bf16.mxu1 %v5282_v5  ;;  %v5209_v13 = vld [vmem:[%s5743_s4 + $0x148] ss:$392 sps:$4 sm:$0xff]  }
  0xfa   : > { %3244 = vmatprep.subr.bf16.mxu1 %v1867_v18  ;;  %v5220_v18 = vld [vmem:[%s5743_s4 + $0x464] ss:$392 sps:$4 sm:$0x1f]  }
  0xfb   : > { %3204 = vmatpush1.bf16.msra.mxu0 %v1858_v14  ;;  %v5215_v14 = vld [vmem:[%s5743_s4 + $0x458] ss:$392 sps:$4 sm:$0x1f]   ;;  %v1933_v22 = vand.u32 %v5220_v18, %v5747_v10 }
  0xfc   : > { %3283 = vmatprep.subr.bf16.mxu0 %v5154_v16  ;;  %v1927_v16 = vand.u32 %v5217_v11, %v5747_v10 }
  0xfd   : > { %3245 = vmatpush1.bf16.msra.mxu1 %v1864_v21  ;;  %v5218_v21 = vld [vmem:[%s5743_s4 + $0x460] ss:$392 sps:$4 sm:$0x1f]  }
  0xfe   : > { %4814 = vmatmul.mubr.msk.bf16.vlgmr.msra.gmra.mrb[60].mxu0 %vm1669_vm2, %v6026_v17  ;;  %3324 = vmatprep.subr.bf16.mxu1 %v5163_v24  ;;  %v5229_v24 = vld [vmem:[%s5743_s4 + $0x46c] ss:$392 sps:$4 sm:$0x1f]   ;;  %v1930_v25 = vand.u32 %v5218_v21, %v5747_v10 }
  0xff   : > { %3284 = vmatpush1.bf16.msra.mxu0 %v5152_v20  ;;  %3315 = vmatprep.mubr.bf16.mxu0 %v5282_v5  ;;  %v1924_v20 = vand.u32 %v5215_v14, %v5747_v10  ;;  %v1939_v29 = vand.u32 %v5229_v24, %v5747_v10 }
 0x100   : > { %3285 = vmatprep.subr.bf16.mxu0 %v1873_v23  ;;  %4815 = vmatmul.mubr.msk.bf16.vlgmr.msra.gmra.mrb[60].mxu1 %vm1669_vm2, %v6026_v17  ;;  %v5223_v23 = vld [vmem:[%s5743_s4 + $0x15c] ss:$392 sps:$4 sm:$0xff]  }
 0x101   : > { %3325 = vmatpush1.bf16.msra.mxu1 %v5161_v26  ;;  %3356 = vmatprep.mubr.bf16.mxu1 %v5282_v5  ;;  %v5221_v26 = vld [vmem:[%s5743_s4 + $0x158] ss:$392 sps:$4 sm:$0xff]  }
 0x102   : > { %3326 = vmatprep.subr.bf16.mxu1 %v1879_v30  ;;  %v5232_v30 = vld [vmem:[%s5743_s4 + $0x474] ss:$392 sps:$4 sm:$0x1f]  }
 0x103   : > { %3286 = vmatpush1.bf16.msra.mxu0 %v1870_v27  ;;  %v5227_v27 = vld [vmem:[%s5743_s4 + $0x468] ss:$392 sps:$4 sm:$0x1f]   ;;  %v1945_v34 = vand.u32 %v5232_v30, %v5747_v10 }
 0x104   : > { %3365 = vmatprep.subr.bf16.mxu0 %v5166_v28  ;;  %v5226_v28 = vld [vmem:[%s5743_s4 + $0x164] ss:$392 sps:$4 sm:$0xff]  }
 0x105   : > { %3327 = vmatpush1.bf16.msra.mxu1 %v1876_v33  ;;  %v5230_v33 = vld [vmem:[%s5743_s4 + $0x470] ss:$392 sps:$4 sm:$0x1f]  }
 0x106   : > { %4816 = vmatmul.mubr.msk.bf16.vlgmr.msra.gmra.mrb[64].mxu0 %vm1669_vm2, %v6026_v17  ;;  %3406 = vmatprep.subr.bf16.mxu1 %v5175_v35  ;;  %v5235_v35 = vld [vmem:[%s5743_s4 + $0x16c] ss:$392 sps:$4 sm:$0xff]   ;;  %v1942_v37 = vand.u32 %v5230_v33, %v5747_v10 }
 0x107   : > { %3366 = vmatpush1.bf16.msra.mxu0 %v5164_v32  ;;  %3397 = vmatprep.mubr.bf16.mxu0 %v5282_v5  ;;  %v1936_v32 = vand.u32 %v5227_v27, %v5747_v10 }
 0x108   : > { %3367 = vmatprep.subr.bf16.mxu0 %v1885_v36  ;;  %4817 = vmatmul.mubr.msk.bf16.vlgmr.msra.gmra.mrb[64].mxu1 %vm1669_vm2, %v6026_v17  ;;  %v5241_v36 = vld [vmem:[%s5743_s4 + $0x47c] ss:$392 sps:$4 sm:$0x1f]  }
 0x109   : > { %3407 = vmatpush1.bf16.msra.mxu1 %v5173_v39  ;;  %3438 = vmatprep.mubr.bf16.mxu1 %v5282_v5  ;;  %v5239_v39 = vld [vmem:[%s5743_s4 + $0x478] ss:$392 sps:$4 sm:$0x1f]  }
 0x10a   : > { %3408 = vmatprep.subr.bf16.mxu1 %v1891_v42  ;;  %v5244_v42 = vld [vmem:[%s5743_s4 + $0x484] ss:$392 sps:$4 sm:$0x1f]  }
 0x10b   : > { %3368 = vmatpush1.bf16.msra.mxu0 %v1882_v38  ;;  %v5233_v38 = vld [vmem:[%s5743_s4 + $0x168] ss:$392 sps:$4 sm:$0xff]   ;;  %v1957_v46 = vand.u32 %v5244_v42, %v5747_v10 }
 0x10c   : > { %3447 = vmatprep.subr.bf16.mxu0 %v5178_v41  ;;  %v1951_v41 = vand.u32 %v5241_v36, %v5747_v10 }
 0x10d   : > { %3409 = vmatpush1.bf16.msra.mxu1 %v1888_v45  ;;  %v5242_v45 = vld [vmem:[%s5743_s4 + $0x480] ss:$392 sps:$4 sm:$0x1f]  }
 0x10e   : > { %4818 = vmatmul.mubr.msk.bf16.vlgmr.msra.gmra.mrb[68].mxu0 %vm1669_vm2, %v6026_v17  ;;  %3488 = vmatprep.subr.bf16.mxu1 %v5187_v48  ;;  %v5253_v48 = vld [vmem:[%s5743_s4 + $0x48c] ss:$392 sps:$4 sm:$0x1f]   ;;  %v1954_v49 = vand.u32 %v5242_v45, %v5747_v10 }
 0x10f   : > { %3448 = vmatpush1.bf16.msra.mxu0 %v5176_v44  ;;  %3479 = vmatprep.mubr.bf16.mxu0 %v5282_v5  ;;  %v1948_v44 = vand.u32 %v5239_v39, %v5747_v10 }
 0x110   : > { %3449 = vmatprep.subr.bf16.mxu0 %v1897_v47  ;;  %4819 = vmatmul.mubr.msk.bf16.vlgmr.msra.gmra.mrb[68].mxu1 %vm1669_vm2, %v6026_v17  ;;  %v5247_v47 = vld [vmem:[%s5743_s4 + $0x17c] ss:$392 sps:$4 sm:$0xff]  }
 0x111   : > { %3489 = vmatpush1.bf16.msra.mxu1 %v5185_v51  ;;  %3520 = vmatprep.mubr.bf16.mxu1 %v5282_v5  ;;  %v5251_v51 = vld [vmem:[%s5743_s4 + $0x488] ss:$392 sps:$4 sm:$0x1f]  }
 0x112   : > { %3490 = vmatprep.subr.bf16.mxu1 %v1903_v54  ;;  %v5256_v54 = vld [vmem:[%s5743_s4 + $0x494] ss:$392 sps:$4 sm:$0x1f]  }
 0x113   : > { %3450 = vmatpush1.bf16.msra.mxu0 %v1894_v50  ;;  %v5245_v50 = vld [vmem:[%s5743_s4 + $0x178] ss:$392 sps:$4 sm:$0xff]   ;;  %v1969_v58 = vand.u32 %v5256_v54, %v5747_v10 }
 0x114   : > { %3529 = vmatprep.subr.bf16.mxu0 %v5190_v53  ;;  %v1963_v53 = vand.u32 %v5253_v48, %v5747_v10 }
 0x115   : > { %3491 = vmatpush1.bf16.msra.mxu1 %v1900_v57  ;;  %v5254_v57 = vld [vmem:[%s5743_s4 + $0x490] ss:$392 sps:$4 sm:$0x1f]  }
 0x116   : > { %4820 = vmatmul.mubr.msk.bf16.vlgmr.msra.gmra.mrb[72].mxu0 %vm1669_vm2, %v6026_v17  ;;  %3570 = vmatprep.subr.bf16.mxu1 %v5199_v60  ;;  %v6198_v60 = vpop.permute.xlu0 %784 }
 0x117   : > { %3530 = vmatpush1.bf16.msra.mxu0 %v5188_v56  ;;  %3561 = vmatprep.mubr.bf16.mxu0 %v5282_v5  ;;  %v1960_v56 = vand.u32 %v5251_v51, %v5747_v10 }
 0x118   : > { %3531 = vmatprep.subr.bf16.mxu0 %v1909_v59  ;;  %4821 = vmatmul.mubr.msk.bf16.vlgmr.msra.gmra.mrb[72].mxu1 %vm1669_vm2, %v6026_v17  ;;  %v1966_v59 = vand.u32 %v5254_v57, %v5747_v10 }
 0x119   : > { %3571 = vmatpush1.bf16.msra.mxu1 %v5197_v63  ;;  %3602 = vmatprep.mubr.bf16.mxu1 %v5282_v5 }
 0x11a   : > { %3572 = vmatprep.subr.bf16.mxu1 %v1915_v2 }
 0x11b   : > { %3532 = vmatpush1.bf16.msra.mxu0 %v1906_v62 }
 0x11c   : > { %3611 = vmatprep.subr.bf16.mxu0 %v5202_v1 }
 0x11d   : > { %3573 = vmatpush1.bf16.msra.mxu1 %v1912_v6 }
 0x11e   : > { %4822 = vmatmul.mubr.msk.bf16.vlgmr.msra.gmra.mrb[76].mxu0 %vm1669_vm2, %v6026_v17  ;;  %3652 = vmatprep.subr.bf16.mxu1 %v5211_v9 }
 0x11f   : > { %3612 = vmatpush1.bf16.msra.mxu0 %v5200_v4  ;;  %3643 = vmatprep.mubr.bf16.mxu0 %v5282_v5 }
 0x120   : > { %3613 = vmatprep.subr.bf16.mxu0 %v1921_v8  ;;  %4823 = vmatmul.mubr.msk.bf16.vlgmr.msra.gmra.mrb[76].mxu1 %vm1669_vm2, %v6026_v17 }
 0x121   : > { %3653 = vmatpush1.bf16.msra.mxu1 %v5209_v13  ;;  %3684 = vmatprep.mubr.bf16.mxu1 %v5282_v5 }
 0x122   : > { %3654 = vmatprep.subr.bf16.mxu1 %v1927_v16 }
 0x123   : > { %3614 = vmatpush1.bf16.msra.mxu0 %v1918_v12 }
 0x124   : > { %3693 = vmatprep.subr.bf16.mxu0 %v5214_v15 }
 0x125   : > { %3655 = vmatpush1.bf16.msra.mxu1 %v1924_v20 }
 0x126   : > { %4824 = vmatmul.mubr.msk.bf16.vlgmr.msra.gmra.mrb[80].mxu0 %vm1669_vm2, %v6026_v17  ;;  %3734 = vmatprep.subr.bf16.mxu1 %v5223_v23 }
 0x127   : > { %3694 = vmatpush1.bf16.msra.mxu0 %v5212_v19  ;;  %3725 = vmatprep.mubr.bf16.mxu0 %v5282_v5 }
 0x128   : > { %3695 = vmatprep.subr.bf16.mxu0 %v1933_v22  ;;  %4825 = vmatmul.mubr.msk.bf16.vlgmr.msra.gmra.mrb[80].mxu1 %vm1669_vm2, %v6026_v17 }
 0x129   : > { %3735 = vmatpush1.bf16.msra.mxu1 %v5221_v26  ;;  %3766 = vmatprep.mubr.bf16.mxu1 %v5282_v5 }
 0x12a   : > { %3736 = vmatprep.subr.bf16.mxu1 %v1939_v29 }
 0x12b   : > { %3696 = vmatpush1.bf16.msra.mxu0 %v1930_v25 }
 0x12c   : > { %3775 = vmatprep.subr.bf16.mxu0 %v5226_v28 }
 0x12d   : > { %3737 = vmatpush1.bf16.msra.mxu1 %v1936_v32 }
 0x12e   : > { %4826 = vmatmul.mubr.msk.bf16.vlgmr.msra.gmra.mrb[84].mxu0 %vm1669_vm2, %v6026_v17  ;;  %3816 = vmatprep.subr.bf16.mxu1 %v5235_v35 }
 0x12f   : > { %3776 = vmatpush1.bf16.msra.mxu0 %v5224_v31  ;;  %3807 = vmatprep.mubr.bf16.mxu0 %v5282_v5 }
 0x130   : > { %3777 = vmatprep.subr.bf16.mxu0 %v1945_v34  ;;  %4827 = vmatmul.mubr.msk.bf16.vlgmr.msra.gmra.mrb[84].mxu1 %vm1669_vm2, %v6026_v17 }
 0x131   : > { %3817 = vmatpush1.bf16.msra.mxu1 %v5233_v38  ;;  %3848 = vmatprep.mubr.bf16.mxu1 %v5282_v5 }
 0x132   : > { %3818 = vmatprep.subr.bf16.mxu1 %v1951_v41 }
 0x133   : > { %3778 = vmatpush1.bf16.msra.mxu0 %v1942_v37 }
 0x134   : > { %3857 = vmatprep.subr.bf16.mxu0 %v5238_v40 }
 0x135   : > { %3819 = vmatpush1.bf16.msra.mxu1 %v1948_v44 }
 0x136   : > { %4828 = vmatmul.mubr.msk.bf16.vlgmr.msra.gmra.mrb[88].mxu0 %vm1669_vm2, %v6026_v17  ;;  %3898 = vmatprep.subr.bf16.mxu1 %v5247_v47 }
 0x137   : > { %3858 = vmatpush1.bf16.msra.mxu0 %v5236_v43  ;;  %3889 = vmatprep.mubr.bf16.mxu0 %v5282_v5 }
 0x138   : > { %3859 = vmatprep.subr.bf16.mxu0 %v1957_v46  ;;  %4829 = vmatmul.mubr.msk.bf16.vlgmr.msra.gmra.mrb[88].mxu1 %vm1669_vm2, %v6026_v17 }
 0x139   : > { %3899 = vmatpush1.bf16.msra.mxu1 %v5245_v50  ;;  %3930 = vmatprep.mubr.bf16.mxu1 %v5282_v5 }
 0x13a   : > { %3900 = vmatprep.subr.bf16.mxu1 %v1963_v53 }
 0x13b   : > { %3860 = vmatpush1.bf16.msra.mxu0 %v1954_v49 }
 0x13c   : > { %3939 = vmatprep.subr.bf16.mxu0 %v5250_v52 }
 0x13d   : > { %3901 = vmatpush1.bf16.msra.mxu1 %v1960_v56 }
 0x13e   : > { %4830 = vmatmul.mubr.msk.bf16.vlgmr.msra.gmra.mrb[92].mxu0 %vm1669_vm2, %v6026_v17 }
 0x13f   : > { %3940 = vmatpush1.bf16.msra.mxu0 %v5248_v55  ;;  %3971 = vmatprep.mubr.bf16.mxu0 %v5282_v5 }
 0x140   : > { %3941 = vmatprep.subr.bf16.mxu0 %v1969_v58  ;;  %4831 = vmatmul.mubr.msk.bf16.vlgmr.msra.gmra.mrb[92].mxu1 %vm1669_vm2, %v6026_v17 }
 0x143   : > { %3942 = vmatpush1.bf16.msra.mxu0 %v1966_v59 }
 0x146   : > { %4832 = vmatmul.mubr.msk.bf16.vlgmr.msra.gmra.mrb[96].mxu0 %vm1669_vm2, %v6026_v17 }
 0x159   : > { %v2005_v61 = vpop.f32.mrb[0].mxu0 }
 0x15a   : > { %v2006_v62 = vadd.f32 %v2005_v61, %v6198_v60  ;;  %v2007_v10 = vpop.f32.mrb[1].mxu0 }
 0x15b   : > { %v2008_v5 = vadd.f32 %v2007_v10, %v6198_v60  ;;  %v2009_v63 = vpop.f32.mrb[2].mxu0  ;;  %v2046_v3 = vpop.f32.mrb[0].mxu1 }
 0x15c   : > { %v3980_v0 = vmax.f32 %v2006_v62, 0.0  ;;  %v2010_v1 = vpop.f32.mrb[3].mxu0  ;;  %v2047_v17 = vadd.f32 %v2046_v3, %v6198_v60  ;;  %v2048_v4 = vpop.f32.mrb[1].mxu1 }
 0x15d   : > { %v3981_v2 = vmax.f32 %v2008_v5, 0.0  ;;  %v2049_v7 = vadd.f32 %v2048_v4, %v6198_v60  ;;  %v2050_v8 = vpop.f32.mrb[2].mxu1 }
 0x15e   : > { %v3982_v9 = vmax.f32 %v2047_v17, 0.0  ;;  %v2051_v11 = vpop.f32.mrb[3].mxu1 }
 0x15f   : > { %v4885_v6 = vpack.c.bf16 %v3981_v2, %v3980_v0  ;;  %v3983_v12 = vmax.f32 %v2049_v7, 0.0 }
 0x161   : > { %4470 = vst [vmem:[%s6205_s14] sm:$0xff] %v4885_v6  ;;  %v2087_v13 = vpop.f32.mrb[4].mxu0  ;;  %v4886_v16 = vpack.c.bf16 %v3983_v12, %v3982_v9 }
 0x162   : > { %v2088_v14 = vadd.f32 %v2087_v13, %v6198_v60  ;;  %v2089_v15 = vpop.f32.mrb[5].mxu0 }
 0x163   : > { %v2090_v18 = vadd.f32 %v2089_v15, %v6198_v60  ;;  %v2091_v19 = vpop.f32.mrb[6].mxu0  ;;  %4471 = vst [vmem:[%s6205_s14 + $0x8] sm:$0xff] %v4886_v16  ;;  %v2128_v23 = vpop.f32.mrb[4].mxu1 }
 0x164   : > { %v3984_v20 = vmax.f32 %v2088_v14, 0.0  ;;  %v2092_v21 = vpop.f32.mrb[7].mxu0  ;;  %v2129_v24 = vadd.f32 %v2128_v23, %v6198_v60  ;;  %v2130_v25 = vpop.f32.mrb[5].mxu1 }
 0x165   : > { %v3985_v22 = vmax.f32 %v2090_v18, 0.0  ;;  %v2131_v27 = vadd.f32 %v2130_v25, %v6198_v60  ;;  %v2132_v28 = vpop.f32.mrb[6].mxu1 }
 0x166   : > { %v3986_v29 = vmax.f32 %v2129_v24, 0.0  ;;  %v2133_v30 = vpop.f32.mrb[7].mxu1 }
 0x167   : > { %v4887_v26 = vpack.c.bf16 %v3985_v22, %v3984_v20  ;;  %v3987_v31 = vmax.f32 %v2131_v27, 0.0 }
 0x169   : > { %4472 = vst [vmem:[%s6205_s14 + $0x10] sm:$0xff] %v4887_v26  ;;  %v2169_v32 = vpop.f32.mrb[8].mxu0  ;;  %v4888_v35 = vpack.c.bf16 %v3987_v31, %v3986_v29 }
 0x16a   : > { %v2170_v33 = vadd.f32 %v2169_v32, %v6198_v60  ;;  %v2171_v34 = vpop.f32.mrb[9].mxu0 }
 0x16b   : > { %v2172_v36 = vadd.f32 %v2171_v34, %v6198_v60  ;;  %v2173_v37 = vpop.f32.mrb[10].mxu0  ;;  %4473 = vst [vmem:[%s6205_s14 + $0x18] sm:$0xff] %v4888_v35  ;;  %v2210_v41 = vpop.f32.mrb[8].mxu1 }
 0x16c   : > { %v3988_v38 = vmax.f32 %v2170_v33, 0.0  ;;  %v2174_v39 = vpop.f32.mrb[11].mxu0  ;;  %v2211_v42 = vadd.f32 %v2210_v41, %v6198_v60  ;;  %v2212_v43 = vpop.f32.mrb[9].mxu1 }
 0x16d   : > { %v3989_v40 = vmax.f32 %v2172_v36, 0.0  ;;  %v2213_v45 = vadd.f32 %v2212_v43, %v6198_v60  ;;  %v2214_v46 = vpop.f32.mrb[10].mxu1 }
 0x16e   : > { %v3990_v47 = vmax.f32 %v2211_v42, 0.0  ;;  %v2215_v48 = vpop.f32.mrb[11].mxu1 }
 0x16f   : > { %v4889_v44 = vpack.c.bf16 %v3989_v40, %v3988_v38  ;;  %v3991_v49 = vmax.f32 %v2213_v45, 0.0 }
 0x171   : > { %4474 = vst [vmem:[%s6205_s14 + $0x20] sm:$0xff] %v4889_v44  ;;  %v2251_v50 = vpop.f32.mrb[12].mxu0  ;;  %v4890_v53 = vpack.c.bf16 %v3991_v49, %v3990_v47 }
 0x172   : > { %v2252_v51 = vadd.f32 %v2251_v50, %v6198_v60  ;;  %v2253_v52 = vpop.f32.mrb[13].mxu0 }
 0x173   : > { %v2254_v54 = vadd.f32 %v2253_v52, %v6198_v60  ;;  %v2255_v55 = vpop.f32.mrb[14].mxu0  ;;  %4475 = vst [vmem:[%s6205_s14 + $0x28] sm:$0xff] %v4890_v53  ;;  %v2292_v59 = vpop.f32.mrb[12].mxu1 }
 0x174   : > { %v3992_v56 = vmax.f32 %v2252_v51, 0.0  ;;  %v2256_v57 = vpop.f32.mrb[15].mxu0  ;;  %v2293_v61 = vadd.f32 %v2292_v59, %v6198_v60  ;;  %v2294_v62 = vpop.f32.mrb[13].mxu1 }
 0x175   : > { %v3993_v58 = vmax.f32 %v2254_v54, 0.0  ;;  %v2295_v5 = vadd.f32 %v2294_v62, %v6198_v60  ;;  %v2296_v63 = vpop.f32.mrb[14].mxu1 }
 0x176   : > { %v3994_v0 = vmax.f32 %v2293_v61, 0.0  ;;  %v2297_v1 = vpop.f32.mrb[15].mxu1 }
 0x177   : > { %v4891_v10 = vpack.c.bf16 %v3993_v58, %v3992_v56  ;;  %v3995_v2 = vmax.f32 %v2295_v5, 0.0 }
 0x179   : > { %4476 = vst [vmem:[%s6205_s14 + $0x30] sm:$0xff] %v4891_v10  ;;  %v2333_v3 = vpop.f32.mrb[16].mxu0  ;;  %v4892_v6 = vpack.c.bf16 %v3995_v2, %v3994_v0 }
 0x17a   : > { %v2334_v17 = vadd.f32 %v2333_v3, %v6198_v60  ;;  %v2335_v4 = vpop.f32.mrb[17].mxu0 }
 0x17b   : > { %v2336_v7 = vadd.f32 %v2335_v4, %v6198_v60  ;;  %v2337_v8 = vpop.f32.mrb[18].mxu0  ;;  %4477 = vst [vmem:[%s6205_s14 + $0x38] sm:$0xff] %v4892_v6  ;;  %v2374_v13 = vpop.f32.mrb[16].mxu1 }
 0x17c   : > { %v3996_v9 = vmax.f32 %v2334_v17, 0.0  ;;  %v2338_v11 = vpop.f32.mrb[19].mxu0  ;;  %v2375_v14 = vadd.f32 %v2374_v13, %v6198_v60  ;;  %v2376_v15 = vpop.f32.mrb[17].mxu1 }
 0x17d   : > { %v3997_v12 = vmax.f32 %v2336_v7, 0.0  ;;  %v2377_v18 = vadd.f32 %v2376_v15, %v6198_v60  ;;  %v2378_v19 = vpop.f32.mrb[18].mxu1 }
 0x17e   : > { %v3998_v20 = vmax.f32 %v2375_v14, 0.0  ;;  %v2379_v21 = vpop.f32.mrb[19].mxu1 }
 0x17f   : > { %v4893_v16 = vpack.c.bf16 %v3997_v12, %v3996_v9  ;;  %v3999_v22 = vmax.f32 %v2377_v18, 0.0 }
 0x181   : > { %4478 = vst [vmem:[%s6205_s14 + $0x40] sm:$0xff] %v4893_v16  ;;  %v2415_v23 = vpop.f32.mrb[20].mxu0  ;;  %v4894_v26 = vpack.c.bf16 %v3999_v22, %v3998_v20 }
 0x182   : > { %v2416_v24 = vadd.f32 %v2415_v23, %v6198_v60  ;;  %v2417_v25 = vpop.f32.mrb[21].mxu0 }
 0x183   : > { %v2418_v27 = vadd.f32 %v2417_v25, %v6198_v60  ;;  %v2419_v28 = vpop.f32.mrb[22].mxu0  ;;  %4479 = vst [vmem:[%s6205_s14 + $0x48] sm:$0xff] %v4894_v26  ;;  %v2456_v32 = vpop.f32.mrb[20].mxu1 }
 0x184   : > { %v4000_v29 = vmax.f32 %v2416_v24, 0.0  ;;  %v2420_v30 = vpop.f32.mrb[23].mxu0  ;;  %v2457_v33 = vadd.f32 %v2456_v32, %v6198_v60  ;;  %v2458_v34 = vpop.f32.mrb[21].mxu1 }
 0x185   : > { %v4001_v31 = vmax.f32 %v2418_v27, 0.0  ;;  %v2459_v36 = vadd.f32 %v2458_v34, %v6198_v60  ;;  %v2460_v37 = vpop.f32.mrb[22].mxu1 }
 0x186   : > { %v4002_v38 = vmax.f32 %v2457_v33, 0.0  ;;  %v2461_v39 = vpop.f32.mrb[23].mxu1 }
 0x187   : > { %v4895_v35 = vpack.c.bf16 %v4001_v31, %v4000_v29  ;;  %v4003_v40 = vmax.f32 %v2459_v36, 0.0 }
 0x189   : > { %4480 = vst [vmem:[%s6205_s14 + $0x50] sm:$0xff] %v4895_v35  ;;  %v2497_v41 = vpop.f32.mrb[24].mxu0  ;;  %v4896_v44 = vpack.c.bf16 %v4003_v40, %v4002_v38 }
 0x18a   : > { %v2498_v42 = vadd.f32 %v2497_v41, %v6198_v60  ;;  %v2499_v43 = vpop.f32.mrb[25].mxu0 }
 0x18b   : > { %v2500_v45 = vadd.f32 %v2499_v43, %v6198_v60  ;;  %v2501_v46 = vpop.f32.mrb[26].mxu0  ;;  %4481 = vst [vmem:[%s6205_s14 + $0x58] sm:$0xff] %v4896_v44  ;;  %v2538_v50 = vpop.f32.mrb[24].mxu1 }
 0x18c   : > { %v4004_v47 = vmax.f32 %v2498_v42, 0.0  ;;  %v2502_v48 = vpop.f32.mrb[27].mxu0  ;;  %v2539_v51 = vadd.f32 %v2538_v50, %v6198_v60  ;;  %v2540_v52 = vpop.f32.mrb[25].mxu1 }
 0x18d   : > { %v4005_v49 = vmax.f32 %v2500_v45, 0.0  ;;  %v2541_v54 = vadd.f32 %v2540_v52, %v6198_v60  ;;  %v2542_v55 = vpop.f32.mrb[26].mxu1 }
 0x18e   : > { %v4006_v56 = vmax.f32 %v2539_v51, 0.0  ;;  %v2543_v57 = vpop.f32.mrb[27].mxu1 }
 0x18f   : > { %v4897_v53 = vpack.c.bf16 %v4005_v49, %v4004_v47  ;;  %v4007_v58 = vmax.f32 %v2541_v54, 0.0 }
 0x191   : > { %4482 = vst [vmem:[%s6205_s14 + $0x60] sm:$0xff] %v4897_v53  ;;  %v2579_v59 = vpop.f32.mrb[28].mxu0  ;;  %v4898_v10 = vpack.c.bf16 %v4007_v58, %v4006_v56 }
 0x192   : > { %v2580_v61 = vadd.f32 %v2579_v59, %v6198_v60  ;;  %v2581_v62 = vpop.f32.mrb[29].mxu0 }
 0x193   : > { %v2582_v5 = vadd.f32 %v2581_v62, %v6198_v60  ;;  %v2583_v63 = vpop.f32.mrb[30].mxu0  ;;  %4483 = vst [vmem:[%s6205_s14 + $0x68] sm:$0xff] %v4898_v10  ;;  %v2620_v3 = vpop.f32.mrb[28].mxu1 }
 0x194   : > { %v4008_v0 = vmax.f32 %v2580_v61, 0.0  ;;  %v2584_v1 = vpop.f32.mrb[31].mxu0  ;;  %v2621_v17 = vadd.f32 %v2620_v3, %v6198_v60  ;;  %v2622_v4 = vpop.f32.mrb[29].mxu1 }
 0x195   : > { %v4009_v2 = vmax.f32 %v2582_v5, 0.0  ;;  %v2623_v7 = vadd.f32 %v2622_v4, %v6198_v60  ;;  %v2624_v8 = vpop.f32.mrb[30].mxu1 }
 0x196   : > { %v4010_v9 = vmax.f32 %v2621_v17, 0.0  ;;  %v2625_v11 = vpop.f32.mrb[31].mxu1 }
 0x197   : > { %v4899_v6 = vpack.c.bf16 %v4009_v2, %v4008_v0  ;;  %v4011_v12 = vmax.f32 %v2623_v7, 0.0 }
 0x199   : > { %4484 = vst [vmem:[%s6205_s14 + $0x70] sm:$0xff] %v4899_v6  ;;  %v2661_v13 = vpop.f32.mrb[32].mxu0  ;;  %v4900_v16 = vpack.c.bf16 %v4011_v12, %v4010_v9 }
 0x19a   : > { %v2662_v14 = vadd.f32 %v2661_v13, %v6198_v60  ;;  %v2663_v15 = vpop.f32.mrb[33].mxu0 }
 0x19b   : > { %v2664_v18 = vadd.f32 %v2663_v15, %v6198_v60  ;;  %v2665_v19 = vpop.f32.mrb[34].mxu0  ;;  %4485 = vst [vmem:[%s6205_s14 + $0x78] sm:$0xff] %v4900_v16  ;;  %v2702_v23 = vpop.f32.mrb[32].mxu1 }
 0x19c   : > { %v4012_v20 = vmax.f32 %v2662_v14, 0.0  ;;  %v2666_v21 = vpop.f32.mrb[35].mxu0  ;;  %v2703_v24 = vadd.f32 %v2702_v23, %v6198_v60  ;;  %v2704_v25 = vpop.f32.mrb[33].mxu1 }
 0x19d   : > { %v4013_v22 = vmax.f32 %v2664_v18, 0.0  ;;  %v2705_v27 = vadd.f32 %v2704_v25, %v6198_v60  ;;  %v2706_v28 = vpop.f32.mrb[34].mxu1 }
 0x19e   : > { %v4014_v29 = vmax.f32 %v2703_v24, 0.0  ;;  %v2707_v30 = vpop.f32.mrb[35].mxu1 }
 0x19f   : > { %v4901_v26 = vpack.c.bf16 %v4013_v22, %v4012_v20  ;;  %v4015_v31 = vmax.f32 %v2705_v27, 0.0 }
 0x1a1   : > { %4486 = vst [vmem:[%s6205_s14 + $0x80] sm:$0xff] %v4901_v26  ;;  %v2743_v32 = vpop.f32.mrb[36].mxu0  ;;  %v4902_v35 = vpack.c.bf16 %v4015_v31, %v4014_v29 }
 0x1a2   : > { %v2744_v33 = vadd.f32 %v2743_v32, %v6198_v60  ;;  %v2745_v34 = vpop.f32.mrb[37].mxu0 }
 0x1a3   : > { %v2746_v36 = vadd.f32 %v2745_v34, %v6198_v60  ;;  %v2747_v37 = vpop.f32.mrb[38].mxu0  ;;  %4487 = vst [vmem:[%s6205_s14 + $0x88] sm:$0xff] %v4902_v35  ;;  %v2784_v41 = vpop.f32.mrb[36].mxu1 }
 0x1a4   : > { %v4016_v38 = vmax.f32 %v2744_v33, 0.0  ;;  %v2748_v39 = vpop.f32.mrb[39].mxu0  ;;  %v2785_v42 = vadd.f32 %v2784_v41, %v6198_v60  ;;  %v2786_v43 = vpop.f32.mrb[37].mxu1 }
 0x1a5   : > { %v4017_v40 = vmax.f32 %v2746_v36, 0.0  ;;  %v2787_v45 = vadd.f32 %v2786_v43, %v6198_v60  ;;  %v2788_v46 = vpop.f32.mrb[38].mxu1 }
 0x1a6   : > { %v4018_v47 = vmax.f32 %v2785_v42, 0.0  ;;  %v2789_v48 = vpop.f32.mrb[39].mxu1 }
 0x1a7   : > { %v4903_v44 = vpack.c.bf16 %v4017_v40, %v4016_v38  ;;  %v4019_v49 = vmax.f32 %v2787_v45, 0.0 }
 0x1a9   : > { %4488 = vst [vmem:[%s6205_s14 + $0x90] sm:$0xff] %v4903_v44  ;;  %v2825_v50 = vpop.f32.mrb[40].mxu0  ;;  %v4904_v53 = vpack.c.bf16 %v4019_v49, %v4018_v47 }
 0x1aa   : > { %v2826_v51 = vadd.f32 %v2825_v50, %v6198_v60  ;;  %v2827_v52 = vpop.f32.mrb[41].mxu0 }
 0x1ab   : > { %v2828_v54 = vadd.f32 %v2827_v52, %v6198_v60  ;;  %v2829_v55 = vpop.f32.mrb[42].mxu0  ;;  %4489 = vst [vmem:[%s6205_s14 + $0x98] sm:$0xff] %v4904_v53  ;;  %v2866_v59 = vpop.f32.mrb[40].mxu1 }
 0x1ac   : > { %v4020_v56 = vmax.f32 %v2826_v51, 0.0  ;;  %v2830_v57 = vpop.f32.mrb[43].mxu0  ;;  %v2867_v61 = vadd.f32 %v2866_v59, %v6198_v60  ;;  %v2868_v62 = vpop.f32.mrb[41].mxu1 }
 0x1ad   : > { %v4021_v58 = vmax.f32 %v2828_v54, 0.0  ;;  %v2869_v5 = vadd.f32 %v2868_v62, %v6198_v60  ;;  %v2870_v63 = vpop.f32.mrb[42].mxu1 }
 0x1ae   : > { %v4022_v0 = vmax.f32 %v2867_v61, 0.0  ;;  %v2871_v1 = vpop.f32.mrb[43].mxu1 }
 0x1af   : > { %v4905_v10 = vpack.c.bf16 %v4021_v58, %v4020_v56  ;;  %v4023_v2 = vmax.f32 %v2869_v5, 0.0 }
 0x1b1   : > { %4490 = vst [vmem:[%s6205_s14 + $0xa0] sm:$0xff] %v4905_v10  ;;  %v2907_v3 = vpop.f32.mrb[44].mxu0  ;;  %v4906_v6 = vpack.c.bf16 %v4023_v2, %v4022_v0 }
 0x1b2   : > { %v2908_v17 = vadd.f32 %v2907_v3, %v6198_v60  ;;  %v2909_v4 = vpop.f32.mrb[45].mxu0 }
 0x1b3   : > { %v2910_v7 = vadd.f32 %v2909_v4, %v6198_v60  ;;  %v2911_v8 = vpop.f32.mrb[46].mxu0  ;;  %4491 = vst [vmem:[%s6205_s14 + $0xa8] sm:$0xff] %v4906_v6  ;;  %v2948_v13 = vpop.f32.mrb[44].mxu1 }
 0x1b4   : > { %v4024_v9 = vmax.f32 %v2908_v17, 0.0  ;;  %v2912_v11 = vpop.f32.mrb[47].mxu0  ;;  %v2949_v14 = vadd.f32 %v2948_v13, %v6198_v60  ;;  %v2950_v15 = vpop.f32.mrb[45].mxu1 }
 0x1b5   : > { %v4025_v12 = vmax.f32 %v2910_v7, 0.0  ;;  %v2951_v18 = vadd.f32 %v2950_v15, %v6198_v60  ;;  %v2952_v19 = vpop.f32.mrb[46].mxu1 }
 0x1b6   : > { %v4026_v20 = vmax.f32 %v2949_v14, 0.0  ;;  %v2953_v21 = vpop.f32.mrb[47].mxu1 }
 0x1b7   : > { %v4907_v16 = vpack.c.bf16 %v4025_v12, %v4024_v9  ;;  %v4027_v22 = vmax.f32 %v2951_v18, 0.0 }
 0x1b9   : > { %4492 = vst [vmem:[%s6205_s14 + $0xb0] sm:$0xff] %v4907_v16  ;;  %v2989_v23 = vpop.f32.mrb[48].mxu0  ;;  %v4908_v26 = vpack.c.bf16 %v4027_v22, %v4026_v20 }
 0x1ba   : > { %v2990_v24 = vadd.f32 %v2989_v23, %v6198_v60  ;;  %v2991_v25 = vpop.f32.mrb[49].mxu0 }
 0x1bb   : > { %v2992_v27 = vadd.f32 %v2991_v25, %v6198_v60  ;;  %v2993_v28 = vpop.f32.mrb[50].mxu0  ;;  %4493 = vst [vmem:[%s6205_s14 + $0xb8] sm:$0xff] %v4908_v26  ;;  %v3030_v32 = vpop.f32.mrb[48].mxu1 }
 0x1bc   : > { %v4028_v29 = vmax.f32 %v2990_v24, 0.0  ;;  %v2994_v30 = vpop.f32.mrb[51].mxu0  ;;  %v3031_v33 = vadd.f32 %v3030_v32, %v6198_v60  ;;  %v3032_v34 = vpop.f32.mrb[49].mxu1 }
 0x1bd   : > { %v4029_v31 = vmax.f32 %v2992_v27, 0.0  ;;  %v3033_v36 = vadd.f32 %v3032_v34, %v6198_v60  ;;  %v3034_v37 = vpop.f32.mrb[50].mxu1 }
 0x1be   : > { %v4030_v38 = vmax.f32 %v3031_v33, 0.0  ;;  %v3035_v39 = vpop.f32.mrb[51].mxu1 }
 0x1bf   : > { %v4909_v35 = vpack.c.bf16 %v4029_v31, %v4028_v29  ;;  %v4031_v40 = vmax.f32 %v3033_v36, 0.0 }
 0x1c1   : > { %4494 = vst [vmem:[%s6205_s14 + $0xc0] sm:$0xff] %v4909_v35  ;;  %v3071_v41 = vpop.f32.mrb[52].mxu0  ;;  %v4910_v44 = vpack.c.bf16 %v4031_v40, %v4030_v38 }
 0x1c2   : > { %v3072_v42 = vadd.f32 %v3071_v41, %v6198_v60  ;;  %v3073_v43 = vpop.f32.mrb[53].mxu0 }
 0x1c3   : > { %v3074_v45 = vadd.f32 %v3073_v43, %v6198_v60  ;;  %v3075_v46 = vpop.f32.mrb[54].mxu0  ;;  %4495 = vst [vmem:[%s6205_s14 + $0xc8] sm:$0xff] %v4910_v44  ;;  %v3112_v50 = vpop.f32.mrb[52].mxu1 }
 0x1c4   : > { %v4032_v47 = vmax.f32 %v3072_v42, 0.0  ;;  %v3076_v48 = vpop.f32.mrb[55].mxu0  ;;  %v3113_v51 = vadd.f32 %v3112_v50, %v6198_v60  ;;  %v3114_v52 = vpop.f32.mrb[53].mxu1 }
 0x1c5   : > { %v4033_v49 = vmax.f32 %v3074_v45, 0.0  ;;  %v3115_v54 = vadd.f32 %v3114_v52, %v6198_v60  ;;  %v3116_v55 = vpop.f32.mrb[54].mxu1 }
 0x1c6   : > { %v4034_v56 = vmax.f32 %v3113_v51, 0.0  ;;  %v3117_v57 = vpop.f32.mrb[55].mxu1 }
 0x1c7   : > { %v4911_v53 = vpack.c.bf16 %v4033_v49, %v4032_v47  ;;  %v4035_v58 = vmax.f32 %v3115_v54, 0.0 }
 0x1c9   : > { %4496 = vst [vmem:[%s6205_s14 + $0xd0] sm:$0xff] %v4911_v53  ;;  %v3153_v59 = vpop.f32.mrb[56].mxu0  ;;  %v4912_v10 = vpack.c.bf16 %v4035_v58, %v4034_v56 }
 0x1ca   : > { %v3154_v61 = vadd.f32 %v3153_v59, %v6198_v60  ;;  %v3155_v62 = vpop.f32.mrb[57].mxu0 }
 0x1cb   : > { %v3156_v5 = vadd.f32 %v3155_v62, %v6198_v60  ;;  %v3157_v63 = vpop.f32.mrb[58].mxu0  ;;  %4497 = vst [vmem:[%s6205_s14 + $0xd8] sm:$0xff] %v4912_v10  ;;  %v3194_v3 = vpop.f32.mrb[56].mxu1 }
 0x1cc   : > { %v4036_v0 = vmax.f32 %v3154_v61, 0.0  ;;  %v3158_v1 = vpop.f32.mrb[59].mxu0  ;;  %v3195_v17 = vadd.f32 %v3194_v3, %v6198_v60  ;;  %v3196_v4 = vpop.f32.mrb[57].mxu1 }
 0x1cd   : > { %v4037_v2 = vmax.f32 %v3156_v5, 0.0  ;;  %v3197_v7 = vadd.f32 %v3196_v4, %v6198_v60  ;;  %v3198_v8 = vpop.f32.mrb[58].mxu1 }
 0x1ce   : > { %v4038_v9 = vmax.f32 %v3195_v17, 0.0  ;;  %v3199_v11 = vpop.f32.mrb[59].mxu1 }
 0x1cf   : > { %v4913_v6 = vpack.c.bf16 %v4037_v2, %v4036_v0  ;;  %v4039_v12 = vmax.f32 %v3197_v7, 0.0 }
 0x1d1   : > { %4498 = vst [vmem:[%s6205_s14 + $0xe0] sm:$0xff] %v4913_v6  ;;  %v3235_v13 = vpop.f32.mrb[60].mxu0  ;;  %v4914_v16 = vpack.c.bf16 %v4039_v12, %v4038_v9 }
 0x1d2   : > { %v3236_v14 = vadd.f32 %v3235_v13, %v6198_v60  ;;  %v3237_v15 = vpop.f32.mrb[61].mxu0 }
 0x1d3   : > { %v3238_v18 = vadd.f32 %v3237_v15, %v6198_v60  ;;  %v3239_v19 = vpop.f32.mrb[62].mxu0  ;;  %4499 = vst [vmem:[%s6205_s14 + $0xe8] sm:$0xff] %v4914_v16  ;;  %v3276_v23 = vpop.f32.mrb[60].mxu1 }
 0x1d4   : > { %v4040_v20 = vmax.f32 %v3236_v14, 0.0  ;;  %v3240_v21 = vpop.f32.mrb[63].mxu0  ;;  %v3277_v24 = vadd.f32 %v3276_v23, %v6198_v60  ;;  %v3278_v25 = vpop.f32.mrb[61].mxu1 }
 0x1d5   : > { %v4041_v22 = vmax.f32 %v3238_v18, 0.0  ;;  %v3279_v27 = vadd.f32 %v3278_v25, %v6198_v60  ;;  %v3280_v28 = vpop.f32.mrb[62].mxu1 }
 0x1d6   : > { %v4042_v29 = vmax.f32 %v3277_v24, 0.0  ;;  %v3281_v30 = vpop.f32.mrb[63].mxu1 }
 0x1d7   : > { %v4915_v26 = vpack.c.bf16 %v4041_v22, %v4040_v20  ;;  %v4043_v31 = vmax.f32 %v3279_v27, 0.0 }
 0x1d9   : > { %4500 = vst [vmem:[%s6205_s14 + $0xf0] sm:$0xff] %v4915_v26  ;;  %v3317_v32 = vpop.f32.mrb[64].mxu0  ;;  %v4916_v35 = vpack.c.bf16 %v4043_v31, %v4042_v29 }
 0x1da   : > { %v3318_v33 = vadd.f32 %v3317_v32, %v6198_v60  ;;  %v3319_v34 = vpop.f32.mrb[65].mxu0 }
 0x1db   : > { %v3320_v36 = vadd.f32 %v3319_v34, %v6198_v60  ;;  %v3321_v37 = vpop.f32.mrb[66].mxu0  ;;  %4501 = vst [vmem:[%s6205_s14 + $0xf8] sm:$0xff] %v4916_v35  ;;  %v3358_v41 = vpop.f32.mrb[64].mxu1 }
 0x1dc   : > { %v4044_v38 = vmax.f32 %v3318_v33, 0.0  ;;  %v3322_v39 = vpop.f32.mrb[67].mxu0  ;;  %v3359_v42 = vadd.f32 %v3358_v41, %v6198_v60  ;;  %v3360_v43 = vpop.f32.mrb[65].mxu1 }
 0x1dd   : > { %v4045_v40 = vmax.f32 %v3320_v36, 0.0  ;;  %v3361_v45 = vadd.f32 %v3360_v43, %v6198_v60  ;;  %v3362_v46 = vpop.f32.mrb[66].mxu1 }
 0x1de   : > { %v4046_v47 = vmax.f32 %v3359_v42, 0.0  ;;  %v3363_v48 = vpop.f32.mrb[67].mxu1 }
 0x1df   : > { %v4917_v44 = vpack.c.bf16 %v4045_v40, %v4044_v38  ;;  %v4047_v49 = vmax.f32 %v3361_v45, 0.0 }
 0x1e1   : > { %4502 = vst [vmem:[%s6205_s14 + $0x100] sm:$0xff] %v4917_v44  ;;  %v3399_v50 = vpop.f32.mrb[68].mxu0  ;;  %v4918_v53 = vpack.c.bf16 %v4047_v49, %v4046_v47 }
 0x1e2   : > { %v3400_v51 = vadd.f32 %v3399_v50, %v6198_v60  ;;  %v3401_v52 = vpop.f32.mrb[69].mxu0 }
 0x1e3   : > { %v3402_v54 = vadd.f32 %v3401_v52, %v6198_v60  ;;  %v3403_v55 = vpop.f32.mrb[70].mxu0  ;;  %4503 = vst [vmem:[%s6205_s14 + $0x108] sm:$0xff] %v4918_v53  ;;  %v3440_v59 = vpop.f32.mrb[68].mxu1 }
 0x1e4   : > { %v4048_v56 = vmax.f32 %v3400_v51, 0.0  ;;  %v3404_v57 = vpop.f32.mrb[71].mxu0  ;;  %v3441_v61 = vadd.f32 %v3440_v59, %v6198_v60  ;;  %v3442_v62 = vpop.f32.mrb[69].mxu1 }
 0x1e5   : > { %v4049_v58 = vmax.f32 %v3402_v54, 0.0  ;;  %v3443_v5 = vadd.f32 %v3442_v62, %v6198_v60  ;;  %v3444_v63 = vpop.f32.mrb[70].mxu1 }
 0x1e6   : > { %v4050_v0 = vmax.f32 %v3441_v61, 0.0  ;;  %v3445_v1 = vpop.f32.mrb[71].mxu1 }
 0x1e7   : > { %v4919_v10 = vpack.c.bf16 %v4049_v58, %v4048_v56  ;;  %v4051_v2 = vmax.f32 %v3443_v5, 0.0 }
 0x1e9   : > { %4504 = vst [vmem:[%s6205_s14 + $0x110] sm:$0xff] %v4919_v10  ;;  %v3481_v3 = vpop.f32.mrb[72].mxu0  ;;  %v4920_v6 = vpack.c.bf16 %v4051_v2, %v4050_v0 }
 0x1ea   : > { %v3482_v17 = vadd.f32 %v3481_v3, %v6198_v60  ;;  %v3483_v4 = vpop.f32.mrb[73].mxu0 }
 0x1eb   : > { %v3484_v7 = vadd.f32 %v3483_v4, %v6198_v60  ;;  %v3485_v8 = vpop.f32.mrb[74].mxu0  ;;  %4505 = vst [vmem:[%s6205_s14 + $0x118] sm:$0xff] %v4920_v6  ;;  %v3522_v13 = vpop.f32.mrb[72].mxu1 }
 0x1ec   : > { %v4052_v9 = vmax.f32 %v3482_v17, 0.0  ;;  %v3486_v11 = vpop.f32.mrb[75].mxu0  ;;  %v3523_v14 = vadd.f32 %v3522_v13, %v6198_v60  ;;  %v3524_v15 = vpop.f32.mrb[73].mxu1 }
 0x1ed   : > { %v4053_v12 = vmax.f32 %v3484_v7, 0.0  ;;  %v3525_v18 = vadd.f32 %v3524_v15, %v6198_v60  ;;  %v3526_v19 = vpop.f32.mrb[74].mxu1 }
 0x1ee   : > { %v4054_v20 = vmax.f32 %v3523_v14, 0.0  ;;  %v3527_v21 = vpop.f32.mrb[75].mxu1 }
 0x1ef   : > { %v4921_v16 = vpack.c.bf16 %v4053_v12, %v4052_v9  ;;  %v4055_v22 = vmax.f32 %v3525_v18, 0.0 }
 0x1f1   : > { %4506 = vst [vmem:[%s6205_s14 + $0x120] sm:$0xff] %v4921_v16  ;;  %v3563_v23 = vpop.f32.mrb[76].mxu0  ;;  %v4922_v26 = vpack.c.bf16 %v4055_v22, %v4054_v20 }
 0x1f2   : > { %v3564_v24 = vadd.f32 %v3563_v23, %v6198_v60  ;;  %v3565_v25 = vpop.f32.mrb[77].mxu0 }
 0x1f3   : > { %v3566_v27 = vadd.f32 %v3565_v25, %v6198_v60  ;;  %v3567_v28 = vpop.f32.mrb[78].mxu0  ;;  %4507 = vst [vmem:[%s6205_s14 + $0x128] sm:$0xff] %v4922_v26  ;;  %v3604_v32 = vpop.f32.mrb[76].mxu1 }
 0x1f4   : > { %v4056_v29 = vmax.f32 %v3564_v24, 0.0  ;;  %v3568_v30 = vpop.f32.mrb[79].mxu0  ;;  %v3605_v33 = vadd.f32 %v3604_v32, %v6198_v60  ;;  %v3606_v34 = vpop.f32.mrb[77].mxu1 }
 0x1f5   : > { %v4057_v31 = vmax.f32 %v3566_v27, 0.0  ;;  %v3607_v36 = vadd.f32 %v3606_v34, %v6198_v60  ;;  %v3608_v37 = vpop.f32.mrb[78].mxu1 }
 0x1f6   : > { %v4058_v38 = vmax.f32 %v3605_v33, 0.0  ;;  %v3609_v39 = vpop.f32.mrb[79].mxu1 }
 0x1f7   : > { %v4923_v35 = vpack.c.bf16 %v4057_v31, %v4056_v29  ;;  %v4059_v40 = vmax.f32 %v3607_v36, 0.0 }
 0x1f9   : > { %4508 = vst [vmem:[%s6205_s14 + $0x130] sm:$0xff] %v4923_v35  ;;  %v3645_v41 = vpop.f32.mrb[80].mxu0  ;;  %v4924_v44 = vpack.c.bf16 %v4059_v40, %v4058_v38 }
 0x1fa   : > { %v3646_v42 = vadd.f32 %v3645_v41, %v6198_v60  ;;  %v3647_v43 = vpop.f32.mrb[81].mxu0 }
 0x1fb   : > { %v3648_v45 = vadd.f32 %v3647_v43, %v6198_v60  ;;  %v3649_v46 = vpop.f32.mrb[82].mxu0  ;;  %4509 = vst [vmem:[%s6205_s14 + $0x138] sm:$0xff] %v4924_v44  ;;  %v3686_v50 = vpop.f32.mrb[80].mxu1 }
 0x1fc   : > { %v4060_v47 = vmax.f32 %v3646_v42, 0.0  ;;  %v3650_v48 = vpop.f32.mrb[83].mxu0  ;;  %v3687_v51 = vadd.f32 %v3686_v50, %v6198_v60  ;;  %v3688_v52 = vpop.f32.mrb[81].mxu1 }
 0x1fd   : > { %v4061_v49 = vmax.f32 %v3648_v45, 0.0  ;;  %v3689_v54 = vadd.f32 %v3688_v52, %v6198_v60  ;;  %v3690_v55 = vpop.f32.mrb[82].mxu1 }
 0x1fe   : > { %v4062_v56 = vmax.f32 %v3687_v51, 0.0  ;;  %v3691_v57 = vpop.f32.mrb[83].mxu1 }
 0x1ff   : > { %v4925_v53 = vpack.c.bf16 %v4061_v49, %v4060_v47  ;;  %v4063_v58 = vmax.f32 %v3689_v54, 0.0 }
 0x201   : > { %4510 = vst [vmem:[%s6205_s14 + $0x140] sm:$0xff] %v4925_v53  ;;  %v3727_v59 = vpop.f32.mrb[84].mxu0  ;;  %v4926_v10 = vpack.c.bf16 %v4063_v58, %v4062_v56 }
 0x202   : > { %v3728_v61 = vadd.f32 %v3727_v59, %v6198_v60  ;;  %v3729_v62 = vpop.f32.mrb[85].mxu0 }
 0x203   : > { %v3730_v5 = vadd.f32 %v3729_v62, %v6198_v60  ;;  %v3731_v63 = vpop.f32.mrb[86].mxu0  ;;  %4511 = vst [vmem:[%s6205_s14 + $0x148] sm:$0xff] %v4926_v10  ;;  %v3768_v3 = vpop.f32.mrb[84].mxu1 }
 0x204   : > { %v4064_v0 = vmax.f32 %v3728_v61, 0.0  ;;  %v3732_v1 = vpop.f32.mrb[87].mxu0  ;;  %v3769_v17 = vadd.f32 %v3768_v3, %v6198_v60  ;;  %v3770_v4 = vpop.f32.mrb[85].mxu1 }
 0x205   : > { %v4065_v2 = vmax.f32 %v3730_v5, 0.0  ;;  %v3771_v7 = vadd.f32 %v3770_v4, %v6198_v60  ;;  %v3772_v8 = vpop.f32.mrb[86].mxu1 }
 0x206   : > { %v4066_v9 = vmax.f32 %v3769_v17, 0.0  ;;  %v3773_v11 = vpop.f32.mrb[87].mxu1 }
 0x207   : > { %v4927_v6 = vpack.c.bf16 %v4065_v2, %v4064_v0  ;;  %v4067_v12 = vmax.f32 %v3771_v7, 0.0 }
 0x209   : > { %4512 = vst [vmem:[%s6205_s14 + $0x150] sm:$0xff] %v4927_v6  ;;  %v3809_v13 = vpop.f32.mrb[88].mxu0  ;;  %v4928_v16 = vpack.c.bf16 %v4067_v12, %v4066_v9 }
 0x20a   : > { %v3810_v14 = vadd.f32 %v3809_v13, %v6198_v60  ;;  %v3811_v15 = vpop.f32.mrb[89].mxu0 }
 0x20b   : > { %v3812_v18 = vadd.f32 %v3811_v15, %v6198_v60  ;;  %v3813_v19 = vpop.f32.mrb[90].mxu0  ;;  %4513 = vst [vmem:[%s6205_s14 + $0x158] sm:$0xff] %v4928_v16  ;;  %v3850_v23 = vpop.f32.mrb[88].mxu1 }
 0x20c   : > { %v4068_v20 = vmax.f32 %v3810_v14, 0.0  ;;  %v3814_v21 = vpop.f32.mrb[91].mxu0  ;;  %v3851_v24 = vadd.f32 %v3850_v23, %v6198_v60  ;;  %v3852_v25 = vpop.f32.mrb[89].mxu1 }
 0x20d   : > { %v4069_v22 = vmax.f32 %v3812_v18, 0.0  ;;  %v3853_v27 = vadd.f32 %v3852_v25, %v6198_v60  ;;  %v3854_v28 = vpop.f32.mrb[90].mxu1 }
 0x20e   : > { %v4070_v29 = vmax.f32 %v3851_v24, 0.0  ;;  %v3855_v30 = vpop.f32.mrb[91].mxu1 }
 0x20f   : > { %v4929_v26 = vpack.c.bf16 %v4069_v22, %v4068_v20  ;;  %v4071_v31 = vmax.f32 %v3853_v27, 0.0 }
 0x211   : > { %4514 = vst [vmem:[%s6205_s14 + $0x160] sm:$0xff] %v4929_v26  ;;  %v3891_v32 = vpop.f32.mrb[92].mxu0  ;;  %v4930_v35 = vpack.c.bf16 %v4071_v31, %v4070_v29 }
 0x212   : > { %v3892_v33 = vadd.f32 %v3891_v32, %v6198_v60  ;;  %v3893_v34 = vpop.f32.mrb[93].mxu0 }
 0x213   : > { %v3894_v36 = vadd.f32 %v3893_v34, %v6198_v60  ;;  %v3895_v37 = vpop.f32.mrb[94].mxu0  ;;  %4515 = vst [vmem:[%s6205_s14 + $0x168] sm:$0xff] %v4930_v35  ;;  %v3932_v41 = vpop.f32.mrb[92].mxu1 }
 0x214   : > { %v4072_v38 = vmax.f32 %v3892_v33, 0.0  ;;  %v3896_v39 = vpop.f32.mrb[95].mxu0  ;;  %v3933_v42 = vadd.f32 %v3932_v41, %v6198_v60  ;;  %v3934_v43 = vpop.f32.mrb[93].mxu1 }
 0x215   : > { %v4073_v40 = vmax.f32 %v3894_v36, 0.0  ;;  %v3935_v45 = vadd.f32 %v3934_v43, %v6198_v60  ;;  %v3936_v46 = vpop.f32.mrb[94].mxu1 }
 0x216   : > { %v4074_v47 = vmax.f32 %v3933_v42, 0.0  ;;  %v3937_v48 = vpop.f32.mrb[95].mxu1 }
 0x217   : > { %v4931_v44 = vpack.c.bf16 %v4073_v40, %v4072_v38  ;;  %v4075_v49 = vmax.f32 %v3935_v45, 0.0 }
 0x219   : > { %4516 = vst [vmem:[%s6205_s14 + $0x170] sm:$0xff] %v4931_v44  ;;  %v3973_v50 = vpop.f32.mrb[96].mxu0  ;;  %v4932_v53 = vpack.c.bf16 %v4075_v49, %v4074_v47 }
 0x21a   : > { %v3974_v51 = vadd.f32 %v3973_v50, %v6198_v60  ;;  %v3975_v52 = vpop.f32.mrb[97].mxu0 }
 0x21b   : > { %v3976_v54 = vadd.f32 %v3975_v52, %v6198_v60  ;;  %v3977_v55 = vpop.f32.mrb[98].mxu0  ;;  %4517 = vst [vmem:[%s6205_s14 + $0x178] sm:$0xff] %v4932_v53 }
 0x21c   : > { %v4076_v56 = vmax.f32 %v3974_v51, 0.0  ;;  %v3978_v57 = vpop.f32.mrb[99].mxu0 }
 0x21d   : > { %v4077_v58 = vmax.f32 %v3976_v54, 0.0 }
 0x21f   : > { %v4933_v59 = vpack.c.bf16 %v4077_v58, %v4076_v56 }
 0x221   : > { %4518 = vst [vmem:[%s6205_s14 + $0x180] sm:$0xff] %v4933_v59 }
 0x222 PF: > { %p10_p9 = scmp.ge.s32.totalorder %s5321_s16, 6   ;;  %s6366_s12 = smov %s5276_s13 }
 0x223   : > { %s6367_s13 = smov %s5330_s19  ;;  %s6368_s14 = smov %s5321_s16 }
 0x224   :  { %12 = sbr.rel (!%p10_p9) target bundleno = 2 (0x2), region = 90 }

// kernel: rpsnet_forward.4
= control target key start
LH: loop header
LB: loop body
LE: loop exit
PB: predicated region body
PF: predicated region fallthrough
CT: control target
= control target key end

     0   :  { %s4237_s12 = smov 0   ;;  %s4239_s13 = smov 0   ;;  %s5314_s0 = inlined_call_operand.vmem [shape: bf16[8,200], index: 0, kind: input, shape index: {}]   ;;  %s5315_s1 = inlined_call_operand.vmem [shape: f32[8,1], index: 1, kind: input, shape index: {}]   ;;  %s5316_s2 = inlined_call_operand.vmem [shape: bf16[200,5888], index: 2, kind: input, shape index: {}]   ;;  %s5317_s3 = inlined_call_operand.vmem [shape: bf16[8,5888], index: 3, kind: output, shape index: {}]  }
   0x1   :  { %s4241_s14 = smov 0  }
   0x2 LB: > { %s3323_s15 = sadd.s32 4294967295, %s4214_s14   ;;  %s4254_s16 = sadd.s32 1, %s4214_s14   ;;  %s4214_s14 = sphi %s4241_s14, %s5320_s14   ;;  %s4210_s13 = sphi %s4239_s13, %s5319_s13   ;;  %s4206_s12 = sphi %s4237_s12, %s5318_s12  }
   0x3   : > { %s59_s17 = ssub.s32 %s4214_s14, %s4254_s16  ;;  %s62_s18 = sadd.s32 1, %s4210_s13 }
   0x4   : > { %p60_p0 = scmp.eq.s32.totalorder %s59_s17, 0  ;;  %p69_p1 = scmp.ne.s32.totalorder %s4210_s13, %s4206_s12 }
   0x5   : > { %p70_p2 = scmp.eq.s32.totalorder %s4214_s14, 0  ;;  %p3326_p4 = scmp.ge.s32.totalorder %s4214_s14, 2 }
   0x6   : > { %s4263_s19 = scalar_select %p60_p0, %s4210_s13, %s62_s18  }
   0x7   : > { %p71_p3 = por %p70_p2, %p69_p1  ;;  %127 = sbr.rel (%p3326_p4) target bundleno = 173 (0xad), region = 24 }
   0xe   : > { %130 = sbr.rel (!%p71_p3) target bundleno = 173 (0xad), region = 28  ;;  %s132_s20 = sand.u32 (%p71_p3), 1, %s4210_s13  }
   0xf   : > { %s3718_s21 = smul.u32 (%p71_p3), 92, %s4214_s14 }
  0x10   : > { %s3731_s22 = smul.u32 (%p71_p3), 2300, %s132_s20 }
  0x11   : > { %s4271_s25 = scalar_lea.vmem (%p71_p3), %s5316_s2, %s3718_s21 }
  0x12   : > { %v152_v0 = vld [vmem:[%s4271_s25] sm:$0xff] (%p71_p3)  ;;  %v154_v1 = vld [vmem:[%s4271_s25 + $0x8] sm:$0xff] (%p71_p3)  ;;  %v156_v2 = vld [vmem:[%s4271_s25 + $0x10] sm:$0xff] (%p71_p3)  ;;  %s4276_s26 = scalar_lea.vmem (%p71_p3), [#allocation2], %s3731_s22 }
  0x13   : > { %153 = vst [vmem:[%s4276_s26] sm:$0xff] (%p71_p3), %v152_v0  ;;  %155 = vst [vmem:[%s4276_s26 + $0x8] sm:$0xff] (%p71_p3), %v154_v1  ;;  %v158_v3 = vld [vmem:[%s4271_s25 + $0x18] sm:$0xff] (%p71_p3)  ;;  %v160_v4 = vld [vmem:[%s4271_s25 + $0x20] sm:$0xff] (%p71_p3) }
  0x14   : > { %157 = vst [vmem:[%s4276_s26 + $0x10] sm:$0xff] (%p71_p3), %v156_v2  ;;  %v162_v5 = vld [vmem:[%s4271_s25 + $0x28] sm:$0xff] (%p71_p3)  ;;  %159 = vst [vmem:[%s4276_s26 + $0x18] sm:$0xff] (%p71_p3), %v158_v3  ;;  %v164_v6 = vld [vmem:[%s4271_s25 + $0x30] sm:$0xff] (%p71_p3) }
  0x15   : > { %161 = vst [vmem:[%s4276_s26 + $0x20] sm:$0xff] %v160_v4  ;;  %163 = vst [vmem:[%s4276_s26 + $0x28] sm:$0xff] %v162_v5  ;;  %v166_v7 = vld [vmem:[%s4271_s25 + $0x38] sm:$0xff]  ;;  %v168_v8 = vld [vmem:[%s4271_s25 + $0x40] sm:$0xff] }
  0x16   : > { %165 = vst [vmem:[%s4276_s26 + $0x30] sm:$0xff] %v164_v6  ;;  %167 = vst [vmem:[%s4276_s26 + $0x38] sm:$0xff] %v166_v7  ;;  %v170_v9 = vld [vmem:[%s4271_s25 + $0x48] sm:$0xff]  ;;  %v172_v10 = vld [vmem:[%s4271_s25 + $0x50] sm:$0xff] }
  0x17   : > { %169 = vst [vmem:[%s4276_s26 + $0x40] sm:$0xff] %v168_v8  ;;  %v174_v11 = vld [vmem:[%s4271_s25 + $0xb8] sm:$0xff]  ;;  %171 = vst [vmem:[%s4276_s26 + $0x48] sm:$0xff] %v170_v9  ;;  %v176_v12 = vld [vmem:[%s4271_s25 + $0xc0] sm:$0xff] }
  0x18   : > { %173 = vst [vmem:[%s4276_s26 + $0x50] sm:$0xff] %v172_v10  ;;  %175 = vst [vmem:[%s4276_s26 + $0x5c] sm:$0xff] %v174_v11  ;;  %v178_v13 = vld [vmem:[%s4271_s25 + $0xc8] sm:$0xff]  ;;  %v180_v14 = vld [vmem:[%s4271_s25 + $0xd0] sm:$0xff] }
  0x19   : > { %177 = vst [vmem:[%s4276_s26 + $0x64] sm:$0xff] %v176_v12  ;;  %179 = vst [vmem:[%s4276_s26 + $0x6c] sm:$0xff] %v178_v13  ;;  %v182_v15 = vld [vmem:[%s4271_s25 + $0xd8] sm:$0xff]  ;;  %v184_v16 = vld [vmem:[%s4271_s25 + $0xe0] sm:$0xff] }
  0x1a   : > { %181 = vst [vmem:[%s4276_s26 + $0x74] sm:$0xff] %v180_v14  ;;  %v186_v17 = vld [vmem:[%s4271_s25 + $0xe8] sm:$0xff]  ;;  %183 = vst [vmem:[%s4276_s26 + $0x7c] sm:$0xff] %v182_v15  ;;  %v188_v18 = vld [vmem:[%s4271_s25 + $0xf0] sm:$0xff] }
  0x1b   : > { %185 = vst [vmem:[%s4276_s26 + $0x84] sm:$0xff] %v184_v16  ;;  %187 = vst [vmem:[%s4276_s26 + $0x8c] sm:$0xff] %v186_v17  ;;  %v190_v19 = vld [vmem:[%s4271_s25 + $0xf8] sm:$0xff]  ;;  %v192_v20 = vld [vmem:[%s4271_s25 + $0x100] sm:$0xff] }
  0x1c   : > { %189 = vst [vmem:[%s4276_s26 + $0x94] sm:$0xff] %v188_v18  ;;  %191 = vst [vmem:[%s4276_s26 + $0x9c] sm:$0xff] %v190_v19  ;;  %v194_v21 = vld [vmem:[%s4271_s25 + $0x108] sm:$0xff]  ;;  %v196_v22 = vld [vmem:[%s4271_s25 + $0x170] sm:$0xff] }
  0x1d   : > { %193 = vst [vmem:[%s4276_s26 + $0xa4] sm:$0xff] %v192_v20  ;;  %v198_v23 = vld [vmem:[%s4271_s25 + $0x178] sm:$0xff]  ;;  %195 = vst [vmem:[%s4276_s26 + $0xac] sm:$0xff] %v194_v21  ;;  %v200_v24 = vld [vmem:[%s4271_s25 + $0x180] sm:$0xff] }
  0x1e   : > { %197 = vst [vmem:[%s4276_s26 + $0xb8] sm:$0xff] %v196_v22  ;;  %199 = vst [vmem:[%s4276_s26 + $0xc0] sm:$0xff] %v198_v23  ;;  %v202_v25 = vld [vmem:[%s4271_s25 + $0x188] sm:$0xff]  ;;  %v204_v26 = vld [vmem:[%s4271_s25 + $0x190] sm:$0xff] }
  0x1f   : > { %201 = vst [vmem:[%s4276_s26 + $0xc8] sm:$0xff] %v200_v24  ;;  %203 = vst [vmem:[%s4276_s26 + $0xd0] sm:$0xff] %v202_v25  ;;  %v206_v27 = vld [vmem:[%s4271_s25 + $0x198] sm:$0xff]  ;;  %v208_v28 = vld [vmem:[%s4271_s25 + $0x1a0] sm:$0xff] }
  0x20   : > { %205 = vst [vmem:[%s4276_s26 + $0xd8] sm:$0xff] %v204_v26  ;;  %v210_v29 = vld [vmem:[%s4271_s25 + $0x1a8] sm:$0xff]  ;;  %207 = vst [vmem:[%s4276_s26 + $0xe0] sm:$0xff] %v206_v27  ;;  %v212_v30 = vld [vmem:[%s4271_s25 + $0x1b0] sm:$0xff] }
  0x21   : > { %209 = vst [vmem:[%s4276_s26 + $0xe8] sm:$0xff] %v208_v28  ;;  %211 = vst [vmem:[%s4276_s26 + $0xf0] sm:$0xff] %v210_v29  ;;  %v214_v31 = vld [vmem:[%s4271_s25 + $0x1b8] sm:$0xff]  ;;  %v216_v32 = vld [vmem:[%s4271_s25 + $0x1c0] sm:$0xff] }
  0x22   : > { %213 = vst [vmem:[%s4276_s26 + $0xf8] sm:$0xff] %v212_v30  ;;  %215 = vst [vmem:[%s4276_s26 + $0x100] sm:$0xff] %v214_v31  ;;  %v218_v33 = vld [vmem:[%s4271_s25 + $0x228] sm:$0xff]  ;;  %v220_v34 = vld [vmem:[%s4271_s25 + $0x230] sm:$0xff] }
  0x23   : > { %217 = vst [vmem:[%s4276_s26 + $0x108] sm:$0xff] %v216_v32  ;;  %v222_v35 = vld [vmem:[%s4271_s25 + $0x238] sm:$0xff]  ;;  %219 = vst [vmem:[%s4276_s26 + $0x114] sm:$0xff] %v218_v33  ;;  %v224_v36 = vld [vmem:[%s4271_s25 + $0x240] sm:$0xff] }
  0x24   : > { %221 = vst [vmem:[%s4276_s26 + $0x11c] sm:$0xff] %v220_v34  ;;  %223 = vst [vmem:[%s4276_s26 + $0x124] sm:$0xff] %v222_v35  ;;  %v226_v37 = vld [vmem:[%s4271_s25 + $0x248] sm:$0xff]  ;;  %v228_v38 = vld [vmem:[%s4271_s25 + $0x250] sm:$0xff] }
  0x25   : > { %225 = vst [vmem:[%s4276_s26 + $0x12c] sm:$0xff] %v224_v36  ;;  %227 = vst [vmem:[%s4276_s26 + $0x134] sm:$0xff] %v226_v37  ;;  %v230_v39 = vld [vmem:[%s4271_s25 + $0x258] sm:$0xff]  ;;  %v232_v40 = vld [vmem:[%s4271_s25 + $0x260] sm:$0xff] }
  0x26   : > { %229 = vst [vmem:[%s4276_s26 + $0x13c] sm:$0xff] %v228_v38  ;;  %v234_v41 = vld [vmem:[%s4271_s25 + $0x268] sm:$0xff]  ;;  %231 = vst [vmem:[%s4276_s26 + $0x144] sm:$0xff] %v230_v39  ;;  %v236_v42 = vld [vmem:[%s4271_s25 + $0x270] sm:$0xff] }
  0x27   : > { %233 = vst [vmem:[%s4276_s26 + $0x14c] sm:$0xff] %v232_v40  ;;  %235 = vst [vmem:[%s4276_s26 + $0x154] sm:$0xff] %v234_v41  ;;  %v238_v43 = vld [vmem:[%s4271_s25 + $0x278] sm:$0xff]  ;;  %v240_v44 = vld [vmem:[%s4271_s25 + $0x2e0] sm:$0xff] }
  0x28   : > { %237 = vst [vmem:[%s4276_s26 + $0x15c] sm:$0xff] %v236_v42  ;;  %239 = vst [vmem:[%s4276_s26 + $0x164] sm:$0xff] %v238_v43  ;;  %v242_v45 = vld [vmem:[%s4271_s25 + $0x2e8] sm:$0xff]  ;;  %v244_v46 = vld [vmem:[%s4271_s25 + $0x2f0] sm:$0xff] }
  0x29   : > { %241 = vst [vmem:[%s4276_s26 + $0x170] sm:$0xff] %v240_v44  ;;  %v246_v47 = vld [vmem:[%s4271_s25 + $0x2f8] sm:$0xff]  ;;  %243 = vst [vmem:[%s4276_s26 + $0x178] sm:$0xff] %v242_v45  ;;  %v248_v48 = vld [vmem:[%s4271_s25 + $0x300] sm:$0xff] }
  0x2a   : > { %245 = vst [vmem:[%s4276_s26 + $0x180] sm:$0xff] %v244_v46  ;;  %247 = vst [vmem:[%s4276_s26 + $0x188] sm:$0xff] %v246_v47  ;;  %v250_v49 = vld [vmem:[%s4271_s25 + $0x308] sm:$0xff]  ;;  %v252_v50 = vld [vmem:[%s4271_s25 + $0x310] sm:$0xff] }
  0x2b   : > { %249 = vst [vmem:[%s4276_s26 + $0x190] sm:$0xff] %v248_v48  ;;  %251 = vst [vmem:[%s4276_s26 + $0x198] sm:$0xff] %v250_v49  ;;  %v254_v51 = vld [vmem:[%s4271_s25 + $0x318] sm:$0xff]  ;;  %v256_v52 = vld [vmem:[%s4271_s25 + $0x320] sm:$0xff] }
  0x2c   : > { %253 = vst [vmem:[%s4276_s26 + $0x1a0] sm:$0xff] %v252_v50  ;;  %v258_v53 = vld [vmem:[%s4271_s25 + $0x328] sm:$0xff]  ;;  %255 = vst [vmem:[%s4276_s26 + $0x1a8] sm:$0xff] %v254_v51  ;;  %v260_v54 = vld [vmem:[%s4271_s25 + $0x330] sm:$0xff] }
  0x2d   : > { %257 = vst [vmem:[%s4276_s26 + $0x1b0] sm:$0xff] %v256_v52  ;;  %259 = vst [vmem:[%s4276_s26 + $0x1b8] sm:$0xff] %v258_v53  ;;  %v262_v55 = vld [vmem:[%s4271_s25 + $0x398] sm:$0xff]  ;;  %v264_v56 = vld [vmem:[%s4271_s25 + $0x3a0] sm:$0xff] }
  0x2e   : > { %261 = vst [vmem:[%s4276_s26 + $0x1c0] sm:$0xff] %v260_v54  ;;  %263 = vst [vmem:[%s4276_s26 + $0x1cc] sm:$0xff] %v262_v55  ;;  %v266_v57 = vld [vmem:[%s4271_s25 + $0x3a8] sm:$0xff]  ;;  %v268_v58 = vld [vmem:[%s4271_s25 + $0x3b0] sm:$0xff] }
  0x2f   : > { %265 = vst [vmem:[%s4276_s26 + $0x1d4] sm:$0xff] %v264_v56  ;;  %v270_v59 = vld [vmem:[%s4271_s25 + $0x3b8] sm:$0xff]  ;;  %267 = vst [vmem:[%s4276_s26 + $0x1dc] sm:$0xff] %v266_v57  ;;  %v272_v60 = vld [vmem:[%s4271_s25 + $0x3c0] sm:$0xff] }
  0x30   : > { %269 = vst [vmem:[%s4276_s26 + $0x1e4] sm:$0xff] %v268_v58  ;;  %271 = vst [vmem:[%s4276_s26 + $0x1ec] sm:$0xff] %v270_v59  ;;  %v274_v61 = vld [vmem:[%s4271_s25 + $0x3c8] sm:$0xff]  ;;  %v276_v62 = vld [vmem:[%s4271_s25 + $0x3d0] sm:$0xff] }
  0x31   : > { %273 = vst [vmem:[%s4276_s26 + $0x1f4] sm:$0xff] %v272_v60  ;;  %275 = vst [vmem:[%s4276_s26 + $0x1fc] sm:$0xff] %v274_v61  ;;  %v278_v63 = vld [vmem:[%s4271_s25 + $0x3d8] sm:$0xff]  ;;  %v280_v0 = vld [vmem:[%s4271_s25 + $0x3e0] sm:$0xff] }
  0x32   : > { %277 = vst [vmem:[%s4276_s26 + $0x204] sm:$0xff] %v276_v62  ;;  %v282_v1 = vld [vmem:[%s4271_s25 + $0x3e8] sm:$0xff]  ;;  %279 = vst [vmem:[%s4276_s26 + $0x20c] sm:$0xff] %v278_v63  ;;  %v284_v2 = vld [vmem:[%s4271_s25 + $0x450] sm:$0xff] }
  0x33   : > { %281 = vst [vmem:[%s4276_s26 + $0x214] sm:$0xff] %v280_v0  ;;  %283 = vst [vmem:[%s4276_s26 + $0x21c] sm:$0xff] %v282_v1  ;;  %v286_v3 = vld [vmem:[%s4271_s25 + $0x458] sm:$0xff]  ;;  %v288_v4 = vld [vmem:[%s4271_s25 + $0x460] sm:$0xff] }
  0x34   : > { %285 = vst [vmem:[%s4276_s26 + $0x228] sm:$0xff] %v284_v2  ;;  %287 = vst [vmem:[%s4276_s26 + $0x230] sm:$0xff] %v286_v3  ;;  %v290_v5 = vld [vmem:[%s4271_s25 + $0x468] sm:$0xff]  ;;  %v292_v6 = vld [vmem:[%s4271_s25 + $0x470] sm:$0xff] }
  0x35   : > { %289 = vst [vmem:[%s4276_s26 + $0x238] sm:$0xff] %v288_v4  ;;  %v294_v7 = vld [vmem:[%s4271_s25 + $0x478] sm:$0xff]  ;;  %291 = vst [vmem:[%s4276_s26 + $0x240] sm:$0xff] %v290_v5  ;;  %v296_v8 = vld [vmem:[%s4271_s25 + $0x480] sm:$0xff] }
  0x36   : > { %293 = vst [vmem:[%s4276_s26 + $0x248] sm:$0xff] %v292_v6  ;;  %295 = vst [vmem:[%s4276_s26 + $0x250] sm:$0xff] %v294_v7  ;;  %v298_v9 = vld [vmem:[%s4271_s25 + $0x488] sm:$0xff]  ;;  %v300_v10 = vld [vmem:[%s4271_s25 + $0x490] sm:$0xff] }
  0x37   : > { %297 = vst [vmem:[%s4276_s26 + $0x258] sm:$0xff] %v296_v8  ;;  %299 = vst [vmem:[%s4276_s26 + $0x260] sm:$0xff] %v298_v9  ;;  %v302_v11 = vld [vmem:[%s4271_s25 + $0x498] sm:$0xff]  ;;  %v304_v12 = vld [vmem:[%s4271_s25 + $0x4a0] sm:$0xff] }
  0x38   : > { %301 = vst [vmem:[%s4276_s26 + $0x268] sm:$0xff] %v300_v10  ;;  %v306_v13 = vld [vmem:[%s4271_s25 + $0x508] sm:$0xff]  ;;  %303 = vst [vmem:[%s4276_s26 + $0x270] sm:$0xff] %v302_v11  ;;  %v308_v14 = vld [vmem:[%s4271_s25 + $0x510] sm:$0xff] }
  0x39   : > { %305 = vst [vmem:[%s4276_s26 + $0x278] sm:$0xff] %v304_v12  ;;  %307 = vst [vmem:[%s4276_s26 + $0x284] sm:$0xff] %v306_v13  ;;  %v310_v15 = vld [vmem:[%s4271_s25 + $0x518] sm:$0xff]  ;;  %v312_v16 = vld [vmem:[%s4271_s25 + $0x520] sm:$0xff] }
  0x3a   : > { %309 = vst [vmem:[%s4276_s26 + $0x28c] sm:$0xff] %v308_v14  ;;  %311 = vst [vmem:[%s4276_s26 + $0x294] sm:$0xff] %v310_v15  ;;  %v314_v17 = vld [vmem:[%s4271_s25 + $0x528] sm:$0xff]  ;;  %v316_v18 = vld [vmem:[%s4271_s25 + $0x530] sm:$0xff] }
  0x3b   : > { %313 = vst [vmem:[%s4276_s26 + $0x29c] sm:$0xff] %v312_v16  ;;  %v318_v19 = vld [vmem:[%s4271_s25 + $0x538] sm:$0xff]  ;;  %315 = vst [vmem:[%s4276_s26 + $0x2a4] sm:$0xff] %v314_v17  ;;  %v320_v20 = vld [vmem:[%s4271_s25 + $0x540] sm:$0xff] }
  0x3c   : > { %317 = vst [vmem:[%s4276_s26 + $0x2ac] sm:$0xff] %v316_v18  ;;  %319 = vst [vmem:[%s4276_s26 + $0x2b4] sm:$0xff] %v318_v19  ;;  %v322_v21 = vld [vmem:[%s4271_s25 + $0x548] sm:$0xff]  ;;  %v324_v22 = vld [vmem:[%s4271_s25 + $0x550] sm:$0xff] }
  0x3d   : > { %321 = vst [vmem:[%s4276_s26 + $0x2bc] sm:$0xff] %v320_v20  ;;  %323 = vst [vmem:[%s4276_s26 + $0x2c4] sm:$0xff] %v322_v21  ;;  %v326_v23 = vld [vmem:[%s4271_s25 + $0x558] sm:$0xff]  ;;  %v328_v24 = vld [vmem:[%s4271_s25 + $0x5c0] sm:$0xff] }
  0x3e   : > { %325 = vst [vmem:[%s4276_s26 + $0x2cc] sm:$0xff] %v324_v22  ;;  %v330_v25 = vld [vmem:[%s4271_s25 + $0x5c8] sm:$0xff]  ;;  %327 = vst [vmem:[%s4276_s26 + $0x2d4] sm:$0xff] %v326_v23  ;;  %v332_v26 = vld [vmem:[%s4271_s25 + $0x5d0] sm:$0xff] }
  0x3f   : > { %329 = vst [vmem:[%s4276_s26 + $0x2e0] sm:$0xff] %v328_v24  ;;  %331 = vst [vmem:[%s4276_s26 + $0x2e8] sm:$0xff] %v330_v25  ;;  %v334_v27 = vld [vmem:[%s4271_s25 + $0x5d8] sm:$0xff]  ;;  %v336_v28 = vld [vmem:[%s4271_s25 + $0x5e0] sm:$0xff] }
  0x40   : > { %333 = vst [vmem:[%s4276_s26 + $0x2f0] sm:$0xff] %v332_v26  ;;  %335 = vst [vmem:[%s4276_s26 + $0x2f8] sm:$0xff] %v334_v27  ;;  %v338_v29 = vld [vmem:[%s4271_s25 + $0x5e8] sm:$0xff]  ;;  %v340_v30 = vld [vmem:[%s4271_s25 + $0x5f0] sm:$0xff] }
  0x41   : > { %337 = vst [vmem:[%s4276_s26 + $0x300] sm:$0xff] %v336_v28  ;;  %v342_v31 = vld [vmem:[%s4271_s25 + $0x5f8] sm:$0xff]  ;;  %339 = vst [vmem:[%s4276_s26 + $0x308] sm:$0xff] %v338_v29  ;;  %v344_v32 = vld [vmem:[%s4271_s25 + $0x600] sm:$0xff] }
  0x42   : > { %341 = vst [vmem:[%s4276_s26 + $0x310] sm:$0xff] %v340_v30  ;;  %343 = vst [vmem:[%s4276_s26 + $0x318] sm:$0xff] %v342_v31  ;;  %v346_v33 = vld [vmem:[%s4271_s25 + $0x608] sm:$0xff]  ;;  %v348_v34 = vld [vmem:[%s4271_s25 + $0x610] sm:$0xff] }
  0x43   : > { %345 = vst [vmem:[%s4276_s26 + $0x320] sm:$0xff] %v344_v32  ;;  %347 = vst [vmem:[%s4276_s26 + $0x328] sm:$0xff] %v346_v33  ;;  %v350_v35 = vld [vmem:[%s4271_s25 + $0x678] sm:$0xff]  ;;  %v352_v36 = vld [vmem:[%s4271_s25 + $0x680] sm:$0xff] }
  0x44   : > { %349 = vst [vmem:[%s4276_s26 + $0x330] sm:$0xff] %v348_v34  ;;  %v354_v37 = vld [vmem:[%s4271_s25 + $0x688] sm:$0xff]  ;;  %351 = vst [vmem:[%s4276_s26 + $0x33c] sm:$0xff] %v350_v35  ;;  %v356_v38 = vld [vmem:[%s4271_s25 + $0x690] sm:$0xff] }
  0x45   : > { %353 = vst [vmem:[%s4276_s26 + $0x344] sm:$0xff] %v352_v36  ;;  %355 = vst [vmem:[%s4276_s26 + $0x34c] sm:$0xff] %v354_v37  ;;  %v358_v39 = vld [vmem:[%s4271_s25 + $0x698] sm:$0xff]  ;;  %v360_v40 = vld [vmem:[%s4271_s25 + $0x6a0] sm:$0xff] }
  0x46   : > { %357 = vst [vmem:[%s4276_s26 + $0x354] sm:$0xff] %v356_v38  ;;  %359 = vst [vmem:[%s4276_s26 + $0x35c] sm:$0xff] %v358_v39  ;;  %v362_v41 = vld [vmem:[%s4271_s25 + $0x6a8] sm:$0xff]  ;;  %v364_v42 = vld [vmem:[%s4271_s25 + $0x6b0] sm:$0xff] }
  0x47   : > { %361 = vst [vmem:[%s4276_s26 + $0x364] sm:$0xff] %v360_v40  ;;  %v366_v43 = vld [vmem:[%s4271_s25 + $0x6b8] sm:$0xff]  ;;  %363 = vst [vmem:[%s4276_s26 + $0x36c] sm:$0xff] %v362_v41  ;;  %v368_v44 = vld [vmem:[%s4271_s25 + $0x6c0] sm:$0xff] }
  0x48   : > { %365 = vst [vmem:[%s4276_s26 + $0x374] sm:$0xff] %v364_v42  ;;  %367 = vst [vmem:[%s4276_s26 + $0x37c] sm:$0xff] %v366_v43  ;;  %v370_v45 = vld [vmem:[%s4271_s25 + $0x6c8] sm:$0xff]  ;;  %v372_v46 = vld [vmem:[%s4271_s25 + $0x730] sm:$0xff] }
  0x49   : > { %369 = vst [vmem:[%s4276_s26 + $0x384] sm:$0xff] %v368_v44  ;;  %371 = vst [vmem:[%s4276_s26 + $0x38c] sm:$0xff] %v370_v45  ;;  %v374_v47 = vld [vmem:[%s4271_s25 + $0x738] sm:$0xff]  ;;  %v376_v48 = vld [vmem:[%s4271_s25 + $0x740] sm:$0xff] }
  0x4a   : > { %373 = vst [vmem:[%s4276_s26 + $0x398] sm:$0xff] %v372_v46  ;;  %v378_v49 = vld [vmem:[%s4271_s25 + $0x748] sm:$0xff]  ;;  %375 = vst [vmem:[%s4276_s26 + $0x3a0] sm:$0xff] %v374_v47  ;;  %v380_v50 = vld [vmem:[%s4271_s25 + $0x750] sm:$0xff] }
  0x4b   : > { %377 = vst [vmem:[%s4276_s26 + $0x3a8] sm:$0xff] %v376_v48  ;;  %379 = vst [vmem:[%s4276_s26 + $0x3b0] sm:$0xff] %v378_v49  ;;  %v382_v51 = vld [vmem:[%s4271_s25 + $0x758] sm:$0xff]  ;;  %v384_v52 = vld [vmem:[%s4271_s25 + $0x760] sm:$0xff] }
  0x4c   : > { %381 = vst [vmem:[%s4276_s26 + $0x3b8] sm:$0xff] %v380_v50  ;;  %383 = vst [vmem:[%s4276_s26 + $0x3c0] sm:$0xff] %v382_v51  ;;  %v386_v53 = vld [vmem:[%s4271_s25 + $0x768] sm:$0xff]  ;;  %v388_v54 = vld [vmem:[%s4271_s25 + $0x770] sm:$0xff] }
  0x4d   : > { %385 = vst [vmem:[%s4276_s26 + $0x3c8] sm:$0xff] %v384_v52  ;;  %v390_v55 = vld [vmem:[%s4271_s25 + $0x778] sm:$0xff]  ;;  %387 = vst [vmem:[%s4276_s26 + $0x3d0] sm:$0xff] %v386_v53  ;;  %v392_v56 = vld [vmem:[%s4271_s25 + $0x780] sm:$0xff] }
  0x4e   : > { %389 = vst [vmem:[%s4276_s26 + $0x3d8] sm:$0xff] %v388_v54  ;;  %391 = vst [vmem:[%s4276_s26 + $0x3e0] sm:$0xff] %v390_v55  ;;  %v394_v57 = vld [vmem:[%s4271_s25 + $0x7e8] sm:$0xff]  ;;  %v396_v58 = vld [vmem:[%s4271_s25 + $0x7f0] sm:$0xff] }
  0x4f   : > { %393 = vst [vmem:[%s4276_s26 + $0x3e8] sm:$0xff] %v392_v56  ;;  %395 = vst [vmem:[%s4276_s26 + $0x3f4] sm:$0xff] %v394_v57  ;;  %v398_v59 = vld [vmem:[%s4271_s25 + $0x7f8] sm:$0xff]  ;;  %v400_v60 = vld [vmem:[%s4271_s25 + $0x800] sm:$0xff] }
  0x50   : > { %397 = vst [vmem:[%s4276_s26 + $0x3fc] sm:$0xff] %v396_v58  ;;  %v402_v61 = vld [vmem:[%s4271_s25 + $0x808] sm:$0xff]  ;;  %399 = vst [vmem:[%s4276_s26 + $0x404] sm:$0xff] %v398_v59  ;;  %v404_v62 = vld [vmem:[%s4271_s25 + $0x810] sm:$0xff] }
  0x51   : > { %401 = vst [vmem:[%s4276_s26 + $0x40c] sm:$0xff] %v400_v60  ;;  %403 = vst [vmem:[%s4276_s26 + $0x414] sm:$0xff] %v402_v61  ;;  %v406_v63 = vld [vmem:[%s4271_s25 + $0x818] sm:$0xff]  ;;  %v408_v0 = vld [vmem:[%s4271_s25 + $0x820] sm:$0xff] }
  0x52   : > { %405 = vst [vmem:[%s4276_s26 + $0x41c] sm:$0xff] %v404_v62  ;;  %407 = vst [vmem:[%s4276_s26 + $0x424] sm:$0xff] %v406_v63  ;;  %v410_v1 = vld [vmem:[%s4271_s25 + $0x828] sm:$0xff]  ;;  %v412_v2 = vld [vmem:[%s4271_s25 + $0x830] sm:$0xff] }
  0x53   : > { %409 = vst [vmem:[%s4276_s26 + $0x42c] sm:$0xff] %v408_v0  ;;  %v414_v3 = vld [vmem:[%s4271_s25 + $0x838] sm:$0xff]  ;;  %411 = vst [vmem:[%s4276_s26 + $0x434] sm:$0xff] %v410_v1  ;;  %v416_v4 = vld [vmem:[%s4271_s25 + $0x8a0] sm:$0xff] }
  0x54   : > { %413 = vst [vmem:[%s4276_s26 + $0x43c] sm:$0xff] %v412_v2  ;;  %415 = vst [vmem:[%s4276_s26 + $0x444] sm:$0xff] %v414_v3  ;;  %v418_v5 = vld [vmem:[%s4271_s25 + $0x8a8] sm:$0xff]  ;;  %v420_v6 = vld [vmem:[%s4271_s25 + $0x8b0] sm:$0xff] }
  0x55   : > { %417 = vst [vmem:[%s4276_s26 + $0x450] sm:$0xff] %v416_v4  ;;  %419 = vst [vmem:[%s4276_s26 + $0x458] sm:$0xff] %v418_v5  ;;  %v422_v7 = vld [vmem:[%s4271_s25 + $0x8b8] sm:$0xff]  ;;  %v424_v8 = vld [vmem:[%s4271_s25 + $0x8c0] sm:$0xff] }
  0x56   : > { %421 = vst [vmem:[%s4276_s26 + $0x460] sm:$0xff] %v420_v6  ;;  %v426_v9 = vld [vmem:[%s4271_s25 + $0x8c8] sm:$0xff]  ;;  %423 = vst [vmem:[%s4276_s26 + $0x468] sm:$0xff] %v422_v7  ;;  %v428_v10 = vld [vmem:[%s4271_s25 + $0x8d0] sm:$0xff] }
  0x57   : > { %425 = vst [vmem:[%s4276_s26 + $0x470] sm:$0xff] %v424_v8  ;;  %427 = vst [vmem:[%s4276_s26 + $0x478] sm:$0xff] %v426_v9  ;;  %v430_v11 = vld [vmem:[%s4271_s25 + $0x8d8] sm:$0xff]  ;;  %v432_v12 = vld [vmem:[%s4271_s25 + $0x8e0] sm:$0xff] }
  0x58   : > { %429 = vst [vmem:[%s4276_s26 + $0x480] sm:$0xff] %v428_v10  ;;  %431 = vst [vmem:[%s4276_s26 + $0x488] sm:$0xff] %v430_v11  ;;  %v434_v13 = vld [vmem:[%s4271_s25 + $0x8e8] sm:$0xff]  ;;  %v436_v14 = vld [vmem:[%s4271_s25 + $0x8f0] sm:$0xff] }
  0x59   : > { %433 = vst [vmem:[%s4276_s26 + $0x490] sm:$0xff] %v432_v12  ;;  %v438_v15 = vld [vmem:[%s4271_s25 + $0x958] sm:$0xff]  ;;  %435 = vst [vmem:[%s4276_s26 + $0x498] sm:$0xff] %v434_v13  ;;  %v440_v16 = vld [vmem:[%s4271_s25 + $0x960] sm:$0xff] }
  0x5a   : > { %437 = vst [vmem:[%s4276_s26 + $0x4a0] sm:$0xff] %v436_v14  ;;  %439 = vst [vmem:[%s4276_s26 + $0x4ac] sm:$0xff] %v438_v15  ;;  %v442_v17 = vld [vmem:[%s4271_s25 + $0x968] sm:$0xff]  ;;  %v444_v18 = vld [vmem:[%s4271_s25 + $0x970] sm:$0xff] }
  0x5b   : > { %441 = vst [vmem:[%s4276_s26 + $0x4b4] sm:$0xff] %v440_v16  ;;  %443 = vst [vmem:[%s4276_s26 + $0x4bc] sm:$0xff] %v442_v17  ;;  %v446_v19 = vld [vmem:[%s4271_s25 + $0x978] sm:$0xff]  ;;  %v448_v20 = vld [vmem:[%s4271_s25 + $0x980] sm:$0xff] }
  0x5c   : > { %445 = vst [vmem:[%s4276_s26 + $0x4c4] sm:$0xff] %v444_v18  ;;  %v450_v21 = vld [vmem:[%s4271_s25 + $0x988] sm:$0xff]  ;;  %447 = vst [vmem:[%s4276_s26 + $0x4cc] sm:$0xff] %v446_v19  ;;  %v452_v22 = vld [vmem:[%s4271_s25 + $0x990] sm:$0xff] }
  0x5d   : > { %449 = vst [vmem:[%s4276_s26 + $0x4d4] sm:$0xff] %v448_v20  ;;  %451 = vst [vmem:[%s4276_s26 + $0x4dc] sm:$0xff] %v450_v21  ;;  %v454_v23 = vld [vmem:[%s4271_s25 + $0x998] sm:$0xff]  ;;  %v456_v24 = vld [vmem:[%s4271_s25 + $0x9a0] sm:$0xff] }
  0x5e   : > { %453 = vst [vmem:[%s4276_s26 + $0x4e4] sm:$0xff] %v452_v22  ;;  %455 = vst [vmem:[%s4276_s26 + $0x4ec] sm:$0xff] %v454_v23  ;;  %v458_v25 = vld [vmem:[%s4271_s25 + $0x9a8] sm:$0xff]  ;;  %v460_v26 = vld [vmem:[%s4271_s25 + $0xa10] sm:$0xff] }
  0x5f   : > { %457 = vst [vmem:[%s4276_s26 + $0x4f4] sm:$0xff] %v456_v24  ;;  %v462_v27 = vld [vmem:[%s4271_s25 + $0xa18] sm:$0xff]  ;;  %459 = vst [vmem:[%s4276_s26 + $0x4fc] sm:$0xff] %v458_v25  ;;  %v464_v28 = vld [vmem:[%s4271_s25 + $0xa20] sm:$0xff] }
  0x60   : > { %461 = vst [vmem:[%s4276_s26 + $0x508] sm:$0xff] %v460_v26  ;;  %463 = vst [vmem:[%s4276_s26 + $0x510] sm:$0xff] %v462_v27  ;;  %v466_v29 = vld [vmem:[%s4271_s25 + $0xa28] sm:$0xff]  ;;  %v468_v30 = vld [vmem:[%s4271_s25 + $0xa30] sm:$0xff] }
  0x61   : > { %465 = vst [vmem:[%s4276_s26 + $0x518] sm:$0xff] %v464_v28  ;;  %467 = vst [vmem:[%s4276_s26 + $0x520] sm:$0xff] %v466_v29  ;;  %v470_v31 = vld [vmem:[%s4271_s25 + $0xa38] sm:$0xff]  ;;  %v472_v32 = vld [vmem:[%s4271_s25 + $0xa40] sm:$0xff] }
  0x62   : > { %469 = vst [vmem:[%s4276_s26 + $0x528] sm:$0xff] %v468_v30  ;;  %v474_v33 = vld [vmem:[%s4271_s25 + $0xa48] sm:$0xff]  ;;  %471 = vst [vmem:[%s4276_s26 + $0x530] sm:$0xff] %v470_v31  ;;  %v476_v34 = vld [vmem:[%s4271_s25 + $0xa50] sm:$0xff] }
  0x63   : > { %473 = vst [vmem:[%s4276_s26 + $0x538] sm:$0xff] %v472_v32  ;;  %475 = vst [vmem:[%s4276_s26 + $0x540] sm:$0xff] %v474_v33  ;;  %v478_v35 = vld [vmem:[%s4271_s25 + $0xa58] sm:$0xff]  ;;  %v480_v36 = vld [vmem:[%s4271_s25 + $0xa60] sm:$0xff] }
  0x64   : > { %477 = vst [vmem:[%s4276_s26 + $0x548] sm:$0xff] %v476_v34  ;;  %479 = vst [vmem:[%s4276_s26 + $0x550] sm:$0xff] %v478_v35  ;;  %v482_v37 = vld [vmem:[%s4271_s25 + $0xac8] sm:$0xff]  ;;  %v484_v38 = vld [vmem:[%s4271_s25 + $0xad0] sm:$0xff] }
  0x65   : > { %481 = vst [vmem:[%s4276_s26 + $0x558] sm:$0xff] %v480_v36  ;;  %v486_v39 = vld [vmem:[%s4271_s25 + $0xad8] sm:$0xff]  ;;  %483 = vst [vmem:[%s4276_s26 + $0x564] sm:$0xff] %v482_v37  ;;  %v488_v40 = vld [vmem:[%s4271_s25 + $0xae0] sm:$0xff] }
  0x66   : > { %485 = vst [vmem:[%s4276_s26 + $0x56c] sm:$0xff] %v484_v38  ;;  %487 = vst [vmem:[%s4276_s26 + $0x574] sm:$0xff] %v486_v39  ;;  %v490_v41 = vld [vmem:[%s4271_s25 + $0xae8] sm:$0xff]  ;;  %v492_v42 = vld [vmem:[%s4271_s25 + $0xaf0] sm:$0xff] }
  0x67   : > { %489 = vst [vmem:[%s4276_s26 + $0x57c] sm:$0xff] %v488_v40  ;;  %491 = vst [vmem:[%s4276_s26 + $0x584] sm:$0xff] %v490_v41  ;;  %v494_v43 = vld [vmem:[%s4271_s25 + $0xaf8] sm:$0xff]  ;;  %v496_v44 = vld [vmem:[%s4271_s25 + $0xb00] sm:$0xff] }
  0x68   : > { %493 = vst [vmem:[%s4276_s26 + $0x58c] sm:$0xff] %v492_v42  ;;  %v498_v45 = vld [vmem:[%s4271_s25 + $0xb08] sm:$0xff]  ;;  %495 = vst [vmem:[%s4276_s26 + $0x594] sm:$0xff] %v494_v43  ;;  %v500_v46 = vld [vmem:[%s4271_s25 + $0xb10] sm:$0xff] }
  0x69   : > { %497 = vst [vmem:[%s4276_s26 + $0x59c] sm:$0xff] %v496_v44  ;;  %499 = vst [vmem:[%s4276_s26 + $0x5a4] sm:$0xff] %v498_v45  ;;  %v502_v47 = vld [vmem:[%s4271_s25 + $0xb18] sm:$0xff]  ;;  %v504_v48 = vld [vmem:[%s4271_s25 + $0xb80] sm:$0xff] }
  0x6a   : > { %501 = vst [vmem:[%s4276_s26 + $0x5ac] sm:$0xff] %v500_v46  ;;  %503 = vst [vmem:[%s4276_s26 + $0x5b4] sm:$0xff] %v502_v47  ;;  %v506_v49 = vld [vmem:[%s4271_s25 + $0xb88] sm:$0xff]  ;;  %v508_v50 = vld [vmem:[%s4271_s25 + $0xb90] sm:$0xff] }
  0x6b   : > { %505 = vst [vmem:[%s4276_s26 + $0x5c0] sm:$0xff] %v504_v48  ;;  %v510_v51 = vld [vmem:[%s4271_s25 + $0xb98] sm:$0xff]  ;;  %507 = vst [vmem:[%s4276_s26 + $0x5c8] sm:$0xff] %v506_v49  ;;  %v512_v52 = vld [vmem:[%s4271_s25 + $0xba0] sm:$0xff] }
  0x6c   : > { %509 = vst [vmem:[%s4276_s26 + $0x5d0] sm:$0xff] %v508_v50  ;;  %511 = vst [vmem:[%s4276_s26 + $0x5d8] sm:$0xff] %v510_v51  ;;  %v514_v53 = vld [vmem:[%s4271_s25 + $0xba8] sm:$0xff]  ;;  %v516_v54 = vld [vmem:[%s4271_s25 + $0xbb0] sm:$0xff] }
  0x6d   : > { %513 = vst [vmem:[%s4276_s26 + $0x5e0] sm:$0xff] %v512_v52  ;;  %515 = vst [vmem:[%s4276_s26 + $0x5e8] sm:$0xff] %v514_v53  ;;  %v518_v55 = vld [vmem:[%s4271_s25 + $0xbb8] sm:$0xff]  ;;  %v520_v56 = vld [vmem:[%s4271_s25 + $0xbc0] sm:$0xff] }
  0x6e   : > { %517 = vst [vmem:[%s4276_s26 + $0x5f0] sm:$0xff] %v516_v54  ;;  %v522_v57 = vld [vmem:[%s4271_s25 + $0xbc8] sm:$0xff]  ;;  %519 = vst [vmem:[%s4276_s26 + $0x5f8] sm:$0xff] %v518_v55  ;;  %v524_v58 = vld [vmem:[%s4271_s25 + $0xbd0] sm:$0xff] }
  0x6f   : > { %521 = vst [vmem:[%s4276_s26 + $0x600] sm:$0xff] %v520_v56  ;;  %523 = vst [vmem:[%s4276_s26 + $0x608] sm:$0xff] %v522_v57  ;;  %v526_v59 = vld [vmem:[%s4271_s25 + $0xc38] sm:$0xff]  ;;  %v528_v60 = vld [vmem:[%s4271_s25 + $0xc40] sm:$0xff] }
  0x70   : > { %525 = vst [vmem:[%s4276_s26 + $0x610] sm:$0xff] %v524_v58  ;;  %527 = vst [vmem:[%s4276_s26 + $0x61c] sm:$0xff] %v526_v59  ;;  %v530_v61 = vld [vmem:[%s4271_s25 + $0xc48] sm:$0xff]  ;;  %v532_v62 = vld [vmem:[%s4271_s25 + $0xc50] sm:$0xff] }
  0x71   : > { %529 = vst [vmem:[%s4276_s26 + $0x624] sm:$0xff] %v528_v60  ;;  %v534_v63 = vld [vmem:[%s4271_s25 + $0xc58] sm:$0xff]  ;;  %531 = vst [vmem:[%s4276_s26 + $0x62c] sm:$0xff] %v530_v61  ;;  %v536_v0 = vld [vmem:[%s4271_s25 + $0xc60] sm:$0xff] }
  0x72   : > { %533 = vst [vmem:[%s4276_s26 + $0x634] sm:$0xff] %v532_v62  ;;  %535 = vst [vmem:[%s4276_s26 + $0x63c] sm:$0xff] %v534_v63  ;;  %v538_v1 = vld [vmem:[%s4271_s25 + $0xc68] sm:$0xff]  ;;  %v540_v2 = vld [vmem:[%s4271_s25 + $0xc70] sm:$0xff] }
  0x73   : > { %537 = vst [vmem:[%s4276_s26 + $0x644] sm:$0xff] %v536_v0  ;;  %539 = vst [vmem:[%s4276_s26 + $0x64c] sm:$0xff] %v538_v1  ;;  %v542_v3 = vld [vmem:[%s4271_s25 + $0xc78] sm:$0xff]  ;;  %v544_v4 = vld [vmem:[%s4271_s25 + $0xc80] sm:$0xff] }
  0x74   : > { %541 = vst [vmem:[%s4276_s26 + $0x654] sm:$0xff] %v540_v2  ;;  %v546_v5 = vld [vmem:[%s4271_s25 + $0xc88] sm:$0xff]  ;;  %543 = vst [vmem:[%s4276_s26 + $0x65c] sm:$0xff] %v542_v3  ;;  %v548_v6 = vld [vmem:[%s4271_s25 + $0xcf0] sm:$0xff] }
  0x75   : > { %545 = vst [vmem:[%s4276_s26 + $0x664] sm:$0xff] %v544_v4  ;;  %547 = vst [vmem:[%s4276_s26 + $0x66c] sm:$0xff] %v546_v5  ;;  %v550_v7 = vld [vmem:[%s4271_s25 + $0xcf8] sm:$0xff]  ;;  %v552_v8 = vld [vmem:[%s4271_s25 + $0xd00] sm:$0xff] }
  0x76   : > { %549 = vst [vmem:[%s4276_s26 + $0x678] sm:$0xff] %v548_v6  ;;  %551 = vst [vmem:[%s4276_s26 + $0x680] sm:$0xff] %v550_v7  ;;  %v554_v9 = vld [vmem:[%s4271_s25 + $0xd08] sm:$0xff]  ;;  %v556_v10 = vld [vmem:[%s4271_s25 + $0xd10] sm:$0xff] }
  0x77   : > { %553 = vst [vmem:[%s4276_s26 + $0x688] sm:$0xff] %v552_v8  ;;  %v558_v11 = vld [vmem:[%s4271_s25 + $0xd18] sm:$0xff]  ;;  %555 = vst [vmem:[%s4276_s26 + $0x690] sm:$0xff] %v554_v9  ;;  %v560_v12 = vld [vmem:[%s4271_s25 + $0xd20] sm:$0xff] }
  0x78   : > { %557 = vst [vmem:[%s4276_s26 + $0x698] sm:$0xff] %v556_v10  ;;  %559 = vst [vmem:[%s4276_s26 + $0x6a0] sm:$0xff] %v558_v11  ;;  %v562_v13 = vld [vmem:[%s4271_s25 + $0xd28] sm:$0xff]  ;;  %v564_v14 = vld [vmem:[%s4271_s25 + $0xd30] sm:$0xff] }
  0x79   : > { %561 = vst [vmem:[%s4276_s26 + $0x6a8] sm:$0xff] %v560_v12  ;;  %563 = vst [vmem:[%s4276_s26 + $0x6b0] sm:$0xff] %v562_v13  ;;  %v566_v15 = vld [vmem:[%s4271_s25 + $0xd38] sm:$0xff]  ;;  %v568_v16 = vld [vmem:[%s4271_s25 + $0xd40] sm:$0xff] }
  0x7a   : > { %565 = vst [vmem:[%s4276_s26 + $0x6b8] sm:$0xff] %v564_v14  ;;  %v570_v17 = vld [vmem:[%s4271_s25 + $0xda8] sm:$0xff]  ;;  %567 = vst [vmem:[%s4276_s26 + $0x6c0] sm:$0xff] %v566_v15  ;;  %v572_v18 = vld [vmem:[%s4271_s25 + $0xdb0] sm:$0xff] }
  0x7b   : > { %569 = vst [vmem:[%s4276_s26 + $0x6c8] sm:$0xff] %v568_v16  ;;  %571 = vst [vmem:[%s4276_s26 + $0x6d4] sm:$0xff] %v570_v17  ;;  %v574_v19 = vld [vmem:[%s4271_s25 + $0xdb8] sm:$0xff]  ;;  %v576_v20 = vld [vmem:[%s4271_s25 + $0xdc0] sm:$0xff] }
  0x7c   : > { %573 = vst [vmem:[%s4276_s26 + $0x6dc] sm:$0xff] %v572_v18  ;;  %575 = vst [vmem:[%s4276_s26 + $0x6e4] sm:$0xff] %v574_v19  ;;  %v578_v21 = vld [vmem:[%s4271_s25 + $0xdc8] sm:$0xff]  ;;  %v580_v22 = vld [vmem:[%s4271_s25 + $0xdd0] sm:$0xff] }
  0x7d   : > { %577 = vst [vmem:[%s4276_s26 + $0x6ec] sm:$0xff] %v576_v20  ;;  %v582_v23 = vld [vmem:[%s4271_s25 + $0xdd8] sm:$0xff]  ;;  %579 = vst [vmem:[%s4276_s26 + $0x6f4] sm:$0xff] %v578_v21  ;;  %v584_v24 = vld [vmem:[%s4271_s25 + $0xde0] sm:$0xff] }
  0x7e   : > { %581 = vst [vmem:[%s4276_s26 + $0x6fc] sm:$0xff] %v580_v22  ;;  %583 = vst [vmem:[%s4276_s26 + $0x704] sm:$0xff] %v582_v23  ;;  %v586_v25 = vld [vmem:[%s4271_s25 + $0xde8] sm:$0xff]  ;;  %v588_v26 = vld [vmem:[%s4271_s25 + $0xdf0] sm:$0xff] }
  0x7f   : > { %585 = vst [vmem:[%s4276_s26 + $0x70c] sm:$0xff] %v584_v24  ;;  %587 = vst [vmem:[%s4276_s26 + $0x714] sm:$0xff] %v586_v25  ;;  %v590_v27 = vld [vmem:[%s4271_s25 + $0xdf8] sm:$0xff]  ;;  %v592_v28 = vld [vmem:[%s4271_s25 + $0xe60] sm:$0xff] }
  0x80   : > { %589 = vst [vmem:[%s4276_s26 + $0x71c] sm:$0xff] %v588_v26  ;;  %v594_v29 = vld [vmem:[%s4271_s25 + $0xe68] sm:$0xff]  ;;  %591 = vst [vmem:[%s4276_s26 + $0x724] sm:$0xff] %v590_v27  ;;  %v596_v30 = vld [vmem:[%s4271_s25 + $0xe70] sm:$0xff] }
  0x81   : > { %593 = vst [vmem:[%s4276_s26 + $0x730] sm:$0xff] %v592_v28  ;;  %595 = vst [vmem:[%s4276_s26 + $0x738] sm:$0xff] %v594_v29  ;;  %v598_v31 = vld [vmem:[%s4271_s25 + $0xe78] sm:$0xff]  ;;  %v600_v32 = vld [vmem:[%s4271_s25 + $0xe80] sm:$0xff] }
  0x82   : > { %597 = vst [vmem:[%s4276_s26 + $0x740] sm:$0xff] %v596_v30  ;;  %599 = vst [vmem:[%s4276_s26 + $0x748] sm:$0xff] %v598_v31  ;;  %v602_v33 = vld [vmem:[%s4271_s25 + $0xe88] sm:$0xff]  ;;  %v604_v34 = vld [vmem:[%s4271_s25 + $0xe90] sm:$0xff] }
  0x83   : > { %601 = vst [vmem:[%s4276_s26 + $0x750] sm:$0xff] %v600_v32  ;;  %v606_v35 = vld [vmem:[%s4271_s25 + $0xe98] sm:$0xff]  ;;  %603 = vst [vmem:[%s4276_s26 + $0x758] sm:$0xff] %v602_v33  ;;  %v608_v36 = vld [vmem:[%s4271_s25 + $0xea0] sm:$0xff] }
  0x84   : > { %605 = vst [vmem:[%s4276_s26 + $0x760] sm:$0xff] %v604_v34  ;;  %607 = vst [vmem:[%s4276_s26 + $0x768] sm:$0xff] %v606_v35  ;;  %v610_v37 = vld [vmem:[%s4271_s25 + $0xea8] sm:$0xff]  ;;  %v612_v38 = vld [vmem:[%s4271_s25 + $0xeb0] sm:$0xff] }
  0x85   : > { %609 = vst [vmem:[%s4276_s26 + $0x770] sm:$0xff] %v608_v36  ;;  %611 = vst [vmem:[%s4276_s26 + $0x778] sm:$0xff] %v610_v37  ;;  %v614_v39 = vld [vmem:[%s4271_s25 + $0xf18] sm:$0xff]  ;;  %v616_v40 = vld [vmem:[%s4271_s25 + $0xf20] sm:$0xff] }
  0x86   : > { %613 = vst [vmem:[%s4276_s26 + $0x780] sm:$0xff] %v612_v38  ;;  %v618_v41 = vld [vmem:[%s4271_s25 + $0xf28] sm:$0xff]  ;;  %615 = vst [vmem:[%s4276_s26 + $0x78c] sm:$0xff] %v614_v39  ;;  %v620_v42 = vld [vmem:[%s4271_s25 + $0xf30] sm:$0xff] }
  0x87   : > { %617 = vst [vmem:[%s4276_s26 + $0x794] sm:$0xff] %v616_v40  ;;  %619 = vst [vmem:[%s4276_s26 + $0x79c] sm:$0xff] %v618_v41  ;;  %v622_v43 = vld [vmem:[%s4271_s25 + $0xf38] sm:$0xff]  ;;  %v624_v44 = vld [vmem:[%s4271_s25 + $0xf40] sm:$0xff] }
  0x88   : > { %621 = vst [vmem:[%s4276_s26 + $0x7a4] sm:$0xff] %v620_v42  ;;  %623 = vst [vmem:[%s4276_s26 + $0x7ac] sm:$0xff] %v622_v43  ;;  %v626_v45 = vld [vmem:[%s4271_s25 + $0xf48] sm:$0xff]  ;;  %v628_v46 = vld [vmem:[%s4271_s25 + $0xf50] sm:$0xff] }
  0x89   : > { %625 = vst [vmem:[%s4276_s26 + $0x7b4] sm:$0xff] %v624_v44  ;;  %v630_v47 = vld [vmem:[%s4271_s25 + $0xf58] sm:$0xff]  ;;  %627 = vst [vmem:[%s4276_s26 + $0x7bc] sm:$0xff] %v626_v45  ;;  %v632_v48 = vld [vmem:[%s4271_s25 + $0xf60] sm:$0xff] }
  0x8a   : > { %629 = vst [vmem:[%s4276_s26 + $0x7c4] sm:$0xff] %v628_v46  ;;  %631 = vst [vmem:[%s4276_s26 + $0x7cc] sm:$0xff] %v630_v47  ;;  %v634_v49 = vld [vmem:[%s4271_s25 + $0xf68] sm:$0xff]  ;;  %v636_v50 = vld [vmem:[%s4271_s25 + $0xfd0] sm:$0xff] }
  0x8b   : > { %633 = vst [vmem:[%s4276_s26 + $0x7d4] sm:$0xff] %v632_v48  ;;  %635 = vst [vmem:[%s4276_s26 + $0x7dc] sm:$0xff] %v634_v49  ;;  %v638_v51 = vld [vmem:[%s4271_s25 + $0xfd8] sm:$0xff]  ;;  %v640_v52 = vld [vmem:[%s4271_s25 + $0xfe0] sm:$0xff] }
  0x8c   : > { %637 = vst [vmem:[%s4276_s26 + $0x7e8] sm:$0xff] %v636_v50  ;;  %v642_v53 = vld [vmem:[%s4271_s25 + $0xfe8] sm:$0xff]  ;;  %639 = vst [vmem:[%s4276_s26 + $0x7f0] sm:$0xff] %v638_v51  ;;  %v644_v54 = vld [vmem:[%s4271_s25 + $0xff0] sm:$0xff] }
  0x8d   : > { %641 = vst [vmem:[%s4276_s26 + $0x7f8] sm:$0xff] %v640_v52  ;;  %643 = vst [vmem:[%s4276_s26 + $0x800] sm:$0xff] %v642_v53  ;;  %v646_v55 = vld [vmem:[%s4271_s25 + $0xff8] sm:$0xff]  ;;  %v648_v56 = vld [vmem:[%s4271_s25 + $0x1000] sm:$0xff] }
  0x8e   : > { %645 = vst [vmem:[%s4276_s26 + $0x808] sm:$0xff] %v644_v54  ;;  %647 = vst [vmem:[%s4276_s26 + $0x810] sm:$0xff] %v646_v55  ;;  %v650_v57 = vld [vmem:[%s4271_s25 + $0x1008] sm:$0xff]  ;;  %v652_v58 = vld [vmem:[%s4271_s25 + $0x1010] sm:$0xff] }
  0x8f   : > { %649 = vst [vmem:[%s4276_s26 + $0x818] sm:$0xff] %v648_v56  ;;  %v654_v59 = vld [vmem:[%s4271_s25 + $0x1018] sm:$0xff]  ;;  %651 = vst [vmem:[%s4276_s26 + $0x820] sm:$0xff] %v650_v57  ;;  %v656_v60 = vld [vmem:[%s4271_s25 + $0x1020] sm:$0xff] }
  0x90   : > { %653 = vst [vmem:[%s4276_s26 + $0x828] sm:$0xff] %v652_v58  ;;  %655 = vst [vmem:[%s4276_s26 + $0x830] sm:$0xff] %v654_v59  ;;  %v658_v61 = vld [vmem:[%s4271_s25 + $0x1088] sm:$0xff]  ;;  %v660_v62 = vld [vmem:[%s4271_s25 + $0x1090] sm:$0xff] }
  0x91   : > { %657 = vst [vmem:[%s4276_s26 + $0x838] sm:$0xff] %v656_v60  ;;  %659 = vst [vmem:[%s4276_s26 + $0x844] sm:$0xff] %v658_v61  ;;  %v662_v63 = vld [vmem:[%s4271_s25 + $0x1098] sm:$0xff]  ;;  %v664_v0 = vld [vmem:[%s4271_s25 + $0x10a0] sm:$0xff] }
  0x92   : > { %661 = vst [vmem:[%s4276_s26 + $0x84c] sm:$0xff] %v660_v62  ;;  %v666_v1 = vld [vmem:[%s4271_s25 + $0x10a8] sm:$0xff]  ;;  %663 = vst [vmem:[%s4276_s26 + $0x854] sm:$0xff] %v662_v63  ;;  %v668_v2 = vld [vmem:[%s4271_s25 + $0x10b0] sm:$0xff] }
  0x93   : > { %665 = vst [vmem:[%s4276_s26 + $0x85c] sm:$0xff] %v664_v0  ;;  %667 = vst [vmem:[%s4276_s26 + $0x864] sm:$0xff] %v666_v1  ;;  %v670_v3 = vld [vmem:[%s4271_s25 + $0x10b8] sm:$0xff]  ;;  %v672_v4 = vld [vmem:[%s4271_s25 + $0x10c0] sm:$0xff] }
  0x94   : > { %669 = vst [vmem:[%s4276_s26 + $0x86c] sm:$0xff] %v668_v2  ;;  %671 = vst [vmem:[%s4276_s26 + $0x874] sm:$0xff] %v670_v3  ;;  %v674_v5 = vld [vmem:[%s4271_s25 + $0x10c8] sm:$0xff]  ;;  %v676_v6 = vld [vmem:[%s4271_s25 + $0x10d0] sm:$0xff] }
  0x95   : > { %673 = vst [vmem:[%s4276_s26 + $0x87c] sm:$0xff] %v672_v4  ;;  %v678_v7 = vld [vmem:[%s4271_s25 + $0x10d8] sm:$0xff]  ;;  %675 = vst [vmem:[%s4276_s26 + $0x884] sm:$0xff] %v674_v5  ;;  %v680_v8 = vld [vmem:[%s4271_s25 + $0x1140] sm:$0xff] }
  0x96   : > { %677 = vst [vmem:[%s4276_s26 + $0x88c] sm:$0xff] %v676_v6  ;;  %679 = vst [vmem:[%s4276_s26 + $0x894] sm:$0xff] %v678_v7  ;;  %v682_v9 = vld [vmem:[%s4271_s25 + $0x1148] sm:$0xff]  ;;  %v684_v10 = vld [vmem:[%s4271_s25 + $0x1150] sm:$0xff] }
  0x97   : > { %681 = vst [vmem:[%s4276_s26 + $0x8a0] sm:$0xff] %v680_v8  ;;  %683 = vst [vmem:[%s4276_s26 + $0x8a8] sm:$0xff] %v682_v9  ;;  %v686_v11 = vld [vmem:[%s4271_s25 + $0x1158] sm:$0xff]  ;;  %v688_v12 = vld [vmem:[%s4271_s25 + $0x1160] sm:$0xff] }
  0x98   : > { %685 = vst [vmem:[%s4276_s26 + $0x8b0] sm:$0xff] %v684_v10  ;;  %v690_v13 = vld [vmem:[%s4271_s25 + $0x1168] sm:$0xff]  ;;  %687 = vst [vmem:[%s4276_s26 + $0x8b8] sm:$0xff] %v686_v11  ;;  %v692_v14 = vld [vmem:[%s4271_s25 + $0x1170] sm:$0xff] }
  0x99   : > { %689 = vst [vmem:[%s4276_s26 + $0x8c0] sm:$0xff] %v688_v12  ;;  %691 = vst [vmem:[%s4276_s26 + $0x8c8] sm:$0xff] %v690_v13  ;;  %v694_v15 = vld [vmem:[%s4271_s25 + $0x1178] sm:$0xff]  ;;  %v696_v16 = vld [vmem:[%s4271_s25 + $0x1180] sm:$0xff] }
  0x9a   : > { %693 = vst [vmem:[%s4276_s26 + $0x8d0] sm:$0xff] %v692_v14  ;;  %695 = vst [vmem:[%s4276_s26 + $0x8d8] sm:$0xff] %v694_v15  ;;  %v698_v17 = vld [vmem:[%s4271_s25 + $0x1188] sm:$0xff]  ;;  %v700_v18 = vld [vmem:[%s4271_s25 + $0x1190] sm:$0xff] }
  0x9b   : > { %697 = vst [vmem:[%s4276_s26 + $0x8e0] sm:$0xff] %v696_v16  ;;  %v3328_v19 = vld [vmem:[%s4271_s25 + $0x58] sm:$0xf]  ;;  %699 = vst [vmem:[%s4276_s26 + $0x8e8] sm:$0xff] %v698_v17  ;;  %v3330_v20 = vld [vmem:[%s4271_s25 + $0x110] sm:$0xf] }
  0x9c   : > { %701 = vst [vmem:[%s4276_s26 + $0x8f0] sm:$0xff] %v700_v18  ;;  %3329 = vst [vmem:[%s4276_s26 + $0x58] sm:$0xf] %v3328_v19  ;;  %v3332_v21 = vld [vmem:[%s4271_s25 + $0x1c8] sm:$0xf] }
  0x9d   : > { %v3334_v22 = vld [vmem:[%s4271_s25 + $0x280] sm:$0xf]  ;;  %3331 = vst [vmem:[%s4276_s26 + $0xb4] sm:$0xf] %v3330_v20  ;;  %3333 = vst [vmem:[%s4276_s26 + $0x110] sm:$0xf] %v3332_v21 }
  0x9e   : > { %3335 = vst [vmem:[%s4276_s26 + $0x16c] sm:$0xf] %v3334_v22  ;;  %v3336_v23 = vld [vmem:[%s4271_s25 + $0x338] sm:$0xf]  ;;  %v3338_v24 = vld [vmem:[%s4271_s25 + $0x3f0] sm:$0xf] }
  0x9f   : > { %v3340_v25 = vld [vmem:[%s4271_s25 + $0x4a8] sm:$0xf]  ;;  %3337 = vst [vmem:[%s4276_s26 + $0x1c8] sm:$0xf] %v3336_v23  ;;  %3339 = vst [vmem:[%s4276_s26 + $0x224] sm:$0xf] %v3338_v24 }
  0xa0   : > { %3341 = vst [vmem:[%s4276_s26 + $0x280] sm:$0xf] %v3340_v25  ;;  %v3342_v26 = vld [vmem:[%s4271_s25 + $0x560] sm:$0xf]  ;;  %v3344_v27 = vld [vmem:[%s4271_s25 + $0x618] sm:$0xf] }
  0xa1   : > { %v3346_v28 = vld [vmem:[%s4271_s25 + $0x6d0] sm:$0xf]  ;;  %3343 = vst [vmem:[%s4276_s26 + $0x2dc] sm:$0xf] %v3342_v26  ;;  %3345 = vst [vmem:[%s4276_s26 + $0x338] sm:$0xf] %v3344_v27 }
  0xa2   : > { %3347 = vst [vmem:[%s4276_s26 + $0x394] sm:$0xf] %v3346_v28  ;;  %v3348_v29 = vld [vmem:[%s4271_s25 + $0x788] sm:$0xf]  ;;  %v3350_v30 = vld [vmem:[%s4271_s25 + $0x840] sm:$0xf] }
  0xa3   : > { %v3352_v31 = vld [vmem:[%s4271_s25 + $0x8f8] sm:$0xf]  ;;  %3349 = vst [vmem:[%s4276_s26 + $0x3f0] sm:$0xf] %v3348_v29  ;;  %3351 = vst [vmem:[%s4276_s26 + $0x44c] sm:$0xf] %v3350_v30 }
  0xa4   : > { %3353 = vst [vmem:[%s4276_s26 + $0x4a8] sm:$0xf] %v3352_v31  ;;  %v3354_v32 = vld [vmem:[%s4271_s25 + $0x9b0] sm:$0xf]  ;;  %v3356_v33 = vld [vmem:[%s4271_s25 + $0xa68] sm:$0xf] }
  0xa5   : > { %v3358_v34 = vld [vmem:[%s4271_s25 + $0xb20] sm:$0xf]  ;;  %3355 = vst [vmem:[%s4276_s26 + $0x504] sm:$0xf] %v3354_v32  ;;  %3357 = vst [vmem:[%s4276_s26 + $0x560] sm:$0xf] %v3356_v33 }
  0xa6   : > { %3359 = vst [vmem:[%s4276_s26 + $0x5bc] sm:$0xf] %v3358_v34  ;;  %v3360_v35 = vld [vmem:[%s4271_s25 + $0xbd8] sm:$0xf]  ;;  %v3362_v36 = vld [vmem:[%s4271_s25 + $0xc90] sm:$0xf] }
  0xa7   : > { %v3364_v37 = vld [vmem:[%s4271_s25 + $0xd48] sm:$0xf]  ;;  %3361 = vst [vmem:[%s4276_s26 + $0x618] sm:$0xf] %v3360_v35  ;;  %3363 = vst [vmem:[%s4276_s26 + $0x674] sm:$0xf] %v3362_v36 }
  0xa8   : > { %3365 = vst [vmem:[%s4276_s26 + $0x6d0] sm:$0xf] %v3364_v37  ;;  %v3366_v38 = vld [vmem:[%s4271_s25 + $0xe00] sm:$0xf]  ;;  %v3368_v39 = vld [vmem:[%s4271_s25 + $0xeb8] sm:$0xf] }
  0xa9   : > { %v3370_v40 = vld [vmem:[%s4271_s25 + $0xf70] sm:$0xf]  ;;  %3367 = vst [vmem:[%s4276_s26 + $0x72c] sm:$0xf] %v3366_v38  ;;  %3369 = vst [vmem:[%s4276_s26 + $0x788] sm:$0xf] %v3368_v39 }
  0xaa   : > { %3371 = vst [vmem:[%s4276_s26 + $0x7e4] sm:$0xf] %v3370_v40  ;;  %v3372_v41 = vld [vmem:[%s4271_s25 + $0x1028] sm:$0xf]  ;;  %v3374_v42 = vld [vmem:[%s4271_s25 + $0x10e0] sm:$0xf] }
  0xab   : > { %v3376_v43 = vld [vmem:[%s4271_s25 + $0x1198] sm:$0xf]  ;;  %3373 = vst [vmem:[%s4276_s26 + $0x840] sm:$0xf] %v3372_v41  ;;  %3375 = vst [vmem:[%s4276_s26 + $0x89c] sm:$0xf] %v3374_v42 }
  0xac   : > { %3377 = vst [vmem:[%s4276_s26 + $0x8f8] sm:$0xf] %v3376_v43 }
  0xad PF: > { %p3378_p5 = scmp.ge.s32.totalorder %s4214_s14, 1  ;;  %p763_p6 = scmp.lt.s32.totalorder %s4214_s14, 3 }
  0xaf   : > { %p764_p7 = pnand %p3378_p5, %p763_p6 }
  0xb0   : > { %s770_s27 = sand.u32 (!%p764_p7), 1, %s4206_s12   ;;  %v4881_v44 = vld [vmem:[%s5314_s0] sm:$0xff] (!%p764_p7)  ;;  %vm2564_vm0 = vcmask (!%p764_p7), 588800   ;;  %v4216_v60 = vmov (!%p764_p7), 0   ;;  %vm2568_vm1 = vcmask (!%p764_p7), 1043456   ;;  %s794_s7 = smul.u32 (!%p764_p7), 23, %s3323_s15 }
  0xb1   : > { %767 = sbr.rel (%p764_p7) target bundleno = 714 (0x2ca), region = 54  ;;  %v4885_v45 = vcombine.high (!%p764_p7), %v4881_v44, %v4881_v44  ;;  %3758 = vset.pattern.permute.xlu0 (!%p764_p7), %v4216_v60  ;;  %v4952_v41 = vcombine.low (!%p764_p7), %v4881_v44, %v4881_v44 }
  0xb2   : > { %s3732_s30 = smul.u32 (!%p764_p7), 2300, %s770_s27  ;;  %p795_p8 = scmp.lt.s32.totalorder (!%p764_p7), %s794_s7, 45 }
  0xb3   : > { %3682 = vmatprep.mubr.msk.bf16.mxu0 (!%p764_p7), %vm2564_vm0, %v4885_v45  ;;  %3684 = vmatprep.mubr.msk.bf16.mxu1 (!%p764_p7), %vm2564_vm0, %v4885_v45 }
  0xb4   : > { %s4891_s4 = scalar_lea.vmem (!%p764_p7), [#allocation2], %s3732_s30 }
  0xb5   : > { %v3759_v46 = vld [vmem:[%s4891_s4 + $0x4] ss:$92 sps:$4 sm:$0xff] (!%p764_p7)   ;;  %v3761_v47 = vld [vmem:[%s4891_s4 + $0xc] ss:$92 sps:$4 sm:$0xff] (!%p764_p7)   ;;  %v3765_v50 = vld [vmem:[%s4891_s4 + $0xbc] ss:$92 sps:$4 sm:$0xff] (!%p764_p7)  }
  0xb6   : > { %2638 = vmatprep.subr.bf16.mxu0 (!%p764_p7), %v3759_v46  ;;  %v3763_v48 = vld [vmem:[%s4891_s4] ss:$92 sps:$4 sm:$0xff] (!%p764_p7)   ;;  %v3764_v49 = vld [vmem:[%s4891_s4 + $0x8] ss:$92 sps:$4 sm:$0xff] (!%p764_p7)   ;;  %2679 = vmatprep.subr.bf16.mxu1 (!%p764_p7), %v3761_v47  ;;  %v3769_v52 = vld [vmem:[%s4891_s4 + $0xb8] ss:$92 sps:$4 sm:$0xff] (!%p764_p7)  }
  0xb7   : > { %2639 = vmatpush1.bf16.msra.mxu0 (!%p764_p7), %v3763_v48  ;;  %2680 = vmatpush1.bf16.msra.mxu1 (!%p764_p7), %v3764_v49  ;;  %v3767_v51 = vld [vmem:[%s4891_s4 + $0xc4] ss:$92 sps:$4 sm:$0xff] (!%p764_p7)   ;;  %v3771_v54 = vld [vmem:[%s4891_s4 + $0x174] ss:$92 sps:$4 sm:$0xff] (!%p764_p7)   ;;  %v3773_v55 = vld [vmem:[%s4891_s4 + $0x17c] ss:$92 sps:$4 sm:$0xff] (!%p764_p7)  }
  0xb8   : > { %2640 = vmatprep.subr.bf16.mxu0 %v3765_v50  ;;  %v3770_v53 = vld [vmem:[%s4891_s4 + $0xc0] ss:$92 sps:$4 sm:$0xff]   ;;  %2681 = vmatprep.subr.bf16.mxu1 %v3767_v51  ;;  %v3775_v56 = vld [vmem:[%s4891_s4 + $0x170] ss:$92 sps:$4 sm:$0xff]   ;;  %v3776_v57 = vld [vmem:[%s4891_s4 + $0x178] ss:$92 sps:$4 sm:$0xff]  }
  0xb9   : > { %v3777_v58 = vld [vmem:[%s4891_s4 + $0x22c] ss:$92 sps:$4 sm:$0xff]   ;;  %v3779_v59 = vld [vmem:[%s4891_s4 + $0x234] ss:$92 sps:$4 sm:$0xff]   ;;  %v3783_v63 = vld [vmem:[%s4891_s4 + $0x2e4] ss:$92 sps:$4 sm:$0xff]  }
  0xba   : > { %v3781_v61 = vld [vmem:[%s4891_s4 + $0x228] ss:$92 sps:$4 sm:$0xff]   ;;  %v3782_v62 = vld [vmem:[%s4891_s4 + $0x230] ss:$92 sps:$4 sm:$0xff]   ;;  %v3787_v1 = vld [vmem:[%s4891_s4 + $0x2e0] ss:$92 sps:$4 sm:$0xff]  }
  0xbb   : > { %2641 = vmatpush1.bf16.msra.mxu0 %v3769_v52  ;;  %2682 = vmatpush1.bf16.msra.mxu1 %v3770_v53  ;;  %v3785_v0 = vld [vmem:[%s4891_s4 + $0x2ec] ss:$92 sps:$4 sm:$0xff]   ;;  %v3789_v3 = vld [vmem:[%s4891_s4 + $0x39c] ss:$92 sps:$4 sm:$0xff]   ;;  %v3791_v4 = vld [vmem:[%s4891_s4 + $0x3a4] ss:$92 sps:$4 sm:$0xff]  }
  0xbc   : > { %2642 = vmatprep.subr.bf16.mxu0 %v3771_v54  ;;  %2683 = vmatprep.subr.bf16.mxu1 %v3773_v55  ;;  %v3788_v2 = vld [vmem:[%s4891_s4 + $0x2e8] ss:$92 sps:$4 sm:$0xff]   ;;  %v3793_v5 = vld [vmem:[%s4891_s4 + $0x398] ss:$92 sps:$4 sm:$0xff]   ;;  %v3794_v6 = vld [vmem:[%s4891_s4 + $0x3a0] ss:$92 sps:$4 sm:$0xff]  }
  0xbd   : > { %v3795_v7 = vld [vmem:[%s4891_s4 + $0x454] ss:$92 sps:$4 sm:$0xff]   ;;  %v3797_v8 = vld [vmem:[%s4891_s4 + $0x45c] ss:$92 sps:$4 sm:$0xff]   ;;  %v3801_v11 = vld [vmem:[%s4891_s4 + $0x50c] ss:$92 sps:$4 sm:$0xff]  }
  0xbe   : > { %v3799_v9 = vld [vmem:[%s4891_s4 + $0x450] ss:$92 sps:$4 sm:$0xff]   ;;  %v3800_v10 = vld [vmem:[%s4891_s4 + $0x458] ss:$92 sps:$4 sm:$0xff]   ;;  %v3805_v13 = vld [vmem:[%s4891_s4 + $0x508] ss:$92 sps:$4 sm:$0xff]  }
  0xbf   : > { %2643 = vmatpush1.bf16.msra.mxu0 %v3775_v56  ;;  %2684 = vmatpush1.bf16.msra.mxu1 %v3776_v57  ;;  %v3803_v12 = vld [vmem:[%s4891_s4 + $0x514] ss:$92 sps:$4 sm:$0xff]   ;;  %v3807_v15 = vld [vmem:[%s4891_s4 + $0x5c4] ss:$92 sps:$4 sm:$0xff]   ;;  %v3809_v16 = vld [vmem:[%s4891_s4 + $0x5cc] ss:$92 sps:$4 sm:$0xff]  }
  0xc0   : > { %2644 = vmatprep.subr.bf16.mxu0 %v3777_v58  ;;  %2685 = vmatprep.subr.bf16.mxu1 %v3779_v59  ;;  %v3806_v14 = vld [vmem:[%s4891_s4 + $0x510] ss:$92 sps:$4 sm:$0xff]   ;;  %v3811_v17 = vld [vmem:[%s4891_s4 + $0x5c0] ss:$92 sps:$4 sm:$0xff]   ;;  %v3812_v18 = vld [vmem:[%s4891_s4 + $0x5c8] ss:$92 sps:$4 sm:$0xff]  }
  0xc1   : > { %v3813_v19 = vld [vmem:[%s4891_s4 + $0x67c] ss:$92 sps:$4 sm:$0xff]   ;;  %v3815_v20 = vld [vmem:[%s4891_s4 + $0x684] ss:$92 sps:$4 sm:$0xff]   ;;  %v3819_v23 = vld [vmem:[%s4891_s4 + $0x734] ss:$92 sps:$4 sm:$0xff]  }
  0xc2   : > { %v3817_v21 = vld [vmem:[%s4891_s4 + $0x678] ss:$92 sps:$4 sm:$0xff]   ;;  %v3818_v22 = vld [vmem:[%s4891_s4 + $0x680] ss:$92 sps:$4 sm:$0xff]   ;;  %v3823_v25 = vld [vmem:[%s4891_s4 + $0x730] ss:$92 sps:$4 sm:$0xff]  }
  0xc3   : > { %2645 = vmatpush1.bf16.msra.mxu0 %v3781_v61  ;;  %2686 = vmatpush1.bf16.msra.mxu1 %v3782_v62  ;;  %v3821_v24 = vld [vmem:[%s4891_s4 + $0x73c] ss:$92 sps:$4 sm:$0xff]   ;;  %v3825_v27 = vld [vmem:[%s4891_s4 + $0x7ec] ss:$92 sps:$4 sm:$0xff]   ;;  %v3827_v28 = vld [vmem:[%s4891_s4 + $0x7f4] ss:$92 sps:$4 sm:$0xff]  }
  0xc4   : > { %2646 = vmatprep.subr.bf16.mxu0 %v3783_v63  ;;  %2687 = vmatprep.subr.bf16.mxu1 %v3785_v0  ;;  %v3824_v26 = vld [vmem:[%s4891_s4 + $0x738] ss:$92 sps:$4 sm:$0xff]   ;;  %v1090_v29 = vld [vmem:[%s4891_s4 + $0x8a0] sm:$0xff]  ;;  %v1091_v30 = vld [vmem:[%s4891_s4 + $0x8a8] sm:$0xff]  ;;  %s5322_s7 = smov (!%p795_p8, %s794_s7), 45 }
  0xc5   : > { %v3829_v31 = vld [vmem:[%s4891_s4 + $0x7e8] ss:$92 sps:$4 sm:$0xff]   ;;  %v3830_v32 = vld [vmem:[%s4891_s4 + $0x7f0] ss:$92 sps:$4 sm:$0xff]   ;;  %v3659_v33 = vcombine.high %v1090_v29, %v1090_v29  ;;  %v3661_v34 = vcombine.high %v1091_v30, %v1091_v30  ;;  %v3658_v35 = vcombine.low %v1090_v29, %v1090_v29  ;;  %v3660_v36 = vcombine.low %v1091_v30, %v1091_v30  ;;  %v3842_v40 = vld [vmem:[%s4891_s4 + $0x1c] ss:$92 sps:$4 sm:$0xff]  }
  0xc6   : > { %v3839_v37 = vld [vmem:[%s4891_s4 + $0x14] ss:$92 sps:$4 sm:$0xff]   ;;  %v3845_v46 = vld [vmem:[%s4891_s4 + $0xcc] ss:$92 sps:$4 sm:$0xff]   ;;  %v3851_v49 = vld [vmem:[%s4891_s4 + $0x184] ss:$92 sps:$4 sm:$0xff]  }
  0xc7   : > { %2647 = vmatpush1.bf16.msra.mxu0 %v3787_v1  ;;  %2688 = vmatpush1.bf16.msra.mxu1 %v3788_v2  ;;  %v2570_v38 = vsel %vm2568_vm1, %v3658_v35, 0  ;;  %v2576_v39 = vsel %vm2568_vm1, %v3660_v36, 0  ;;  %v3837_v42 = vld [vmem:[%s4891_s4 + $0x10] ss:$92 sps:$4 sm:$0xff]   ;;  %v3840_v43 = vld [vmem:[%s4891_s4 + $0x18] ss:$92 sps:$4 sm:$0xff]  }
  0xc8   : > { %2648 = vmatprep.subr.bf16.mxu0 %v3789_v3  ;;  %2689 = vmatprep.subr.bf16.mxu1 %v3791_v4  ;;  %v3848_v47 = vld [vmem:[%s4891_s4 + $0xd4] ss:$92 sps:$4 sm:$0xff]   ;;  %v3843_v44 = vld [vmem:[%s4891_s4 + $0xc8] ss:$92 sps:$4 sm:$0xff]   ;;  %v3849_v51 = vld [vmem:[%s4891_s4 + $0x180] ss:$92 sps:$4 sm:$0xff]  }
  0xc9   : > { %v3846_v48 = vld [vmem:[%s4891_s4 + $0xd0] ss:$92 sps:$4 sm:$0xff]   ;;  %v3852_v52 = vld [vmem:[%s4891_s4 + $0x188] ss:$92 sps:$4 sm:$0xff]   ;;  %v3857_v53 = vld [vmem:[%s4891_s4 + $0x23c] ss:$92 sps:$4 sm:$0xff]  }
  0xca   : > { %v3854_v50 = vld [vmem:[%s4891_s4 + $0x18c] ss:$92 sps:$4 sm:$0xff]   ;;  %v3860_v54 = vld [vmem:[%s4891_s4 + $0x244] ss:$92 sps:$4 sm:$0xff]   ;;  %v3855_v55 = vld [vmem:[%s4891_s4 + $0x238] ss:$92 sps:$4 sm:$0xff]  }
  0xcb   : > { %2649 = vmatpush1.bf16.msra.mxu0 %v3793_v5  ;;  %2690 = vmatpush1.bf16.msra.mxu1 %v3794_v6  ;;  %v3858_v56 = vld [vmem:[%s4891_s4 + $0x240] ss:$92 sps:$4 sm:$0xff]   ;;  %v3863_v57 = vld [vmem:[%s4891_s4 + $0x2f4] ss:$92 sps:$4 sm:$0xff]   ;;  %v3869_v62 = vld [vmem:[%s4891_s4 + $0x3ac] ss:$92 sps:$4 sm:$0xff]  }
  0xcc   : > { %2650 = vmatprep.subr.bf16.mxu0 %v3795_v7  ;;  %2691 = vmatprep.subr.bf16.mxu1 %v3797_v8  ;;  %v3866_v58 = vld [vmem:[%s4891_s4 + $0x2fc] ss:$92 sps:$4 sm:$0xff]   ;;  %v3861_v59 = vld [vmem:[%s4891_s4 + $0x2f0] ss:$92 sps:$4 sm:$0xff]   ;;  %v3867_v0 = vld [vmem:[%s4891_s4 + $0x3a8] ss:$92 sps:$4 sm:$0xff]  }
  0xcd   : > { %v3864_v61 = vld [vmem:[%s4891_s4 + $0x2f8] ss:$92 sps:$4 sm:$0xff]   ;;  %v3870_v1 = vld [vmem:[%s4891_s4 + $0x3b0] ss:$92 sps:$4 sm:$0xff]   ;;  %v3875_v2 = vld [vmem:[%s4891_s4 + $0x464] ss:$92 sps:$4 sm:$0xff]  }
  0xce   : > { %v3872_v63 = vld [vmem:[%s4891_s4 + $0x3b4] ss:$92 sps:$4 sm:$0xff]   ;;  %v3878_v3 = vld [vmem:[%s4891_s4 + $0x46c] ss:$92 sps:$4 sm:$0xff]   ;;  %v3873_v4 = vld [vmem:[%s4891_s4 + $0x460] ss:$92 sps:$4 sm:$0xff]  }
  0xcf   : > { %2651 = vmatpush1.bf16.msra.mxu0 %v3799_v9  ;;  %2692 = vmatpush1.bf16.msra.mxu1 %v3800_v10  ;;  %v3876_v5 = vld [vmem:[%s4891_s4 + $0x468] ss:$92 sps:$4 sm:$0xff]   ;;  %v3881_v6 = vld [vmem:[%s4891_s4 + $0x51c] ss:$92 sps:$4 sm:$0xff]   ;;  %v3887_v10 = vld [vmem:[%s4891_s4 + $0x5d4] ss:$92 sps:$4 sm:$0xff]  }
  0xd0   : > { %2652 = vmatprep.subr.bf16.mxu0 %v3801_v11  ;;  %2693 = vmatprep.subr.bf16.mxu1 %v3803_v12  ;;  %v3884_v7 = vld [vmem:[%s4891_s4 + $0x524] ss:$92 sps:$4 sm:$0xff]   ;;  %v3879_v8 = vld [vmem:[%s4891_s4 + $0x518] ss:$92 sps:$4 sm:$0xff]   ;;  %v3885_v12 = vld [vmem:[%s4891_s4 + $0x5d0] ss:$92 sps:$4 sm:$0xff]  }
  0xd1   : > { %v3882_v9 = vld [vmem:[%s4891_s4 + $0x520] ss:$92 sps:$4 sm:$0xff]   ;;  %v3918_v36 = vld [vmem:[%s4891_s4 + $0x2c] ss:$92 sps:$4 sm:$0xff]   ;;  %s3379_s8 = sshll.u32 %s5322_s7, 2 }
  0xd2   : > { %v3890_v11 = vld [vmem:[%s4891_s4 + $0x5dc] ss:$92 sps:$4 sm:$0xff]   ;;  %s5228_s11 = scalar_lea.vmem %s5317_s3, %s3379_s8 }
  0xd3   : > { %2653 = vmatpush1.bf16.msra.mxu0 %v3805_v13  ;;  %2694 = vmatpush1.bf16.msra.mxu1 %v3806_v14  ;;  %v3888_v13 = vld [vmem:[%s4891_s4 + $0x5d8] ss:$92 sps:$4 sm:$0xff]   ;;  %v3893_v14 = vld [vmem:[%s4891_s4 + $0x68c] ss:$92 sps:$4 sm:$0xff]  }
  0xd4   : > { %2654 = vmatprep.subr.bf16.mxu0 %v3807_v15  ;;  %2695 = vmatprep.subr.bf16.mxu1 %v3809_v16  ;;  %v3896_v15 = vld [vmem:[%s4891_s4 + $0x694] ss:$92 sps:$4 sm:$0xff]   ;;  %v3891_v16 = vld [vmem:[%s4891_s4 + $0x688] ss:$92 sps:$4 sm:$0xff]  }
  0xd7   : > { %2655 = vmatpush1.bf16.msra.mxu0 %v3811_v17  ;;  %2696 = vmatpush1.bf16.msra.mxu1 %v3812_v18  ;;  %v3894_v17 = vld [vmem:[%s4891_s4 + $0x690] ss:$92 sps:$4 sm:$0xff]   ;;  %v3899_v18 = vld [vmem:[%s4891_s4 + $0x744] ss:$92 sps:$4 sm:$0xff]  }
  0xd8   : > { %2656 = vmatprep.subr.bf16.mxu0 %v3813_v19  ;;  %2697 = vmatprep.subr.bf16.mxu1 %v3815_v20  ;;  %v3902_v19 = vld [vmem:[%s4891_s4 + $0x74c] ss:$92 sps:$4 sm:$0xff]  }
  0xd9   : > { %v1102_v20 = vld [vmem:[%s5315_s1] sm:$0xff] }
  0xda   : > { %1105 = vperm.xlu0 %3758, %v1102_v20   ;;  %v1094_v20 = vld [vmem:[%s4891_s4 + $0x8c0] sm:$0xff] }
  0xdb   : > { %2657 = vmatpush1.bf16.msra.mxu0 %v3817_v21  ;;  %2698 = vmatpush1.bf16.msra.mxu1 %v3818_v22  ;;  %v3897_v21 = vld [vmem:[%s4891_s4 + $0x740] ss:$92 sps:$4 sm:$0xff]   ;;  %v3900_v22 = vld [vmem:[%s4891_s4 + $0x748] ss:$92 sps:$4 sm:$0xff]  }
  0xdc   : > { %2658 = vmatprep.subr.bf16.mxu0 %v3819_v23  ;;  %2699 = vmatprep.subr.bf16.mxu1 %v3821_v24  ;;  %v3905_v23 = vld [vmem:[%s4891_s4 + $0x7fc] ss:$92 sps:$4 sm:$0xff]   ;;  %v3908_v24 = vld [vmem:[%s4891_s4 + $0x804] ss:$92 sps:$4 sm:$0xff]  }
  0xdf   : > { %2659 = vmatpush1.bf16.msra.mxu0 %v3823_v25  ;;  %2700 = vmatpush1.bf16.msra.mxu1 %v3824_v26  ;;  %v1092_v25 = vld [vmem:[%s4891_s4 + $0x8b0] sm:$0xff]  ;;  %v1093_v26 = vld [vmem:[%s4891_s4 + $0x8b8] sm:$0xff] }
  0xe0   : > { %2660 = vmatprep.subr.bf16.mxu0 %v3825_v27  ;;  %2701 = vmatprep.subr.bf16.mxu1 %v3827_v28  ;;  %v3903_v27 = vld [vmem:[%s4891_s4 + $0x7f8] ss:$92 sps:$4 sm:$0xff]   ;;  %v3906_v28 = vld [vmem:[%s4891_s4 + $0x800] ss:$92 sps:$4 sm:$0xff]   ;;  %v3663_v29 = vcombine.high %v1092_v25, %v1092_v25  ;;  %v3665_v30 = vcombine.high %v1093_v26, %v1093_v26 }
  0xe3   : > { %2661 = vmatpush1.bf16.msra.mxu0 %v3829_v31  ;;  %2702 = vmatpush1.bf16.msra.mxu1 %v3830_v32  ;;  %v3662_v31 = vcombine.low %v1092_v25, %v1092_v25  ;;  %v3664_v32 = vcombine.low %v1093_v26, %v1093_v26  ;;  %v3666_v26 = vcombine.low %v1094_v20, %v1094_v20 }
  0xe4   : > { %3681 = vmatprep.subr.msk.bf16.mxu0 %vm2568_vm1, %v3659_v33  ;;  %3683 = vmatprep.subr.msk.bf16.mxu1 %vm2568_vm1, %v3661_v34  ;;  %v3915_v33 = vld [vmem:[%s4891_s4 + $0x24] ss:$92 sps:$4 sm:$0xff]  }
  0xe5   : > { %v2582_v34 = vsel %vm2568_vm1, %v3662_v31, 0  ;;  %v2588_v35 = vsel %vm2568_vm1, %v3664_v32, 0  ;;  %v3994_v31 = vld [vmem:[%s4891_s4 + $0x3c] ss:$92 sps:$4 sm:$0xff]   ;;  %v3989_v32 = vld [vmem:[%s4891_s4 + $0x30] ss:$92 sps:$4 sm:$0xff]  }
  0xe7   : > { %2663 = vmatpush1.bf16.msra.mxu0 %v2570_v38  ;;  %2704 = vmatpush1.bf16.msra.mxu1 %v2576_v39  ;;  %v3916_v38 = vld [vmem:[%s4891_s4 + $0x28] ss:$92 sps:$4 sm:$0xff]   ;;  %v3921_v39 = vld [vmem:[%s4891_s4 + $0xdc] ss:$92 sps:$4 sm:$0xff]  }
  0xe8   : > { %2720 = vmatprep.subr.bf16.mxu0 %v3839_v37  ;;  %2761 = vmatprep.subr.bf16.mxu1 %v3842_v40  ;;  %v3913_v37 = vld [vmem:[%s4891_s4 + $0x20] ss:$92 sps:$4 sm:$0xff]  }
  0xe9   : > { %v3924_v40 = vld [vmem:[%s4891_s4 + $0xe4] ss:$92 sps:$4 sm:$0xff]  }
  0xea   : > { %2671 = vmatmul.mubr.bf16.vlgmr.msra.gmra.mrb[0].mxu0 %v4952_v41  ;;  %2712 = vmatmul.mubr.bf16.vlgmr.msra.gmra.mrb[0].mxu1 %v4952_v41 }
  0xeb   : > { %2721 = vmatpush1.bf16.msra.mxu0 %v3837_v42  ;;  %2762 = vmatpush1.bf16.msra.mxu1 %v3840_v43  ;;  %v3919_v42 = vld [vmem:[%s4891_s4 + $0xd8] ss:$92 sps:$4 sm:$0xff]   ;;  %v3922_v43 = vld [vmem:[%s4891_s4 + $0xe0] ss:$92 sps:$4 sm:$0xff]  }
  0xec   : > { %2722 = vmatprep.subr.bf16.mxu0 %v3845_v46  ;;  %2763 = vmatprep.subr.bf16.mxu1 %v3848_v47  ;;  %v3927_v46 = vld [vmem:[%s4891_s4 + $0x194] ss:$92 sps:$4 sm:$0xff]   ;;  %v3930_v47 = vld [vmem:[%s4891_s4 + $0x19c] ss:$92 sps:$4 sm:$0xff]  }
  0xed   : > { %3686 = vmatprep.mubr.msk.bf16.mxu0 %vm2564_vm0, %v4885_v45  ;;  %3688 = vmatprep.mubr.msk.bf16.mxu1 %vm2564_vm0, %v4885_v45 }
  0xef   : > { %2723 = vmatpush1.bf16.msra.mxu0 %v3843_v44  ;;  %2764 = vmatpush1.bf16.msra.mxu1 %v3846_v48  ;;  %v3925_v44 = vld [vmem:[%s4891_s4 + $0x190] ss:$92 sps:$4 sm:$0xff]   ;;  %v3928_v48 = vld [vmem:[%s4891_s4 + $0x198] ss:$92 sps:$4 sm:$0xff]  }
  0xf0   : > { %2724 = vmatprep.subr.bf16.mxu0 %v3851_v49  ;;  %2765 = vmatprep.subr.bf16.mxu1 %v3854_v50  ;;  %v3933_v49 = vld [vmem:[%s4891_s4 + $0x24c] ss:$92 sps:$4 sm:$0xff]   ;;  %v3936_v50 = vld [vmem:[%s4891_s4 + $0x254] ss:$92 sps:$4 sm:$0xff]  }
  0xf3   : > { %2725 = vmatpush1.bf16.msra.mxu0 %v3849_v51  ;;  %2766 = vmatpush1.bf16.msra.mxu1 %v3852_v52  ;;  %v3931_v51 = vld [vmem:[%s4891_s4 + $0x248] ss:$92 sps:$4 sm:$0xff]   ;;  %v3934_v52 = vld [vmem:[%s4891_s4 + $0x250] ss:$92 sps:$4 sm:$0xff]  }
  0xf4   : > { %2726 = vmatprep.subr.bf16.mxu0 %v3857_v53  ;;  %2767 = vmatprep.subr.bf16.mxu1 %v3860_v54  ;;  %v3939_v53 = vld [vmem:[%s4891_s4 + $0x304] ss:$92 sps:$4 sm:$0xff]   ;;  %v3942_v54 = vld [vmem:[%s4891_s4 + $0x30c] ss:$92 sps:$4 sm:$0xff]  }
  0xf7   : > { %2727 = vmatpush1.bf16.msra.mxu0 %v3855_v55  ;;  %2768 = vmatpush1.bf16.msra.mxu1 %v3858_v56  ;;  %v3937_v55 = vld [vmem:[%s4891_s4 + $0x300] ss:$92 sps:$4 sm:$0xff]   ;;  %v3940_v56 = vld [vmem:[%s4891_s4 + $0x308] ss:$92 sps:$4 sm:$0xff]  }
  0xf8   : > { %2728 = vmatprep.subr.bf16.mxu0 %v3863_v57  ;;  %2769 = vmatprep.subr.bf16.mxu1 %v3866_v58  ;;  %v3945_v57 = vld [vmem:[%s4891_s4 + $0x3bc] ss:$92 sps:$4 sm:$0xff]   ;;  %v3948_v58 = vld [vmem:[%s4891_s4 + $0x3c4] ss:$92 sps:$4 sm:$0xff]  }
  0xfb   : > { %2729 = vmatpush1.bf16.msra.mxu0 %v3861_v59  ;;  %2770 = vmatpush1.bf16.msra.mxu1 %v3864_v61  ;;  %v3943_v59 = vld [vmem:[%s4891_s4 + $0x3b8] ss:$92 sps:$4 sm:$0xff]   ;;  %v3946_v61 = vld [vmem:[%s4891_s4 + $0x3c0] ss:$92 sps:$4 sm:$0xff]  }
  0xfc   : > { %2730 = vmatprep.subr.bf16.mxu0 %v3869_v62  ;;  %2771 = vmatprep.subr.bf16.mxu1 %v3872_v63  ;;  %v3951_v62 = vld [vmem:[%s4891_s4 + $0x474] ss:$92 sps:$4 sm:$0xff]   ;;  %v3954_v63 = vld [vmem:[%s4891_s4 + $0x47c] ss:$92 sps:$4 sm:$0xff]  }
  0xff   : > { %2731 = vmatpush1.bf16.msra.mxu0 %v3867_v0  ;;  %2772 = vmatpush1.bf16.msra.mxu1 %v3870_v1  ;;  %v3949_v0 = vld [vmem:[%s4891_s4 + $0x470] ss:$92 sps:$4 sm:$0xff]   ;;  %v3952_v1 = vld [vmem:[%s4891_s4 + $0x478] ss:$92 sps:$4 sm:$0xff]  }
 0x100   : > { %2732 = vmatprep.subr.bf16.mxu0 %v3875_v2  ;;  %2773 = vmatprep.subr.bf16.mxu1 %v3878_v3  ;;  %v3957_v2 = vld [vmem:[%s4891_s4 + $0x52c] ss:$92 sps:$4 sm:$0xff]   ;;  %v3960_v3 = vld [vmem:[%s4891_s4 + $0x534] ss:$92 sps:$4 sm:$0xff]  }
 0x103   : > { %2733 = vmatpush1.bf16.msra.mxu0 %v3873_v4  ;;  %2774 = vmatpush1.bf16.msra.mxu1 %v3876_v5  ;;  %v3955_v4 = vld [vmem:[%s4891_s4 + $0x528] ss:$92 sps:$4 sm:$0xff]   ;;  %v3958_v5 = vld [vmem:[%s4891_s4 + $0x530] ss:$92 sps:$4 sm:$0xff]  }
 0x104   : > { %2734 = vmatprep.subr.bf16.mxu0 %v3881_v6  ;;  %2775 = vmatprep.subr.bf16.mxu1 %v3884_v7  ;;  %v3963_v6 = vld [vmem:[%s4891_s4 + $0x5e4] ss:$92 sps:$4 sm:$0xff]   ;;  %v3966_v7 = vld [vmem:[%s4891_s4 + $0x5ec] ss:$92 sps:$4 sm:$0xff]  }
 0x107   : > { %2735 = vmatpush1.bf16.msra.mxu0 %v3879_v8  ;;  %2776 = vmatpush1.bf16.msra.mxu1 %v3882_v9  ;;  %v3961_v8 = vld [vmem:[%s4891_s4 + $0x5e0] ss:$92 sps:$4 sm:$0xff]   ;;  %v3964_v9 = vld [vmem:[%s4891_s4 + $0x5e8] ss:$92 sps:$4 sm:$0xff]  }
 0x108   : > { %2736 = vmatprep.subr.bf16.mxu0 %v3887_v10  ;;  %2777 = vmatprep.subr.bf16.mxu1 %v3890_v11  ;;  %v3969_v10 = vld [vmem:[%s4891_s4 + $0x69c] ss:$92 sps:$4 sm:$0xff]   ;;  %v3972_v11 = vld [vmem:[%s4891_s4 + $0x6a4] ss:$92 sps:$4 sm:$0xff]  }
 0x10b   : > { %2737 = vmatpush1.bf16.msra.mxu0 %v3885_v12  ;;  %2778 = vmatpush1.bf16.msra.mxu1 %v3888_v13  ;;  %v3967_v12 = vld [vmem:[%s4891_s4 + $0x698] ss:$92 sps:$4 sm:$0xff]   ;;  %v3970_v13 = vld [vmem:[%s4891_s4 + $0x6a0] ss:$92 sps:$4 sm:$0xff]  }
 0x10c   : > { %2738 = vmatprep.subr.bf16.mxu0 %v3893_v14  ;;  %2779 = vmatprep.subr.bf16.mxu1 %v3896_v15  ;;  %v3975_v14 = vld [vmem:[%s4891_s4 + $0x754] ss:$92 sps:$4 sm:$0xff]   ;;  %v3978_v15 = vld [vmem:[%s4891_s4 + $0x75c] ss:$92 sps:$4 sm:$0xff]  }
 0x10f   : > { %2739 = vmatpush1.bf16.msra.mxu0 %v3891_v16  ;;  %2780 = vmatpush1.bf16.msra.mxu1 %v3894_v17  ;;  %v3973_v16 = vld [vmem:[%s4891_s4 + $0x750] ss:$92 sps:$4 sm:$0xff]   ;;  %v3976_v17 = vld [vmem:[%s4891_s4 + $0x758] ss:$92 sps:$4 sm:$0xff]  }
 0x110   : > { %2740 = vmatprep.subr.bf16.mxu0 %v3899_v18  ;;  %2781 = vmatprep.subr.bf16.mxu1 %v3902_v19  ;;  %v3981_v18 = vld [vmem:[%s4891_s4 + $0x80c] ss:$92 sps:$4 sm:$0xff]   ;;  %v3984_v19 = vld [vmem:[%s4891_s4 + $0x814] ss:$92 sps:$4 sm:$0xff]  }
 0x113   : > { %2741 = vmatpush1.bf16.msra.mxu0 %v3897_v21  ;;  %2782 = vmatpush1.bf16.msra.mxu1 %v3900_v22  ;;  %v1095_v21 = vld [vmem:[%s4891_s4 + $0x8c8] sm:$0xff] }
 0x114   : > { %2742 = vmatprep.subr.bf16.mxu0 %v3905_v23  ;;  %2783 = vmatprep.subr.bf16.mxu1 %v3908_v24  ;;  %v3979_v22 = vld [vmem:[%s4891_s4 + $0x808] ss:$92 sps:$4 sm:$0xff]   ;;  %v3982_v23 = vld [vmem:[%s4891_s4 + $0x810] ss:$92 sps:$4 sm:$0xff]   ;;  %v3667_v24 = vcombine.high %v1094_v20, %v1094_v20  ;;  %v3669_v25 = vcombine.high %v1095_v21, %v1095_v21 }
 0x117   : > { %2743 = vmatpush1.bf16.msra.mxu0 %v3903_v27  ;;  %2784 = vmatpush1.bf16.msra.mxu1 %v3906_v28  ;;  %v3668_v27 = vcombine.low %v1095_v21, %v1095_v21  ;;  %v3991_v28 = vld [vmem:[%s4891_s4 + $0x34] ss:$92 sps:$4 sm:$0xff]  }
 0x118   : > { %3685 = vmatprep.subr.msk.bf16.mxu0 %vm2568_vm1, %v3663_v29  ;;  %3687 = vmatprep.subr.msk.bf16.mxu1 %vm2568_vm1, %v3665_v30  ;;  %v2594_v29 = vsel %vm2568_vm1, %v3666_v26, 0  ;;  %v4070_v26 = vld [vmem:[%s4891_s4 + $0x4c] ss:$92 sps:$4 sm:$0xff]  }
 0x119   : > { %v2600_v30 = vsel %vm2568_vm1, %v3668_v27, 0  ;;  %v4065_v27 = vld [vmem:[%s4891_s4 + $0x40] ss:$92 sps:$4 sm:$0xff]  }
 0x11b   : > { %2745 = vmatpush1.bf16.msra.mxu0 %v2582_v34  ;;  %2786 = vmatpush1.bf16.msra.mxu1 %v2588_v35  ;;  %v3997_v34 = vld [vmem:[%s4891_s4 + $0xec] ss:$92 sps:$4 sm:$0xff]   ;;  %v4000_v35 = vld [vmem:[%s4891_s4 + $0xf4] ss:$92 sps:$4 sm:$0xff]  }
 0x11c   : > { %2802 = vmatprep.subr.bf16.mxu0 %v3915_v33  ;;  %2843 = vmatprep.subr.bf16.mxu1 %v3918_v36  ;;  %v3992_v33 = vld [vmem:[%s4891_s4 + $0x38] ss:$92 sps:$4 sm:$0xff]   ;;  %v3995_v36 = vld [vmem:[%s4891_s4 + $0xe8] ss:$92 sps:$4 sm:$0xff]  }
 0x11e   : > { %2753 = vmatmul.mubr.bf16.vlgmr.msra.gmra.mrb[4].mxu0 %v4952_v41  ;;  %2794 = vmatmul.mubr.bf16.vlgmr.msra.gmra.mrb[4].mxu1 %v4952_v41 }
 0x11f   : > { %2803 = vmatpush1.bf16.msra.mxu0 %v3913_v37  ;;  %2844 = vmatpush1.bf16.msra.mxu1 %v3916_v38  ;;  %v3998_v37 = vld [vmem:[%s4891_s4 + $0xf0] ss:$92 sps:$4 sm:$0xff]   ;;  %v4003_v38 = vld [vmem:[%s4891_s4 + $0x1a4] ss:$92 sps:$4 sm:$0xff]  }
 0x120   : > { %2804 = vmatprep.subr.bf16.mxu0 %v3921_v39  ;;  %2845 = vmatprep.subr.bf16.mxu1 %v3924_v40  ;;  %v4006_v39 = vld [vmem:[%s4891_s4 + $0x1ac] ss:$92 sps:$4 sm:$0xff]   ;;  %v4001_v40 = vld [vmem:[%s4891_s4 + $0x1a0] ss:$92 sps:$4 sm:$0xff]  }
 0x121   : > { %3690 = vmatprep.mubr.msk.bf16.mxu0 %vm2564_vm0, %v4885_v45  ;;  %3692 = vmatprep.mubr.msk.bf16.mxu1 %vm2564_vm0, %v4885_v45 }
 0x123   : > { %2805 = vmatpush1.bf16.msra.mxu0 %v3919_v42  ;;  %2846 = vmatpush1.bf16.msra.mxu1 %v3922_v43  ;;  %v4004_v42 = vld [vmem:[%s4891_s4 + $0x1a8] ss:$92 sps:$4 sm:$0xff]   ;;  %v4009_v43 = vld [vmem:[%s4891_s4 + $0x25c] ss:$92 sps:$4 sm:$0xff]  }
 0x124   : > { %2806 = vmatprep.subr.bf16.mxu0 %v3927_v46  ;;  %2847 = vmatprep.subr.bf16.mxu1 %v3930_v47  ;;  %v4012_v46 = vld [vmem:[%s4891_s4 + $0x264] ss:$92 sps:$4 sm:$0xff]   ;;  %v4007_v47 = vld [vmem:[%s4891_s4 + $0x258] ss:$92 sps:$4 sm:$0xff]  }
 0x127   : > { %2807 = vmatpush1.bf16.msra.mxu0 %v3925_v44  ;;  %2848 = vmatpush1.bf16.msra.mxu1 %v3928_v48  ;;  %v4010_v44 = vld [vmem:[%s4891_s4 + $0x260] ss:$92 sps:$4 sm:$0xff]   ;;  %v4015_v48 = vld [vmem:[%s4891_s4 + $0x314] ss:$92 sps:$4 sm:$0xff]  }
 0x128   : > { %2808 = vmatprep.subr.bf16.mxu0 %v3933_v49  ;;  %2849 = vmatprep.subr.bf16.mxu1 %v3936_v50  ;;  %v4018_v49 = vld [vmem:[%s4891_s4 + $0x31c] ss:$92 sps:$4 sm:$0xff]   ;;  %v4013_v50 = vld [vmem:[%s4891_s4 + $0x310] ss:$92 sps:$4 sm:$0xff]  }
 0x12b   : > { %2809 = vmatpush1.bf16.msra.mxu0 %v3931_v51  ;;  %2850 = vmatpush1.bf16.msra.mxu1 %v3934_v52  ;;  %v4016_v51 = vld [vmem:[%s4891_s4 + $0x318] ss:$92 sps:$4 sm:$0xff]   ;;  %v4021_v52 = vld [vmem:[%s4891_s4 + $0x3cc] ss:$92 sps:$4 sm:$0xff]  }
 0x12c   : > { %2810 = vmatprep.subr.bf16.mxu0 %v3939_v53  ;;  %2851 = vmatprep.subr.bf16.mxu1 %v3942_v54  ;;  %v4024_v53 = vld [vmem:[%s4891_s4 + $0x3d4] ss:$92 sps:$4 sm:$0xff]   ;;  %v4019_v54 = vld [vmem:[%s4891_s4 + $0x3c8] ss:$92 sps:$4 sm:$0xff]  }
 0x12f   : > { %2811 = vmatpush1.bf16.msra.mxu0 %v3937_v55  ;;  %2852 = vmatpush1.bf16.msra.mxu1 %v3940_v56  ;;  %v4022_v55 = vld [vmem:[%s4891_s4 + $0x3d0] ss:$92 sps:$4 sm:$0xff]   ;;  %v4027_v56 = vld [vmem:[%s4891_s4 + $0x484] ss:$92 sps:$4 sm:$0xff]  }
 0x130   : > { %2812 = vmatprep.subr.bf16.mxu0 %v3945_v57  ;;  %2853 = vmatprep.subr.bf16.mxu1 %v3948_v58  ;;  %v4030_v57 = vld [vmem:[%s4891_s4 + $0x48c] ss:$92 sps:$4 sm:$0xff]   ;;  %v4025_v58 = vld [vmem:[%s4891_s4 + $0x480] ss:$92 sps:$4 sm:$0xff]  }
 0x133   : > { %2813 = vmatpush1.bf16.msra.mxu0 %v3943_v59  ;;  %2854 = vmatpush1.bf16.msra.mxu1 %v3946_v61  ;;  %v4028_v59 = vld [vmem:[%s4891_s4 + $0x488] ss:$92 sps:$4 sm:$0xff]   ;;  %v4033_v61 = vld [vmem:[%s4891_s4 + $0x53c] ss:$92 sps:$4 sm:$0xff]  }
 0x134   : > { %2814 = vmatprep.subr.bf16.mxu0 %v3951_v62  ;;  %2855 = vmatprep.subr.bf16.mxu1 %v3954_v63  ;;  %v4036_v62 = vld [vmem:[%s4891_s4 + $0x544] ss:$92 sps:$4 sm:$0xff]   ;;  %v4031_v63 = vld [vmem:[%s4891_s4 + $0x538] ss:$92 sps:$4 sm:$0xff]  }
 0x137   : > { %2815 = vmatpush1.bf16.msra.mxu0 %v3949_v0  ;;  %2856 = vmatpush1.bf16.msra.mxu1 %v3952_v1  ;;  %v4034_v0 = vld [vmem:[%s4891_s4 + $0x540] ss:$92 sps:$4 sm:$0xff]   ;;  %v4039_v1 = vld [vmem:[%s4891_s4 + $0x5f4] ss:$92 sps:$4 sm:$0xff]  }
 0x138   : > { %2816 = vmatprep.subr.bf16.mxu0 %v3957_v2  ;;  %2857 = vmatprep.subr.bf16.mxu1 %v3960_v3  ;;  %v4042_v2 = vld [vmem:[%s4891_s4 + $0x5fc] ss:$92 sps:$4 sm:$0xff]   ;;  %v4037_v3 = vld [vmem:[%s4891_s4 + $0x5f0] ss:$92 sps:$4 sm:$0xff]  }
 0x13b   : > { %2817 = vmatpush1.bf16.msra.mxu0 %v3955_v4  ;;  %2858 = vmatpush1.bf16.msra.mxu1 %v3958_v5  ;;  %v4040_v4 = vld [vmem:[%s4891_s4 + $0x5f8] ss:$92 sps:$4 sm:$0xff]   ;;  %v4045_v5 = vld [vmem:[%s4891_s4 + $0x6ac] ss:$92 sps:$4 sm:$0xff]  }
 0x13c   : > { %2818 = vmatprep.subr.bf16.mxu0 %v3963_v6  ;;  %2859 = vmatprep.subr.bf16.mxu1 %v3966_v7  ;;  %v4048_v6 = vld [vmem:[%s4891_s4 + $0x6b4] ss:$92 sps:$4 sm:$0xff]   ;;  %v4043_v7 = vld [vmem:[%s4891_s4 + $0x6a8] ss:$92 sps:$4 sm:$0xff]  }
 0x13f   : > { %2819 = vmatpush1.bf16.msra.mxu0 %v3961_v8  ;;  %2860 = vmatpush1.bf16.msra.mxu1 %v3964_v9  ;;  %v4046_v8 = vld [vmem:[%s4891_s4 + $0x6b0] ss:$92 sps:$4 sm:$0xff]   ;;  %v4051_v9 = vld [vmem:[%s4891_s4 + $0x764] ss:$92 sps:$4 sm:$0xff]  }
 0x140   : > { %2820 = vmatprep.subr.bf16.mxu0 %v3969_v10  ;;  %2861 = vmatprep.subr.bf16.mxu1 %v3972_v11  ;;  %v4054_v10 = vld [vmem:[%s4891_s4 + $0x76c] ss:$92 sps:$4 sm:$0xff]   ;;  %v4049_v11 = vld [vmem:[%s4891_s4 + $0x760] ss:$92 sps:$4 sm:$0xff]  }
 0x143   : > { %2821 = vmatpush1.bf16.msra.mxu0 %v3967_v12  ;;  %2862 = vmatpush1.bf16.msra.mxu1 %v3970_v13  ;;  %v4052_v12 = vld [vmem:[%s4891_s4 + $0x768] ss:$92 sps:$4 sm:$0xff]   ;;  %v4057_v13 = vld [vmem:[%s4891_s4 + $0x81c] ss:$92 sps:$4 sm:$0xff]  }
 0x144   : > { %2822 = vmatprep.subr.bf16.mxu0 %v3975_v14  ;;  %2863 = vmatprep.subr.bf16.mxu1 %v3978_v15  ;;  %v4060_v14 = vld [vmem:[%s4891_s4 + $0x824] ss:$92 sps:$4 sm:$0xff]   ;;  %v1096_v15 = vld [vmem:[%s4891_s4 + $0x8d0] sm:$0xff] }
 0x145   : > { %v3670_v21 = vcombine.low %v1096_v15, %v1096_v15 }
 0x147   : > { %2823 = vmatpush1.bf16.msra.mxu0 %v3973_v16  ;;  %2864 = vmatpush1.bf16.msra.mxu1 %v3976_v17  ;;  %v1097_v16 = vld [vmem:[%s4891_s4 + $0x8d8] sm:$0xff] }
 0x148   : > { %2824 = vmatprep.subr.bf16.mxu0 %v3981_v18  ;;  %2865 = vmatprep.subr.bf16.mxu1 %v3984_v19  ;;  %v4055_v17 = vld [vmem:[%s4891_s4 + $0x818] ss:$92 sps:$4 sm:$0xff]   ;;  %v4058_v18 = vld [vmem:[%s4891_s4 + $0x820] ss:$92 sps:$4 sm:$0xff]   ;;  %v3671_v19 = vcombine.high %v1096_v15, %v1096_v15  ;;  %v3673_v20 = vcombine.high %v1097_v16, %v1097_v16 }
 0x14b   : > { %2825 = vmatpush1.bf16.msra.mxu0 %v3979_v22  ;;  %2866 = vmatpush1.bf16.msra.mxu1 %v3982_v23  ;;  %v3672_v22 = vcombine.low %v1097_v16, %v1097_v16  ;;  %v2606_v23 = vsel %vm2568_vm1, %v3670_v21, 0  ;;  %v4141_v21 = vld [vmem:[%s4891_s4 + $0x50] ss:$92 sps:$4 sm:$0xff]  }
 0x14c   : > { %3689 = vmatprep.subr.msk.bf16.mxu0 %vm2568_vm1, %v3667_v24  ;;  %3691 = vmatprep.subr.msk.bf16.mxu1 %vm2568_vm1, %v3669_v25  ;;  %v4067_v25 = vld [vmem:[%s4891_s4 + $0x44] ss:$92 sps:$4 sm:$0xff]  }
 0x14d   : > { %v2612_v24 = vsel %vm2568_vm1, %v3672_v22, 0  ;;  %v4144_v22 = vld [vmem:[%s4891_s4 + $0x58] ss:$92 sps:$4 sm:$0xff]  }
 0x14f   : > { %2827 = vmatpush1.bf16.msra.mxu0 %v2594_v29  ;;  %2868 = vmatpush1.bf16.msra.mxu1 %v2600_v30  ;;  %v4073_v29 = vld [vmem:[%s4891_s4 + $0xfc] ss:$92 sps:$4 sm:$0xff]   ;;  %v4076_v30 = vld [vmem:[%s4891_s4 + $0x104] ss:$92 sps:$4 sm:$0xff]  }
 0x150   : > { %2884 = vmatprep.subr.bf16.mxu0 %v3991_v28  ;;  %2925 = vmatprep.subr.bf16.mxu1 %v3994_v31  ;;  %v4068_v28 = vld [vmem:[%s4891_s4 + $0x48] ss:$92 sps:$4 sm:$0xff]   ;;  %v4071_v31 = vld [vmem:[%s4891_s4 + $0xf8] ss:$92 sps:$4 sm:$0xff]  }
 0x152   : > { %2835 = vmatmul.mubr.bf16.vlgmr.msra.gmra.mrb[8].mxu0 %v4952_v41  ;;  %2876 = vmatmul.mubr.bf16.vlgmr.msra.gmra.mrb[8].mxu1 %v4952_v41 }
 0x153   : > { %2885 = vmatpush1.bf16.msra.mxu0 %v3989_v32  ;;  %2926 = vmatpush1.bf16.msra.mxu1 %v3992_v33  ;;  %v4074_v32 = vld [vmem:[%s4891_s4 + $0x100] ss:$92 sps:$4 sm:$0xff]   ;;  %v4079_v33 = vld [vmem:[%s4891_s4 + $0x1b4] ss:$92 sps:$4 sm:$0xff]  }
 0x154   : > { %2886 = vmatprep.subr.bf16.mxu0 %v3997_v34  ;;  %2927 = vmatprep.subr.bf16.mxu1 %v4000_v35  ;;  %v4082_v34 = vld [vmem:[%s4891_s4 + $0x1bc] ss:$92 sps:$4 sm:$0xff]   ;;  %v4077_v35 = vld [vmem:[%s4891_s4 + $0x1b0] ss:$92 sps:$4 sm:$0xff]  }
 0x155   : > { %3694 = vmatprep.mubr.msk.bf16.mxu0 %vm2564_vm0, %v4885_v45  ;;  %3696 = vmatprep.mubr.msk.bf16.mxu1 %vm2564_vm0, %v4885_v45 }
 0x157   : > { %2887 = vmatpush1.bf16.msra.mxu0 %v3995_v36  ;;  %2928 = vmatpush1.bf16.msra.mxu1 %v3998_v37  ;;  %v4080_v36 = vld [vmem:[%s4891_s4 + $0x1b8] ss:$92 sps:$4 sm:$0xff]   ;;  %v4085_v37 = vld [vmem:[%s4891_s4 + $0x26c] ss:$92 sps:$4 sm:$0xff]  }
 0x158   : > { %2888 = vmatprep.subr.bf16.mxu0 %v4003_v38  ;;  %2929 = vmatprep.subr.bf16.mxu1 %v4006_v39  ;;  %v4088_v38 = vld [vmem:[%s4891_s4 + $0x274] ss:$92 sps:$4 sm:$0xff]   ;;  %v4083_v39 = vld [vmem:[%s4891_s4 + $0x268] ss:$92 sps:$4 sm:$0xff]  }
 0x15b   : > { %2889 = vmatpush1.bf16.msra.mxu0 %v4001_v40  ;;  %2930 = vmatpush1.bf16.msra.mxu1 %v4004_v42  ;;  %v4086_v40 = vld [vmem:[%s4891_s4 + $0x270] ss:$92 sps:$4 sm:$0xff]   ;;  %v4091_v42 = vld [vmem:[%s4891_s4 + $0x324] ss:$92 sps:$4 sm:$0xff]  }
 0x15c   : > { %2890 = vmatprep.subr.bf16.mxu0 %v4009_v43  ;;  %2931 = vmatprep.subr.bf16.mxu1 %v4012_v46  ;;  %v4094_v43 = vld [vmem:[%s4891_s4 + $0x32c] ss:$92 sps:$4 sm:$0xff]   ;;  %v4089_v46 = vld [vmem:[%s4891_s4 + $0x320] ss:$92 sps:$4 sm:$0xff]  }
 0x15f   : > { %2891 = vmatpush1.bf16.msra.mxu0 %v4007_v47  ;;  %2932 = vmatpush1.bf16.msra.mxu1 %v4010_v44  ;;  %v4092_v47 = vld [vmem:[%s4891_s4 + $0x328] ss:$92 sps:$4 sm:$0xff]   ;;  %v4097_v44 = vld [vmem:[%s4891_s4 + $0x3dc] ss:$92 sps:$4 sm:$0xff]  }
 0x160   : > { %2892 = vmatprep.subr.bf16.mxu0 %v4015_v48  ;;  %2933 = vmatprep.subr.bf16.mxu1 %v4018_v49  ;;  %v4100_v48 = vld [vmem:[%s4891_s4 + $0x3e4] ss:$92 sps:$4 sm:$0xff]   ;;  %v4095_v49 = vld [vmem:[%s4891_s4 + $0x3d8] ss:$92 sps:$4 sm:$0xff]  }
 0x163   : > { %2893 = vmatpush1.bf16.msra.mxu0 %v4013_v50  ;;  %2934 = vmatpush1.bf16.msra.mxu1 %v4016_v51  ;;  %v4098_v50 = vld [vmem:[%s4891_s4 + $0x3e0] ss:$92 sps:$4 sm:$0xff]   ;;  %v4103_v51 = vld [vmem:[%s4891_s4 + $0x494] ss:$92 sps:$4 sm:$0xff]  }
 0x164   : > { %2894 = vmatprep.subr.bf16.mxu0 %v4021_v52  ;;  %2935 = vmatprep.subr.bf16.mxu1 %v4024_v53  ;;  %v4106_v52 = vld [vmem:[%s4891_s4 + $0x49c] ss:$92 sps:$4 sm:$0xff]   ;;  %v4101_v53 = vld [vmem:[%s4891_s4 + $0x490] ss:$92 sps:$4 sm:$0xff]  }
 0x167   : > { %2895 = vmatpush1.bf16.msra.mxu0 %v4019_v54  ;;  %2936 = vmatpush1.bf16.msra.mxu1 %v4022_v55  ;;  %v4104_v54 = vld [vmem:[%s4891_s4 + $0x498] ss:$92 sps:$4 sm:$0xff]   ;;  %v4109_v55 = vld [vmem:[%s4891_s4 + $0x54c] ss:$92 sps:$4 sm:$0xff]  }
 0x168   : > { %2896 = vmatprep.subr.bf16.mxu0 %v4027_v56  ;;  %2937 = vmatprep.subr.bf16.mxu1 %v4030_v57  ;;  %v4112_v56 = vld [vmem:[%s4891_s4 + $0x554] ss:$92 sps:$4 sm:$0xff]   ;;  %v4107_v57 = vld [vmem:[%s4891_s4 + $0x548] ss:$92 sps:$4 sm:$0xff]  }
 0x16b   : > { %2897 = vmatpush1.bf16.msra.mxu0 %v4025_v58  ;;  %2938 = vmatpush1.bf16.msra.mxu1 %v4028_v59  ;;  %v4110_v58 = vld [vmem:[%s4891_s4 + $0x550] ss:$92 sps:$4 sm:$0xff]   ;;  %v4115_v59 = vld [vmem:[%s4891_s4 + $0x604] ss:$92 sps:$4 sm:$0xff]  }
 0x16c   : > { %2898 = vmatprep.subr.bf16.mxu0 %v4033_v61  ;;  %2939 = vmatprep.subr.bf16.mxu1 %v4036_v62  ;;  %v4118_v61 = vld [vmem:[%s4891_s4 + $0x60c] ss:$92 sps:$4 sm:$0xff]   ;;  %v4113_v62 = vld [vmem:[%s4891_s4 + $0x600] ss:$92 sps:$4 sm:$0xff]  }
 0x16f   : > { %2899 = vmatpush1.bf16.msra.mxu0 %v4031_v63  ;;  %2940 = vmatpush1.bf16.msra.mxu1 %v4034_v0  ;;  %v4116_v63 = vld [vmem:[%s4891_s4 + $0x608] ss:$92 sps:$4 sm:$0xff]   ;;  %v4121_v0 = vld [vmem:[%s4891_s4 + $0x6bc] ss:$92 sps:$4 sm:$0xff]  }
 0x170   : > { %2900 = vmatprep.subr.bf16.mxu0 %v4039_v1  ;;  %2941 = vmatprep.subr.bf16.mxu1 %v4042_v2  ;;  %v4124_v1 = vld [vmem:[%s4891_s4 + $0x6c4] ss:$92 sps:$4 sm:$0xff]   ;;  %v4119_v2 = vld [vmem:[%s4891_s4 + $0x6b8] ss:$92 sps:$4 sm:$0xff]  }
 0x173   : > { %2901 = vmatpush1.bf16.msra.mxu0 %v4037_v3  ;;  %2942 = vmatpush1.bf16.msra.mxu1 %v4040_v4  ;;  %v4122_v3 = vld [vmem:[%s4891_s4 + $0x6c0] ss:$92 sps:$4 sm:$0xff]   ;;  %v4127_v4 = vld [vmem:[%s4891_s4 + $0x774] ss:$92 sps:$4 sm:$0xff]  }
 0x174   : > { %2902 = vmatprep.subr.bf16.mxu0 %v4045_v5  ;;  %2943 = vmatprep.subr.bf16.mxu1 %v4048_v6  ;;  %v4130_v5 = vld [vmem:[%s4891_s4 + $0x77c] ss:$92 sps:$4 sm:$0xff]   ;;  %v4125_v6 = vld [vmem:[%s4891_s4 + $0x770] ss:$92 sps:$4 sm:$0xff]  }
 0x177   : > { %2903 = vmatpush1.bf16.msra.mxu0 %v4043_v7  ;;  %2944 = vmatpush1.bf16.msra.mxu1 %v4046_v8  ;;  %v4128_v7 = vld [vmem:[%s4891_s4 + $0x778] ss:$92 sps:$4 sm:$0xff]   ;;  %v4133_v8 = vld [vmem:[%s4891_s4 + $0x82c] ss:$92 sps:$4 sm:$0xff]  }
 0x178   : > { %2904 = vmatprep.subr.bf16.mxu0 %v4051_v9  ;;  %2945 = vmatprep.subr.bf16.mxu1 %v4054_v10  ;;  %v4136_v9 = vld [vmem:[%s4891_s4 + $0x834] ss:$92 sps:$4 sm:$0xff]   ;;  %v1098_v10 = vld [vmem:[%s4891_s4 + $0x8e0] sm:$0xff] }
 0x179   : > { %v3674_v16 = vcombine.low %v1098_v10, %v1098_v10 }
 0x17b   : > { %2905 = vmatpush1.bf16.msra.mxu0 %v4049_v11  ;;  %2946 = vmatpush1.bf16.msra.mxu1 %v4052_v12  ;;  %v1099_v11 = vld [vmem:[%s4891_s4 + $0x8e8] sm:$0xff] }
 0x17c   : > { %2906 = vmatprep.subr.bf16.mxu0 %v4057_v13  ;;  %2947 = vmatprep.subr.bf16.mxu1 %v4060_v14  ;;  %v4131_v12 = vld [vmem:[%s4891_s4 + $0x828] ss:$92 sps:$4 sm:$0xff]   ;;  %v4134_v13 = vld [vmem:[%s4891_s4 + $0x830] ss:$92 sps:$4 sm:$0xff]   ;;  %v3675_v14 = vcombine.high %v1098_v10, %v1098_v10  ;;  %v3677_v15 = vcombine.high %v1099_v11, %v1099_v11  ;;  %v4187_v10 = vld [vmem:[%s4891_s4 + $0x83c] ss:$92 sps:$4 sm:$0xff]  }
 0x17f   : > { %2907 = vmatpush1.bf16.msra.mxu0 %v4055_v17  ;;  %2948 = vmatpush1.bf16.msra.mxu1 %v4058_v18  ;;  %v3676_v17 = vcombine.low %v1099_v11, %v1099_v11  ;;  %v2618_v18 = vsel %vm2568_vm1, %v3674_v16, 0  ;;  %v1100_v11 = vld [vmem:[%s4891_s4 + $0x8f0] sm:$0xff]  ;;  %v4191_v16 = vld [vmem:[%s4891_s4 + $0x8f8] ss:$0 sps:$4 sm:$0xff]  }
 0x180   : > { %3693 = vmatprep.subr.msk.bf16.mxu0 %vm2568_vm1, %v3671_v19  ;;  %3695 = vmatprep.subr.msk.bf16.mxu1 %vm2568_vm1, %v3673_v20  ;;  %v4143_v20 = vld [vmem:[%s4891_s4 + $0x54] ss:$92 sps:$4 sm:$0xff]  }
 0x181   : > { %v2624_v19 = vsel %vm2568_vm1, %v3676_v17, 0 }
 0x183   : > { %2909 = vmatpush1.bf16.msra.mxu0 %v2606_v23  ;;  %2950 = vmatpush1.bf16.msra.mxu1 %v2612_v24  ;;  %v4147_v23 = vld [vmem:[%s4891_s4 + $0x10c] ss:$92 sps:$4 sm:$0xff]   ;;  %v5206_v24 = vpop.permute.xlu0 %1105 }
 0x184   : > { %2966 = vmatprep.subr.bf16.mxu0 %v4067_v25  ;;  %3007 = vmatprep.subr.bf16.mxu1 %v4070_v26  ;;  %v4145_v25 = vld [vmem:[%s4891_s4 + $0x108] ss:$92 sps:$4 sm:$0xff]   ;;  %v4148_v26 = vld [vmem:[%s4891_s4 + $0x110] ss:$92 sps:$4 sm:$0xff]  }
 0x186   : > { %2917 = vmatmul.mubr.bf16.vlgmr.msra.gmra.mrb[12].mxu0 %v4952_v41  ;;  %2958 = vmatmul.mubr.bf16.vlgmr.msra.gmra.mrb[12].mxu1 %v4952_v41 }
 0x187   : > { %2967 = vmatpush1.bf16.msra.mxu0 %v4065_v27  ;;  %3008 = vmatpush1.bf16.msra.mxu1 %v4068_v28  ;;  %v4151_v27 = vld [vmem:[%s4891_s4 + $0x1c4] ss:$92 sps:$4 sm:$0xff]  }
 0x188   : > { %2968 = vmatprep.subr.bf16.mxu0 %v4073_v29  ;;  %3009 = vmatprep.subr.bf16.mxu1 %v4076_v30 }
 0x189   : > { %3698 = vmatprep.mubr.msk.bf16.mxu0 %vm2564_vm0, %v4885_v45  ;;  %3700 = vmatprep.mubr.msk.bf16.mxu1 %vm2564_vm0, %v4885_v45 }
 0x18b   : > { %2969 = vmatpush1.bf16.msra.mxu0 %v4071_v31  ;;  %3010 = vmatpush1.bf16.msra.mxu1 %v4074_v32 }
 0x18c   : > { %2970 = vmatprep.subr.bf16.mxu0 %v4079_v33  ;;  %3011 = vmatprep.subr.bf16.mxu1 %v4082_v34 }
 0x18f   : > { %2971 = vmatpush1.bf16.msra.mxu0 %v4077_v35  ;;  %3012 = vmatpush1.bf16.msra.mxu1 %v4080_v36 }
 0x190   : > { %2972 = vmatprep.subr.bf16.mxu0 %v4085_v37  ;;  %3013 = vmatprep.subr.bf16.mxu1 %v4088_v38  ;;  %v4149_v38 = vld [vmem:[%s4891_s4 + $0x1c0] ss:$92 sps:$4 sm:$0xff]  }
 0x193   : > { %2973 = vmatpush1.bf16.msra.mxu0 %v4083_v39  ;;  %3014 = vmatpush1.bf16.msra.mxu1 %v4086_v40  ;;  %v4152_v39 = vld [vmem:[%s4891_s4 + $0x1c8] ss:$92 sps:$4 sm:$0xff]  }
 0x194   : > { %2974 = vmatprep.subr.bf16.mxu0 %v4091_v42  ;;  %3015 = vmatprep.subr.bf16.mxu1 %v4094_v43 }
 0x197   : > { %2975 = vmatpush1.bf16.msra.mxu0 %v4089_v46  ;;  %3016 = vmatpush1.bf16.msra.mxu1 %v4092_v47  ;;  %v4155_v46 = vld [vmem:[%s4891_s4 + $0x27c] ss:$92 sps:$4 sm:$0xff]  }
 0x198   : > { %2976 = vmatprep.subr.bf16.mxu0 %v4097_v44  ;;  %3017 = vmatprep.subr.bf16.mxu1 %v4100_v48 }
 0x19b   : > { %2977 = vmatpush1.bf16.msra.mxu0 %v4095_v49  ;;  %3018 = vmatpush1.bf16.msra.mxu1 %v4098_v50  ;;  %v4153_v50 = vld [vmem:[%s4891_s4 + $0x278] ss:$92 sps:$4 sm:$0xff]  }
 0x19c   : > { %2978 = vmatprep.subr.bf16.mxu0 %v4103_v51  ;;  %3019 = vmatprep.subr.bf16.mxu1 %v4106_v52  ;;  %v4156_v51 = vld [vmem:[%s4891_s4 + $0x280] ss:$92 sps:$4 sm:$0xff]   ;;  %v4159_v52 = vld [vmem:[%s4891_s4 + $0x334] ss:$92 sps:$4 sm:$0xff]  }
 0x19f   : > { %2979 = vmatpush1.bf16.msra.mxu0 %v4101_v53  ;;  %3020 = vmatpush1.bf16.msra.mxu1 %v4104_v54  ;;  %v4157_v53 = vld [vmem:[%s4891_s4 + $0x330] ss:$92 sps:$4 sm:$0xff]   ;;  %v4160_v54 = vld [vmem:[%s4891_s4 + $0x338] ss:$92 sps:$4 sm:$0xff]  }
 0x1a0   : > { %2980 = vmatprep.subr.bf16.mxu0 %v4109_v55  ;;  %3021 = vmatprep.subr.bf16.mxu1 %v4112_v56  ;;  %v4163_v55 = vld [vmem:[%s4891_s4 + $0x3ec] ss:$92 sps:$4 sm:$0xff]  }
 0x1a1   : > { %v4161_v56 = vld [vmem:[%s4891_s4 + $0x3e8] ss:$92 sps:$4 sm:$0xff]  }
 0x1a3   : > { %2981 = vmatpush1.bf16.msra.mxu0 %v4107_v57  ;;  %3022 = vmatpush1.bf16.msra.mxu1 %v4110_v58  ;;  %v4164_v57 = vld [vmem:[%s4891_s4 + $0x3f0] ss:$92 sps:$4 sm:$0xff]   ;;  %v4167_v58 = vld [vmem:[%s4891_s4 + $0x4a4] ss:$92 sps:$4 sm:$0xff]  }
 0x1a4   : > { %2982 = vmatprep.subr.bf16.mxu0 %v4115_v59  ;;  %3023 = vmatprep.subr.bf16.mxu1 %v4118_v61  ;;  %v4165_v59 = vld [vmem:[%s4891_s4 + $0x4a0] ss:$92 sps:$4 sm:$0xff]   ;;  %v4168_v61 = vld [vmem:[%s4891_s4 + $0x4a8] ss:$92 sps:$4 sm:$0xff]  }
 0x1a7   : > { %2983 = vmatpush1.bf16.msra.mxu0 %v4113_v62  ;;  %3024 = vmatpush1.bf16.msra.mxu1 %v4116_v63  ;;  %v4171_v62 = vld [vmem:[%s4891_s4 + $0x55c] ss:$92 sps:$4 sm:$0xff]  }
 0x1a8   : > { %2984 = vmatprep.subr.bf16.mxu0 %v4121_v0  ;;  %3025 = vmatprep.subr.bf16.mxu1 %v4124_v1  ;;  %v4169_v63 = vld [vmem:[%s4891_s4 + $0x558] ss:$92 sps:$4 sm:$0xff]   ;;  %v4172_v0 = vld [vmem:[%s4891_s4 + $0x560] ss:$92 sps:$4 sm:$0xff]  }
 0x1a9   : > { %v4175_v1 = vld [vmem:[%s4891_s4 + $0x614] ss:$92 sps:$4 sm:$0xff]  }
 0x1ab   : > { %2985 = vmatpush1.bf16.msra.mxu0 %v4119_v2  ;;  %3026 = vmatpush1.bf16.msra.mxu1 %v4122_v3  ;;  %v4173_v2 = vld [vmem:[%s4891_s4 + $0x610] ss:$92 sps:$4 sm:$0xff]   ;;  %v4176_v3 = vld [vmem:[%s4891_s4 + $0x618] ss:$92 sps:$4 sm:$0xff]  }
 0x1ac   : > { %2986 = vmatprep.subr.bf16.mxu0 %v4127_v4  ;;  %3027 = vmatprep.subr.bf16.mxu1 %v4130_v5  ;;  %v4179_v4 = vld [vmem:[%s4891_s4 + $0x6cc] ss:$92 sps:$4 sm:$0xff]  }
 0x1ad   : > { %v4177_v5 = vld [vmem:[%s4891_s4 + $0x6c8] ss:$92 sps:$4 sm:$0xff]  }
 0x1af   : > { %2987 = vmatpush1.bf16.msra.mxu0 %v4125_v6  ;;  %3028 = vmatpush1.bf16.msra.mxu1 %v4128_v7  ;;  %v4180_v6 = vld [vmem:[%s4891_s4 + $0x6d0] ss:$92 sps:$4 sm:$0xff]   ;;  %v4183_v7 = vld [vmem:[%s4891_s4 + $0x784] ss:$92 sps:$4 sm:$0xff]  }
 0x1b0   : > { %2988 = vmatprep.subr.bf16.mxu0 %v4133_v8  ;;  %3029 = vmatprep.subr.bf16.mxu1 %v4136_v9  ;;  %v4181_v8 = vld [vmem:[%s4891_s4 + $0x780] ss:$92 sps:$4 sm:$0xff]   ;;  %v4184_v9 = vld [vmem:[%s4891_s4 + $0x788] ss:$92 sps:$4 sm:$0xff]  }
 0x1b3   : > { %2989 = vmatpush1.bf16.msra.mxu0 %v4131_v12  ;;  %3030 = vmatpush1.bf16.msra.mxu1 %v4134_v13  ;;  %v4185_v12 = vld [vmem:[%s4891_s4 + $0x838] ss:$92 sps:$4 sm:$0xff]   ;;  %v4188_v13 = vld [vmem:[%s4891_s4 + $0x840] ss:$92 sps:$4 sm:$0xff]  }
 0x1b4   : > { %3697 = vmatprep.subr.msk.bf16.mxu0 %vm2568_vm1, %v3675_v14  ;;  %3699 = vmatprep.subr.msk.bf16.mxu1 %vm2568_vm1, %v3677_v15  ;;  %v3679_v14 = vcombine.high %v1100_v11, %v1100_v11  ;;  %v3678_v15 = vcombine.low %v1100_v11, %v1100_v11 }
 0x1b6   : > { %v2630_v17 = vsel %vm2568_vm1, %v3678_v15, 0 }
 0x1b7   : > { %2991 = vmatpush1.bf16.msra.mxu0 %v2618_v18  ;;  %3032 = vmatpush1.bf16.msra.mxu1 %v2624_v19  ;;  %v2636_v18 = vsel %vm2568_vm1, %v4191_v16, 0 }
 0x1b8   : > { %3048 = vmatprep.subr.bf16.mxu0 %v4143_v20  ;;  %3089 = vmatprep.subr.bf16.mxu1 %v4216_v60 }
 0x1ba   : > { %2999 = vmatmul.mubr.bf16.vlgmr.msra.gmra.mrb[16].mxu0 %v4952_v41  ;;  %3040 = vmatmul.mubr.bf16.vlgmr.msra.gmra.mrb[16].mxu1 %v4952_v41 }
 0x1bb   : > { %3049 = vmatpush1.bf16.msra.mxu0 %v4141_v21  ;;  %3090 = vmatpush1.bf16.msra.mxu1 %v4144_v22 }
 0x1bc   : > { %3050 = vmatprep.subr.bf16.mxu0 %v4147_v23  ;;  %3091 = vmatprep.subr.bf16.mxu1 %v4216_v60 }
 0x1bd   : > { %v2672_v28 = vpop.f32.mrb[0].mxu0  ;;  %v2713_v29 = vpop.f32.mrb[0].mxu1  ;;  %3702 = vmatprep.mubr.msk.bf16.mxu0 %vm2564_vm0, %v4885_v45  ;;  %3703 = vmatprep.mubr.msk.bf16.mxu1 %vm2564_vm0, %v4885_v45 }
 0x1be   : > { %v2673_v30 = vadd.f32 %v2672_v28, %v5206_v24  ;;  %v2674_v31 = vpop.f32.mrb[1].mxu0  ;;  %v2714_v32 = vadd.f32 %v2713_v29, %v5206_v24  ;;  %v2715_v33 = vpop.f32.mrb[1].mxu1 }
 0x1bf   : > { %v2675_v34 = vadd.f32 %v2674_v31, %v5206_v24  ;;  %v2716_v35 = vadd.f32 %v2715_v33, %v5206_v24  ;;  %v2676_v36 = vpop.f32.mrb[2].mxu0  ;;  %v2717_v37 = vpop.f32.mrb[2].mxu1  ;;  %3051 = vmatpush1.bf16.msra.mxu0 %v4145_v25  ;;  %3092 = vmatpush1.bf16.msra.mxu1 %v4148_v26 }
 0x1c0   : > { %v3129_v45 = vmax.f32 %v2673_v30, 0.0  ;;  %v3131_v40 = vmax.f32 %v2714_v32, 0.0  ;;  %v2677_v42 = vpop.f32.mrb[3].mxu0  ;;  %v2718_v43 = vpop.f32.mrb[3].mxu1  ;;  %3052 = vmatprep.subr.bf16.mxu0 %v4151_v27  ;;  %3093 = vmatprep.subr.bf16.mxu1 %v4216_v60 }
 0x1c1   : > { %v3130_v47 = vmax.f32 %v2675_v34, 0.0  ;;  %v3132_v44 = vmax.f32 %v2716_v35, 0.0 }
 0x1c3   : > { %v3719_v48 = vpack.c.bf16 %v3130_v47, %v3129_v45  ;;  %v3720_v49 = vpack.c.bf16 %v3132_v44, %v3131_v40  ;;  %3053 = vmatpush1.bf16.msra.mxu0 %v4149_v38  ;;  %3094 = vmatpush1.bf16.msra.mxu1 %v4152_v39 }
 0x1c4   : > { %3054 = vmatprep.subr.bf16.mxu0 %v4155_v46  ;;  %3095 = vmatprep.subr.bf16.mxu1 %v4216_v60 }
 0x1c5   : > { %3245 = vst [vmem:[%s5228_s11] sm:$0xff] %v3719_v48  ;;  %3246 = vst [vmem:[%s5228_s11 + $0x8] sm:$0xff] %v3720_v49 }
 0x1c7   : > { %3055 = vmatpush1.bf16.msra.mxu0 %v4153_v50  ;;  %3096 = vmatpush1.bf16.msra.mxu1 %v4156_v51 }
 0x1c8   : > { %3056 = vmatprep.subr.bf16.mxu0 %v4159_v52  ;;  %3097 = vmatprep.subr.bf16.mxu1 %v4216_v60 }
 0x1cb   : > { %3057 = vmatpush1.bf16.msra.mxu0 %v4157_v53  ;;  %3098 = vmatpush1.bf16.msra.mxu1 %v4160_v54 }
 0x1cc   : > { %3058 = vmatprep.subr.bf16.mxu0 %v4163_v55  ;;  %3099 = vmatprep.subr.bf16.mxu1 %v4216_v60 }
 0x1cf   : > { %3059 = vmatpush1.bf16.msra.mxu0 %v4161_v56  ;;  %3100 = vmatpush1.bf16.msra.mxu1 %v4164_v57 }
 0x1d0   : > { %3060 = vmatprep.subr.bf16.mxu0 %v4167_v58  ;;  %3101 = vmatprep.subr.bf16.mxu1 %v4216_v60 }
 0x1d3   : > { %3061 = vmatpush1.bf16.msra.mxu0 %v4165_v59  ;;  %3102 = vmatpush1.bf16.msra.mxu1 %v4168_v61 }
 0x1d4   : > { %3062 = vmatprep.subr.bf16.mxu0 %v4171_v62  ;;  %3103 = vmatprep.subr.bf16.mxu1 %v4216_v60 }
 0x1d7   : > { %3063 = vmatpush1.bf16.msra.mxu0 %v4169_v63  ;;  %3104 = vmatpush1.bf16.msra.mxu1 %v4172_v0 }
 0x1d8   : > { %3064 = vmatprep.subr.bf16.mxu0 %v4175_v1  ;;  %3105 = vmatprep.subr.bf16.mxu1 %v4216_v60 }
 0x1db   : > { %3065 = vmatpush1.bf16.msra.mxu0 %v4173_v2  ;;  %3106 = vmatpush1.bf16.msra.mxu1 %v4176_v3 }
 0x1dc   : > { %3066 = vmatprep.subr.bf16.mxu0 %v4179_v4  ;;  %3107 = vmatprep.subr.bf16.mxu1 %v4216_v60 }
 0x1df   : > { %3067 = vmatpush1.bf16.msra.mxu0 %v4177_v5  ;;  %3108 = vmatpush1.bf16.msra.mxu1 %v4180_v6 }
 0x1e0   : > { %3068 = vmatprep.subr.bf16.mxu0 %v4183_v7  ;;  %3109 = vmatprep.subr.bf16.mxu1 %v4216_v60 }
 0x1e3   : > { %3069 = vmatpush1.bf16.msra.mxu0 %v4181_v8  ;;  %3110 = vmatpush1.bf16.msra.mxu1 %v4184_v9 }
 0x1e4   : > { %3070 = vmatprep.subr.bf16.mxu0 %v4187_v10  ;;  %3111 = vmatprep.subr.bf16.mxu1 %v4216_v60 }
 0x1e7   : > { %3071 = vmatpush1.bf16.msra.mxu0 %v4185_v12  ;;  %3112 = vmatpush1.bf16.msra.mxu1 %v4188_v13 }
 0x1e8   : > { %3701 = vmatprep.subr.msk.bf16.mxu0 %vm2568_vm1, %v3679_v14  ;;  %3113 = vmatprep.subr.bf16.mxu1 %v4216_v60 }
 0x1eb   : > { %3073 = vmatpush1.bf16.msra.mxu0 %v2630_v17  ;;  %3114 = vmatpush1.bf16.msra.mxu1 %v2636_v18 }
 0x1ee   : > { %3081 = vmatmul.mubr.bf16.vlgmr.msra.gmra.mrb[20].mxu0 %v4952_v41  ;;  %3122 = vmatmul.mubr.bf16.vlgmr.msra.gmra.mrb[20].mxu1 %v4952_v41 }
 0x1f1   : > { %v2754_v19 = vpop.f32.mrb[4].mxu0  ;;  %v2795_v20 = vpop.f32.mrb[4].mxu1 }
 0x1f2   : > { %v2755_v21 = vadd.f32 %v2754_v19, %v5206_v24  ;;  %v2796_v22 = vadd.f32 %v2795_v20, %v5206_v24  ;;  %v2756_v23 = vpop.f32.mrb[5].mxu0  ;;  %v2797_v60 = vpop.f32.mrb[5].mxu1 }
 0x1f3   : > { %v2757_v25 = vadd.f32 %v2756_v23, %v5206_v24  ;;  %v2798_v26 = vadd.f32 %v2797_v60, %v5206_v24  ;;  %v2758_v27 = vpop.f32.mrb[6].mxu0  ;;  %v2799_v28 = vpop.f32.mrb[6].mxu1 }
 0x1f4   : > { %v3133_v29 = vmax.f32 %v2755_v21, 0.0  ;;  %v3135_v30 = vmax.f32 %v2796_v22, 0.0  ;;  %v2759_v31 = vpop.f32.mrb[7].mxu0  ;;  %v2800_v41 = vpop.f32.mrb[7].mxu1 }
 0x1f5   : > { %v3134_v32 = vmax.f32 %v2757_v25, 0.0  ;;  %v3136_v33 = vmax.f32 %v2798_v26, 0.0 }
 0x1f7   : > { %v3721_v34 = vpack.c.bf16 %v3134_v32, %v3133_v29  ;;  %v3722_v35 = vpack.c.bf16 %v3136_v33, %v3135_v30 }
 0x1f9   : > { %3247 = vst [vmem:[%s5228_s11 + $0x10] sm:$0xff] %v3721_v34  ;;  %3248 = vst [vmem:[%s5228_s11 + $0x18] sm:$0xff] %v3722_v35 }
 0x225   : > { %v2836_v36 = vpop.f32.mrb[8].mxu0  ;;  %v2877_v37 = vpop.f32.mrb[8].mxu1 }
 0x226   : > { %v2837_v38 = vadd.f32 %v2836_v36, %v5206_v24  ;;  %v2878_v39 = vadd.f32 %v2877_v37, %v5206_v24  ;;  %v2838_v45 = vpop.f32.mrb[9].mxu0  ;;  %v2879_v40 = vpop.f32.mrb[9].mxu1 }
 0x227   : > { %v2839_v42 = vadd.f32 %v2838_v45, %v5206_v24  ;;  %v2880_v43 = vadd.f32 %v2879_v40, %v5206_v24  ;;  %v2840_v46 = vpop.f32.mrb[10].mxu0  ;;  %v2881_v47 = vpop.f32.mrb[10].mxu1 }
 0x228   : > { %v3137_v44 = vmax.f32 %v2837_v38, 0.0  ;;  %v3139_v48 = vmax.f32 %v2878_v39, 0.0  ;;  %v2841_v49 = vpop.f32.mrb[11].mxu0  ;;  %v2882_v50 = vpop.f32.mrb[11].mxu1 }
 0x229   : > { %v3138_v51 = vmax.f32 %v2839_v42, 0.0  ;;  %v3140_v52 = vmax.f32 %v2880_v43, 0.0 }
 0x22b   : > { %v3723_v53 = vpack.c.bf16 %v3138_v51, %v3137_v44  ;;  %v3724_v54 = vpack.c.bf16 %v3140_v52, %v3139_v48 }
 0x22d   : > { %3249 = vst [vmem:[%s5228_s11 + $0x20] sm:$0xff] %v3723_v53  ;;  %3250 = vst [vmem:[%s5228_s11 + $0x28] sm:$0xff] %v3724_v54 }
 0x259   : > { %v2918_v55 = vpop.f32.mrb[12].mxu0  ;;  %v2959_v56 = vpop.f32.mrb[12].mxu1 }
 0x25a   : > { %v2919_v57 = vadd.f32 %v2918_v55, %v5206_v24  ;;  %v2960_v58 = vadd.f32 %v2959_v56, %v5206_v24  ;;  %v2920_v59 = vpop.f32.mrb[13].mxu0  ;;  %v2961_v61 = vpop.f32.mrb[13].mxu1 }
 0x25b   : > { %v2921_v62 = vadd.f32 %v2920_v59, %v5206_v24  ;;  %v2962_v63 = vadd.f32 %v2961_v61, %v5206_v24  ;;  %v2922_v0 = vpop.f32.mrb[14].mxu0  ;;  %v2963_v1 = vpop.f32.mrb[14].mxu1 }
 0x25c   : > { %v3141_v2 = vmax.f32 %v2919_v57, 0.0  ;;  %v3143_v3 = vmax.f32 %v2960_v58, 0.0  ;;  %v2923_v4 = vpop.f32.mrb[15].mxu0  ;;  %v2964_v5 = vpop.f32.mrb[15].mxu1 }
 0x25d   : > { %v3142_v6 = vmax.f32 %v2921_v62, 0.0  ;;  %v3144_v7 = vmax.f32 %v2962_v63, 0.0 }
 0x25f   : > { %v3725_v8 = vpack.c.bf16 %v3142_v6, %v3141_v2  ;;  %v3726_v9 = vpack.c.bf16 %v3144_v7, %v3143_v3 }
 0x261   : > { %3251 = vst [vmem:[%s5228_s11 + $0x30] sm:$0xff] %v3725_v8  ;;  %3252 = vst [vmem:[%s5228_s11 + $0x38] sm:$0xff] %v3726_v9 }
 0x28d   : > { %v3000_v10 = vpop.f32.mrb[16].mxu0  ;;  %v3041_v11 = vpop.f32.mrb[16].mxu1 }
 0x28e   : > { %v3001_v12 = vadd.f32 %v3000_v10, %v5206_v24  ;;  %v3042_v13 = vadd.f32 %v3041_v11, %v5206_v24  ;;  %v3002_v14 = vpop.f32.mrb[17].mxu0  ;;  %v3043_v15 = vpop.f32.mrb[17].mxu1 }
 0x28f   : > { %v3003_v16 = vadd.f32 %v3002_v14, %v5206_v24  ;;  %v3044_v17 = vadd.f32 %v3043_v15, %v5206_v24  ;;  %v3004_v18 = vpop.f32.mrb[18].mxu0  ;;  %v3045_v19 = vpop.f32.mrb[18].mxu1 }
 0x290   : > { %v3145_v20 = vmax.f32 %v3001_v12, 0.0  ;;  %v3147_v21 = vmax.f32 %v3042_v13, 0.0  ;;  %v3005_v22 = vpop.f32.mrb[19].mxu0  ;;  %v3046_v23 = vpop.f32.mrb[19].mxu1 }
 0x291   : > { %v3146_v60 = vmax.f32 %v3003_v16, 0.0  ;;  %v3148_v25 = vmax.f32 %v3044_v17, 0.0 }
 0x293   : > { %v3727_v26 = vpack.c.bf16 %v3146_v60, %v3145_v20  ;;  %v3728_v27 = vpack.c.bf16 %v3148_v25, %v3147_v21 }
 0x295   : > { %3253 = vst [vmem:[%s5228_s11 + $0x40] sm:$0xff] %v3727_v26  ;;  %3254 = vst [vmem:[%s5228_s11 + $0x48] sm:$0xff] %v3728_v27 }
 0x2c1   : > { %v3082_v28 = vpop.f32.mrb[20].mxu0  ;;  %v3123_v29 = vpop.f32.mrb[20].mxu1 }
 0x2c2   : > { %v3083_v30 = vadd.f32 %v3082_v28, %v5206_v24  ;;  %v3124_v31 = vadd.f32 %v3123_v29, %v5206_v24  ;;  %v3084_v41 = vpop.f32.mrb[21].mxu0  ;;  %v3125_v32 = vpop.f32.mrb[21].mxu1 }
 0x2c3   : > { %v3085_v33 = vadd.f32 %v3084_v41, %v5206_v24  ;;  %v3086_v34 = vpop.f32.mrb[22].mxu0  ;;  %v3126_v35 = vpop.f32.mrb[22].mxu1 }
 0x2c4   : > { %v3149_v36 = vmax.f32 %v3083_v30, 0.0  ;;  %v3151_v37 = vmax.f32 %v3124_v31, 0.0  ;;  %v3087_v38 = vpop.f32.mrb[23].mxu0  ;;  %v3127_v39 = vpop.f32.mrb[23].mxu1 }
 0x2c5   : > { %v3150_v45 = vmax.f32 %v3085_v33, 0.0 }
 0x2c6   : > { %v3730_v40 = vpack.c.bf16 %v3151_v37, %v3151_v37 }
 0x2c7   : > { %v3729_v42 = vpack.c.bf16 %v3150_v45, %v3149_v36 }
 0x2c8   : > { %3256 = vst [vmem:[%s5228_s11 + $0x58] sm:$0xf] %v3730_v40 }
 0x2c9   : > { %3255 = vst [vmem:[%s5228_s11 + $0x50] sm:$0xff] %v3729_v42 }
 0x2ca PF: > { %p10_p9 = scmp.ge.s32.totalorder %s4254_s16, 4   ;;  %s5318_s12 = smov %s4210_s13 }
 0x2cb   : > { %s5319_s13 = smov %s4263_s19  ;;  %s5320_s14 = smov %s4254_s16 }
 0x2cc   :  { %12 = sbr.rel (!%p10_p9) target bundleno = 2 (0x2), region = 99 }

// kernel: rpsnet_forward.5
= control target key start
LH: loop header
LB: loop body
LE: loop exit
PB: predicated region body
PF: predicated region fallthrough
CT: control target
= control target key end

     0   :  { %v410_v1 = vmov 0   ;;  %vm184_vm0 = vcmask 588800   ;;  %vm188_vm1 = vcmask 1043456   ;;  %vm244_vm2 = vcmask 785408   ;;  %s544_s2 = inlined_call_operand.vmem [shape: bf16[200,192], index: 2, kind: input, shape index: {}]   ;;  %s545_s0 = inlined_call_operand.vmem [shape: bf16[8,200], index: 0, kind: input, shape index: {}]   ;;  %s546_s1 = inlined_call_operand.vmem [shape: f32[8,1], index: 1, kind: input, shape index: {}]   ;;  %s547_s3 = inlined_call_operand.vmem [shape: f32[3,8,96], index: 3, kind: input, shape index: {}]   ;;  %s548_s4 = inlined_call_operand.vmem [shape: f32[3,1], index: 4, kind: input, shape index: {}]   ;;  %s549_s5 = inlined_call_operand.vmem [shape: f32[3,2], index: 5, kind: output, shape index: {}]  }
   0x1   :  { %v370_v0 = vld [vmem:[%s544_s2 + $0x4] ss:$8 sps:$4 sm:$0xff]   ;;  %369 = vset.pattern.permute.xlu0 %v410_v1  ;;  %v372_v2 = vld [vmem:[%s544_s2] ss:$8 sps:$4 sm:$0xff]   ;;  %v373_v3 = vld [vmem:[%s544_s2 + $0x14] ss:$8 sps:$4 sm:$0xff]   ;;  %v257_v60 = vlaneseq }
   0x2   :  { %195 = vmatprep.subr.bf16.mxu0 %v370_v0  ;;  %v375_v4 = vld [vmem:[%s544_s2 + $0x10] ss:$8 sps:$4 sm:$0xff]   ;;  %v376_v5 = vld [vmem:[%s544_s2 + $0x24] ss:$8 sps:$4 sm:$0xff]   ;;  %v378_v6 = vld [vmem:[%s544_s2 + $0x20] ss:$8 sps:$4 sm:$0xff]  }
   0x3   :  { %196 = vmatpush1.bf16.msra.mxu0 %v372_v2  ;;  %v379_v7 = vld [vmem:[%s544_s2 + $0x34] ss:$8 sps:$4 sm:$0xff]   ;;  %v381_v8 = vld [vmem:[%s544_s2 + $0x30] ss:$8 sps:$4 sm:$0xff]   ;;  %v382_v9 = vld [vmem:[%s544_s2 + $0x44] ss:$8 sps:$4 sm:$0xff]  }
   0x4   :  { %197 = vmatprep.subr.bf16.mxu0 %v373_v3  ;;  %v384_v10 = vld [vmem:[%s544_s2 + $0x40] ss:$8 sps:$4 sm:$0xff]   ;;  %v385_v11 = vld [vmem:[%s544_s2 + $0x54] ss:$8 sps:$4 sm:$0xff]   ;;  %v387_v15 = vld [vmem:[%s544_s2 + $0x50] ss:$8 sps:$4 sm:$0xff]  }
   0x5   :  { %v21_v12 = vld [vmem:[%s545_s0] sm:$0xff]  ;;  %v391_v18 = vld [vmem:[%s544_s2 + $0x74] ss:$8 sps:$4 sm:$0xff]   ;;  %v393_v19 = vld [vmem:[%s544_s2 + $0x70] ss:$8 sps:$4 sm:$0xff]   ;;  %vm286_vm3 = vcmask 261120  }
   0x6   :  { %v47_v13 = vld [vmem:[%s546_s1] sm:$0xff]  ;;  %v338_v14 = vcombine.high %v21_v12, %v21_v12  ;;  %v397_v22 = vld [vmem:[%s544_s2 + $0x94] ss:$8 sps:$4 sm:$0xff]   ;;  %v399_v23 = vld [vmem:[%s544_s2 + $0x90] ss:$8 sps:$4 sm:$0xff]   ;;  %v337_v32 = vcombine.low %v21_v12, %v21_v12  ;;  %v258_v61 = vand.u32 127, %v257_v60 }
   0x7   :  { %198 = vmatpush1.bf16.msra.mxu0 %v375_v4  ;;  %50 = vperm.xlu0 %369, %v47_v13   ;;  %v388_v16 = vld [vmem:[%s544_s2 + $0x64] ss:$8 sps:$4 sm:$0xff]   ;;  %v390_v17 = vld [vmem:[%s544_s2 + $0x60] ss:$8 sps:$4 sm:$0xff]   ;;  %v403_v26 = vld [vmem:[%s544_s2 + $0xb4] ss:$8 sps:$4 sm:$0xff]  }
   0x8   :  { %199 = vmatprep.subr.bf16.mxu0 %v376_v5  ;;  %366 = vmatprep.mubr.msk.bf16.mxu0 %vm184_vm0, %v338_v14  ;;  %v394_v20 = vld [vmem:[%s544_s2 + $0x84] ss:$8 sps:$4 sm:$0xff]   ;;  %v396_v21 = vld [vmem:[%s544_s2 + $0x80] ss:$8 sps:$4 sm:$0xff]   ;;  %v405_v28 = vld [vmem:[%s544_s2 + $0xb0] ss:$8 sps:$4 sm:$0xff]  }
   0x9   :  { %v400_v24 = vld [vmem:[%s544_s2 + $0xa4] ss:$8 sps:$4 sm:$0xff]   ;;  %v402_v25 = vld [vmem:[%s544_s2 + $0xa0] ss:$8 sps:$4 sm:$0xff]   ;;  %v240_v39 = vld [vmem:[%s547_s3 + $0x10] sm:$0xff]  ;;  %v260_v62 = vshrl.u32 %v257_v60, 7 }
   0xa   :  { %v46_v27 = vld [vmem:[%s544_s2 + $0xc0] sm:$0xff]  ;;  %s411_s2 = smov 32   ;;  %v239_v44 = vld [vmem:[%s547_s3 + $0x8] sm:$0xff]  ;;  %vm271_vm4 = vcmask 1041409   ;;  %vm273_vm5 = vcmask 1042434   ;;  %vm276_vm6 = vcmask 59392  }
   0xb   :  { %200 = vmatpush1.bf16.msra.mxu0 %v378_v6  ;;  %v364_v29 = vcombine.high %v46_v27, %v46_v27  ;;  %v363_v30 = vcombine.low %v46_v27, %v46_v27  ;;  %v238_v46 = vld [vmem:[%s547_s3] sm:$0xff]  ;;  %v261_v1 = vsub.s32 %v258_v61, %v260_v62  ;;  %vm322_vm7 = vcmask 7168  }
   0xc   :  { %201 = vmatprep.subr.bf16.mxu0 %v379_v7  ;;  %vm331_vm8 = vcmask 10240  }
   0xd   :  { %v190_v31 = vsel %vm188_vm1, %v363_v30, 0 }
   0xf   :  { %202 = vmatpush1.bf16.msra.mxu0 %v381_v8 }
  0x10   :  { %203 = vmatprep.subr.bf16.mxu0 %v382_v9 }
  0x13   :  { %204 = vmatpush1.bf16.msra.mxu0 %v384_v10 }
  0x14   :  { %205 = vmatprep.subr.bf16.mxu0 %v385_v11 }
  0x17   :  { %206 = vmatpush1.bf16.msra.mxu0 %v387_v15 }
  0x18   :  { %207 = vmatprep.subr.bf16.mxu0 %v388_v16 }
  0x1b   :  { %208 = vmatpush1.bf16.msra.mxu0 %v390_v17 }
  0x1c   :  { %209 = vmatprep.subr.bf16.mxu0 %v391_v18  ;;  %v324_v18 = vld [vmem:[%s548_s4] sm:$0x7] }
  0x1f   :  { %210 = vmatpush1.bf16.msra.mxu0 %v393_v19 }
  0x20   :  { %211 = vmatprep.subr.bf16.mxu0 %v394_v20 }
  0x23   :  { %212 = vmatpush1.bf16.msra.mxu0 %v396_v21 }
  0x24   :  { %213 = vmatprep.subr.bf16.mxu0 %v397_v22 }
  0x27   :  { %214 = vmatpush1.bf16.msra.mxu0 %v399_v23 }
  0x28   :  { %215 = vmatprep.subr.bf16.mxu0 %v400_v24 }
  0x2b   :  { %216 = vmatpush1.bf16.msra.mxu0 %v402_v25 }
  0x2c   :  { %217 = vmatprep.subr.bf16.mxu0 %v403_v26 }
  0x2f   :  { %218 = vmatpush1.bf16.msra.mxu0 %v405_v28 }
  0x30   :  { %365 = vmatprep.subr.msk.bf16.mxu0 %vm188_vm1, %v364_v29 }
  0x33   :  { %220 = vmatpush1.bf16.msra.mxu0 %v190_v31 }
  0x36   :  { %228 = vmatmul.mubr.bf16.vlgmr.msra.gmra.mrb[0].mxu0 %v337_v32 }
  0x86   :  { %v51_v33 = vpop.permute.xlu0 %50 }
 0x109   :  { %v229_v34 = vpop.f32.mrb[0].mxu0 }
 0x10a   :  { %v230_v35 = vadd.f32 %v229_v34, %v51_v33  ;;  %v231_v36 = vpop.f32.mrb[1].mxu0 }
 0x10b   :  { %v232_v37 = vadd.f32 %v231_v36, %v51_v33  ;;  %v233_v38 = vpop.f32.mrb[2].mxu0 }
 0x10c   :  { %v236_v40 = vmax.f32 %v230_v35, 0.0  ;;  %v234_v41 = vpop.f32.mrb[3].mxu0 }
 0x10d   :  { %v237_v42 = vmax.f32 %v232_v37, 0.0 }
 0x10e   :  { %282 = vrot.lane.b32.xlu0 %v236_v40, %s411_s2  ;;  %v243_v43 = vmul.f32 %v240_v39, %v236_v40  ;;  %v242_v45 = vmul.f32 %v239_v44, %v236_v40  ;;  %v241_v48 = vmul.f32 %v238_v46, %v236_v40 }
 0x10f   :  { %284 = vrot.lane.b32.xlu1 %v237_v42, %s411_s2 }
 0x110   :  { %v248_v47 = vsel %vm244_vm2, %v242_v45, 0.0  ;;  %v245_v49 = vsel %vm244_vm2, %v241_v48, 0.0  ;;  %v251_v58 = vsel %vm244_vm2, %v243_v43, 0.0 }
 0x12d   :  { %249 = vadd.xlane.f32.xlu0 %v248_v47 }
 0x133   :  { %246 = vadd.xlane.f32.xlu1 %v245_v49 }
 0x180   :  { %v283_v50 = vpop.permute.xlu0 %282 }
 0x181   :  { %v285_v51 = vpop.permute.xlu1 %284 }
 0x182   :  { %v287_v52 = vsel %vm286_vm3, %v283_v50, %v285_v51 }
 0x183   :  { %v289_v53 = vmul.f32 %v287_v52, %v238_v46  ;;  %v290_v54 = vmul.f32 %v287_v52, %v239_v44  ;;  %v291_v57 = vmul.f32 %v287_v52, %v240_v39 }
 0x185   :  { %v292_v55 = vsel %vm244_vm2, %v289_v53, 0.0  ;;  %v295_v56 = vsel %vm244_vm2, %v290_v54, 0.0  ;;  %v298_v59 = vsel %vm244_vm2, %v291_v57, 0.0 }
 0x186   :  { %293 = vadd.xlane.f32.xlu0 %v292_v55  ;;  %296 = vadd.xlane.f32.xlu1 %v295_v56 }
 0x18a   :  { %252 = vadd.xlane.f32.xlu0 %v251_v58  ;;  %299 = vadd.xlane.f32.xlu1 %v298_v59 }
 0x1ba   :  { %v250_v63 = vpop.xlane.xlu0 %249 }
 0x1bb   :  { %v266_v7 = vrot.slane %v250_v63, %v261_v1 }
 0x1c0   :  { %v247_v0 = vpop.xlane.xlu1 %246 }
 0x1c1   :  { %v262_v4 = vrot.slane %v247_v0, %v261_v1 }
 0x1c3   :  { %v272_v12 = vsel %vm271_vm4, %v266_v7, %v262_v4 }
 0x213   :  { %v294_v2 = vpop.xlane.xlu0 %293  ;;  %v297_v3 = vpop.xlane.xlu1 %296 }
 0x214   :  { %v307_v5 = vrot.slane %v294_v2, %v261_v1  ;;  %v311_v6 = vrot.slane %v297_v3, %v261_v1 }
 0x216   :  { %v316_v13 = vsel %vm271_vm4, %v311_v6, %v307_v5 }
 0x217   :  { %v253_v8 = vpop.xlane.xlu0 %252  ;;  %v300_v9 = vpop.xlane.xlu1 %299 }
 0x218   :  { %v270_v10 = vrot.slane %v253_v8, %v261_v1  ;;  %v315_v11 = vrot.slane %v300_v9, %v261_v1 }
 0x21a   :  { %v274_v14 = vsel %vm273_vm5, %v270_v10, %v272_v12  ;;  %v317_v15 = vsel %vm273_vm5, %v315_v11, %v316_v13 }
 0x21b   :  { %v277_v16 = vsel %vm276_vm6, %v274_v14, 0.0  ;;  %v319_v17 = vsel %vm276_vm6, %v317_v15, 0.0 }
 0x21c   :  { %278 = vadd.xlane.f32.xlu0 %v277_v16  ;;  %320 = vadd.xlane.f32.xlu1 %v319_v17 }
 0x232   :  { %327 = vperm.xlu0 %369, %v324_v18  }
 0x2a9   :  { %v279_v19 = vpop.xlane.xlu0 %278  ;;  %v321_v20 = vpop.xlane.xlu1 %320 }
 0x2aa   :  { %v323_v22 = vsel %vm322_vm7, %v279_v19, %v321_v20 }
 0x2b1   :  { %v328_v21 = vpop.permute.xlu0 %327 }
 0x2b2   :  { %v330_v23 = vadd.f32 %v328_v21, %v323_v22 }
 0x2b4   :  { %332 = vst.msk [vmem:[%s549_s5] sm:$0x7] %vm331_vm8, %v330_v23 }

</bundles_post_ra>
